<compile_context>
chip_gen: v5e
topology: v5e:2x2
jax: 0.10.0
libtpu: 0.0.40
codegen_flags: <defaults>
</compile_context>

<pallas_src>
import functools
import math

import jax
import jax.numpy as jnp
from jax import lax
from jax.experimental import pallas as pl
from jax.experimental.pallas import tpu as pltpu

MATMUL_DTYPE = jnp.bfloat16  # MXU operand dtype; accumulation stays float32


# ----------------------------------------------------------------------------
# In-kernel helpers
# ----------------------------------------------------------------------------
def _layernorm(z, gamma, beta, eps):
    mu = jnp.mean(z, axis=-1, keepdims=True)
    zc = z - mu
    var = jnp.mean(zc * zc, axis=-1, keepdims=True)
    return zc * lax.rsqrt(var + eps) * gamma + beta


def _mm(x, w_ref, b_ref):
    """x @ W + b with bf16 MXU operands and f32 accumulation (W pre-transposed)."""
    return (
        jnp.dot(x.astype(w_ref.dtype), w_ref[...], preferred_element_type=jnp.float32)
        + b_ref[...]
    )


def _softmax_lastdim(x):
    m = jnp.max(x, axis=-1, keepdims=True)
    e = jnp.exp(x - m)
    return e * pl.reciprocal(jnp.sum(e, axis=-1, keepdims=True), approx=True)


# ----------------------------------------------------------------------------
# Single fused kernel: entire decoder layer for a batch tile
# ----------------------------------------------------------------------------
def _decoder_layer_kernel(
    tgt_ref, qpos_ref, mem_ref, refscl_ref,
    wqkv_ref, bqkv_ref,
    wval_ref, bval_ref,
    woa_ref, boa_ref,
    wo_ref, bo_ref,
    w1_ref, b1_ref,
    w2_ref, b2_ref,
    lngb_ref,
    out_ref,
    attn_sc, cross_sc,
    *, nhead, K, eps,
):
    B, Lq, d = tgt_ref.shape          # B = batch tile
    Lv = mem_ref.shape[1]
    hd = d // nhead
    BLq = B * Lq

    tgt = tgt_ref[...].reshape(BLq, d)                 # flattened (B*Lq, d)
    h = tgt + qpos_ref[...].reshape(BLq, d)            # with_pos_embed(tgt, query_pos)

    # ---------------- self attention (RelationAttention) ----------------
    # Fused Q/K/V projection; 1/sqrt(hd) already folded into the Q columns.
    qkv = _mm(h, wqkv_ref, bqkv_ref)                   # (B*Lq, 3d) f32
    qkv3 = qkv.reshape(B, Lq, 3 * d)
    for hh in range(nhead):                            # static unroll over heads
        qh = qkv3[:, :, hh * hd:(hh + 1) * hd].astype(MATMUL_DTYPE)
        kh = qkv3[:, :, d + hh * hd:d + (hh + 1) * hd].astype(MATMUL_DTYPE)
        vh = qkv3[:, :, 2 * d + hh * hd:2 * d + (hh + 1) * hd].astype(MATMUL_DTYPE)
        # scores: contract head dim of both operands, no explicit transpose
        s = lax.dot_general(qh, kh, (((2,), (2,)), ((0,), (0,))),
                            preferred_element_type=jnp.float32)   # (B, Lq, Lq)
        p = _softmax_lastdim(s)
        o = lax.dot_general(p.astype(MATMUL_DTYPE), vh,
                            (((2,), (1,)), ((0,), (0,))),
                            preferred_element_type=jnp.float32)   # (B, Lq, hd)
        attn_sc[:, hh * hd:(hh + 1) * hd] = o.reshape(BLq, hd)

    tgt2 = attn_sc[...] + h                            # residual inside RelationAttention

    g1 = lngb_ref[0:1, :]; be1 = lngb_ref[1:2, :]
    g2 = lngb_ref[2:3, :]; be2 = lngb_ref[3:4, :]
    g3 = lngb_ref[4:5, :]; be3 = lngb_ref[5:6, :]

    tgt_n1 = _layernorm(tgt + tgt2, g1, be1, eps)      # norm1(tgt + dropout1(tgt2))

    # -------- deformable cross attention (query = tgt2, value = memory) --------
    v = _mm(mem_ref[...].reshape(B * Lv, d), wval_ref, bval_ref)   # value projection
    v3 = v.reshape(B, Lv, d)
    oa = _mm(tgt2, woa_ref, boa_ref).reshape(B, Lq, 2 * nhead * K)  # fused off + attn-w

    refscl = refscl_ref[...]                           # (B, Lq, 2)
    base = refscl[:, :, 0:1]                           # ref * (Lv-1)        (pixel space)
    scale = refscl[:, :, 1:2]                          # (Lv-1)/snippet_num  (pixel space)
    lane = lax.broadcasted_iota(jnp.int32, (B, Lq, Lv), 2)

    for hh in range(nhead):                            # static unroll over heads
        off_h = oa[:, :, hh * K:(hh + 1) * K]                                   # (B, Lq, K)
        aw_h = oa[:, :, nhead * K + hh * K:nhead * K + (hh + 1) * K]            # (B, Lq, K)
        a = _softmax_lastdim(aw_h)                     # softmax over sampling points

        x = base + off_h * scale                       # pixel coordinate (align_corners=True)
        x0 = jnp.floor(x)
        whi = a * (x - x0)                             # attn * upper interpolation weight
        wlo = a - whi                                  # attn * lower interpolation weight
        x0i = x0.astype(jnp.int32)

        # Combined interpolation + attention weights C (B, Lq, Lv), zeros padding OOB.
        # `lane == x0` can only be true for 0 <= x0 <= Lv-1, so no bounds checks needed.
        C = jnp.zeros((B, Lq, Lv), jnp.float32)
        for k in range(K):                             # K is a small static constant
            x0k = x0i[:, :, k:k + 1]
            C = C + jnp.where(lane == x0k, wlo[:, :, k:k + 1], 0.0)
            C = C + jnp.where(lane == x0k + 1, whi[:, :, k:k + 1], 0.0)

        vh = v3[:, :, hh * hd:(hh + 1) * hd].astype(MATMUL_DTYPE)               # (B, Lv, hd)
        o = lax.dot_general(C.astype(MATMUL_DTYPE), vh,
                            (((2,), (1,)), ((0,), (0,))),
                            preferred_element_type=jnp.float32)                 # (B, Lq, hd)
        cross_sc[:, hh * hd:(hh + 1) * hd] = o.reshape(BLq, hd)

    cross = _mm(cross_sc[...], wo_ref, bo_ref)         # out_proj
    tgt_n2 = _layernorm(tgt_n1 + cross, g2, be2, eps)  # norm2

    # ---------------- feed-forward (linear1 -> relu -> linear2) + norm3 --------
    hidden = jnp.maximum(_mm(tgt_n2, w1_ref, b1_ref), 0.0)
    ff = _mm(hidden, w2_ref, b2_ref)
    out_ref[...] = _layernorm(tgt_n2 + ff, g3, be3, eps).reshape(B, Lq, d)


# ----------------------------------------------------------------------------
# Host-side wrapper
# ----------------------------------------------------------------------------
def prepare_params(params, *, nhead):
    """One-time weight prep: transpose to (Din, Dout), fuse QKV and off/aw,
    fold 1/sqrt(head_dim) into Q, cast matmul weights to bf16, pack LN params."""
    sa = params["self_attn"]
    ca = params["cross_attn"]
    wd = MATMUL_DTYPE
    d = sa["Wq"].shape[0]
    qs = 1.0 / math.sqrt(d // nhead)                   # folded score scale
    return {
        "wqkv_t": jnp.concatenate([sa["Wq"].T * qs, sa["Wk"].T, sa["Wv"].T], axis=1).astype(wd),
        "bqkv": jnp.concatenate([sa["bq"] * qs, sa["bk"], sa["bv"]]).reshape(1, -1),
        "wval_t": ca["Wval"].T.astype(wd),
        "bval": ca["bval"].reshape(1, -1),
        "woa_t": jnp.concatenate([ca["Woff"].T, ca["Waw"].T], axis=1).astype(wd),
        "boa": jnp.concatenate([ca["boff"], ca["baw"]]).reshape(1, -1),
        "wo_t": ca["Wo"].T.astype(wd),
        "bo": ca["bo"].reshape(1, -1),
        "w1_t": params["W1"].T.astype(wd),
        "b1": params["b1"].reshape(1, -1),
        "w2_t": params["W2"].T.astype(wd),
        "b2": params["b2"].reshape(1, -1),
        "ln_gb": jnp.stack(
            [params["ln1_g"], params["ln1_b"],
             params["ln2_g"], params["ln2_b"],
             params["ln3_g"], params["ln3_b"]], axis=0),
    }


def transformer_decoder_layer(tgt, memory, query_pos, reference_point, snippet_num,
                              prepared, *, nhead, K, eps=1e-5, batch_tile=None):
    """tgt/memory/query_pos: sequence-first (L, B, D) float32, as in PyTorch."""
    Lq, bz, d = tgt.shape
    Lv = memory.shape[0]
    hd = d // nhead
    HK2 = 2 * nhead * K
    F = prepared["w1_t"].shape[1]

    if batch_tile is None:
        batch_tile = bz                  # demo: fold the whole batch into one grid step
    assert bz % batch_tile == 0
    nb = bz // batch_tile                # on v7x with small bz, pick batch_tile = bz // 2

    qp = jnp.zeros_like(tgt) if query_pos is None else query_pos

    # batch-major layouts for the kernel (single cheap transpose each)
    tgt_b = jnp.transpose(tgt, (1, 0, 2))
    qpos_b = jnp.transpose(qp, (1, 0, 2))
    mem_b = jnp.transpose(memory, (1, 0, 2))

    # Pixel-space sample coordinate:  x = ref*(Lv-1) + offset*(Lv-1)/snippet_num
    # (equivalent to the reference's [-1,1] grid coords with align_corners=True).
    base = reference_point.reshape(bz, Lq, 1).astype(jnp.float32) * (Lv - 1.0)
    scale = jnp.broadcast_to(
        ((Lv - 1.0) / snippet_num.astype(jnp.float32)).reshape(bz, 1, 1), (bz, Lq, 1))
    refscl = jnp.concatenate([base, scale], axis=-1)   # merged (bz, Lq, 2) stream

    b_map = lambda b: (b, 0, 0)
    w_map = lambda b: (0, 0)

    # Advisory cost estimate for XLA scheduling around the fused call.
    flops = int(2 * bz * (
        Lq * d * 3 * d + Lv * d * d + Lq * d * HK2 + Lq * d * d + 2 * Lq * d * F
        + nhead * (2 * Lq * Lq * hd + Lq * Lv * hd)))
    transcend = int(bz * nhead * Lq * (Lq + K))
    weight_bytes = sum(int(v.size) * v.dtype.itemsize for v in prepared.values())
    bytes_accessed = int(weight_bytes + 4 * (tgt_b.size + qpos_b.size + mem_b.size
                                             + refscl.size + bz * Lq * d))

    out = pl.pallas_call(
        functools.partial(_decoder_layer_kernel, nhead=nhead, K=K, eps=eps),
        grid=(nb,),
        in_specs=[
            pl.BlockSpec((batch_tile, Lq, d), b_map),    # tgt
            pl.BlockSpec((batch_tile, Lq, d), b_map),    # query_pos
            pl.BlockSpec((batch_tile, Lv, d), b_map),    # memory
            pl.BlockSpec((batch_tile, Lq, 2), b_map),    # [base, scale] pixel coords
            pl.BlockSpec((d, 3 * d), w_map),             # fused QKV weight (resident)
            pl.BlockSpec((1, 3 * d), w_map),             # fused QKV bias
            pl.BlockSpec((d, d), w_map),                 # value_proj weight
            pl.BlockSpec((1, d), w_map),                 # value_proj bias
            pl.BlockSpec((d, HK2), w_map),               # fused sampling_offsets + atten_weight W
            pl.BlockSpec((1, HK2), w_map),               # fused sampling_offsets + atten_weight b
            pl.BlockSpec((d, d), w_map),                 # out_proj weight
            pl.BlockSpec((1, d), w_map),                 # out_proj bias
            pl.BlockSpec((d, F), w_map),                 # linear1 weight
            pl.BlockSpec((1, F), w_map),                 # linear1 bias
            pl.BlockSpec((F, d), w_map),                 # linear2 weight
            pl.BlockSpec((1, d), w_map),                 # linear2 bias
            pl.BlockSpec((6, d), w_map),                 # packed LayerNorm gammas / betas
        ],
        out_specs=pl.BlockSpec((batch_tile, Lq, d), b_map),
        out_shape=jax.ShapeDtypeStruct((bz, Lq, d), jnp.float32),
        scratch_shapes=[
            pltpu.VMEM((batch_tile * Lq, d), jnp.float32),   # self-attn head accumulator
            pltpu.VMEM((batch_tile * Lq, d), jnp.float32),   # cross-attn head accumulator
        ],
        compiler_params=pltpu.CompilerParams(
            dimension_semantics=("parallel",),      # batch-tile axis -> megacore / 2nd TC
            vmem_limit_bytes=32 * 1024 * 1024,      # keep headroom for v7x's 64 MiB VMEM
        ),
        cost_estimate=pl.CostEstimate(flops=flops, transcendentals=transcend,
                                      bytes_accessed=bytes_accessed),
    )(
        tgt_b, qpos_b, mem_b, refscl,
        prepared["wqkv_t"], prepared["bqkv"],
        prepared["wval_t"], prepared["bval"],
        prepared["woa_t"], prepared["boa"],
        prepared["wo_t"], prepared["bo"],
        prepared["w1_t"], prepared["b1"],
        prepared["w2_t"], prepared["b2"],
        prepared["ln_gb"],
    )
    return jnp.transpose(out, (1, 0, 2))   # back to (Lq, bz, d)


# ----------------------------------------------------------------------------
# Deterministic parameter init (synthetic, PyTorch nn.Linear layout)
# ----------------------------------------------------------------------------
def init_params(key, d_model, nhead, dim_ff, K):
    keys = jax.random.split(key, 12)

    def lin(k, out_dim, in_dim, scale=0.05):
        kw, kb = jax.random.split(k)
        w = jax.random.normal(kw, (out_dim, in_dim), jnp.float32) * scale
        b = jax.random.normal(kb, (out_dim,), jnp.float32) * scale
        return w, b

    p = {}
    self_attn = {}
    self_attn["Wq"], self_attn["bq"] = lin(keys[0], d_model, d_model)
    self_attn["Wk"], self_attn["bk"] = lin(keys[1], d_model, d_model)
    self_attn["Wv"], self_attn["bv"] = lin(keys[2], d_model, d_model)
    p["self_attn"] = self_attn

    cross = {}
    cross["Wval"], cross["bval"] = lin(keys[3], d_model, d_model)
    cross["Woff"], cross["boff"] = lin(keys[4], nhead * K, d_model)
    cross["Waw"], cross["baw"] = lin(keys[5], nhead * K, d_model)
    cross["Wo"], cross["bo"] = lin(keys[6], d_model, d_model)
    p["cross_attn"] = cross

    p["W1"], p["b1"] = lin(keys[7], dim_ff, d_model)
    p["W2"], p["b2"] = lin(keys[8], d_model, dim_ff)

    for name in ("ln1", "ln2", "ln3"):   # default LayerNorm init
        p[f"{name}_g"] = jnp.ones((d_model,), jnp.float32)
        p[f"{name}_b"] = jnp.zeros((d_model,), jnp.float32)
    return p


# ----------------------------------------------------------------------------
if __name__ == "__main__":
    d_model, nhead, dim_ff, Ksamp = 32, 4, 64, 3
    Lq, Lv, bz = 8, 16, 2

    key = jax.random.PRNGKey(0)
    k1, k2, k3, k4, kp = jax.random.split(key, 5)
    tgt = jax.random.normal(k1, (Lq, bz, d_model), jnp.float32)
    memory = jax.random.normal(k2, (Lv, bz, d_model), jnp.float32)
    query_pos = jax.random.normal(k3, (Lq, bz, d_model), jnp.float32) * 0.1
    reference_point = jax.random.uniform(k4, (bz, Lq, 1), jnp.float32)   # last dim == 1
    snippet_num = jnp.full((bz,), float(Lv), jnp.float32)

    params = init_params(kp, d_model, nhead, dim_ff, Ksamp)
    prepared = prepare_params(params, nhead=nhead)   # one-time transpose/fuse/scale-fold/bf16

    fwd = jax.jit(functools.partial(transformer_decoder_layer, nhead=nhead, K=Ksamp))
    out = fwd(tgt, memory, query_pos, reference_point, snippet_num, prepared)
    out = jax.block_until_ready(out)

    assert out.shape == (Lq, bz, d_model)
    assert bool(jnp.all(jnp.isfinite(out)))
    print("KERNEL_OK")
</pallas_src>

<mosaic_0001>
module attributes {stable_mosaic.version = 11 : i64} {
  func.func @_decoder_layer_kernel(%arg0: i32, %arg1: memref<2x8x32xf32, #tpu.memory_space<vmem>>, %arg2: memref<2x8x32xf32, #tpu.memory_space<vmem>>, %arg3: memref<2x16x32xf32, #tpu.memory_space<vmem>>, %arg4: memref<2x8x2xf32, #tpu.memory_space<vmem>>, %arg5: memref<32x96xbf16, #tpu.memory_space<vmem>>, %arg6: memref<1x96xf32, #tpu.memory_space<vmem>>, %arg7: memref<32x32xbf16, #tpu.memory_space<vmem>>, %arg8: memref<1x32xf32, #tpu.memory_space<vmem>>, %arg9: memref<32x24xbf16, #tpu.memory_space<vmem>>, %arg10: memref<1x24xf32, #tpu.memory_space<vmem>>, %arg11: memref<32x32xbf16, #tpu.memory_space<vmem>>, %arg12: memref<1x32xf32, #tpu.memory_space<vmem>>, %arg13: memref<32x64xbf16, #tpu.memory_space<vmem>>, %arg14: memref<1x64xf32, #tpu.memory_space<vmem>>, %arg15: memref<64x32xbf16, #tpu.memory_space<vmem>>, %arg16: memref<1x32xf32, #tpu.memory_space<vmem>>, %arg17: memref<6x32xf32, #tpu.memory_space<vmem>>, %arg18: memref<2x8x32xf32, #tpu.memory_space<vmem>>, %arg19: memref<16x32xf32, #tpu.memory_space<vmem>>, %arg20: memref<16x32xf32, #tpu.memory_space<vmem>>) attributes {dimension_semantics = [#tpu.dimension_semantics<parallel>], iteration_bounds = array<i64: 1>, scalar_prefetch = 0 : i64, scratch_operands = 2 : i64, tpu.core_type = #tpu.core_type<tc>, window_params = [{transform_indices = @transform_0, window_bounds = array<i64: 2, 8, 32>}, {transform_indices = @transform_1, window_bounds = array<i64: 2, 8, 32>}, {transform_indices = @transform_2, window_bounds = array<i64: 2, 16, 32>}, {transform_indices = @transform_3, window_bounds = array<i64: 2, 8, 2>}, {pipeline_mode = #tpu.pipeline_mode<synchronous>, transform_indices = @transform_4, window_bounds = array<i64: 32, 96>}, {pipeline_mode = #tpu.pipeline_mode<synchronous>, transform_indices = @transform_5, window_bounds = array<i64: 1, 96>}, {pipeline_mode = #tpu.pipeline_mode<synchronous>, transform_indices = @transform_6, window_bounds = array<i64: 32, 32>}, {pipeline_mode = #tpu.pipeline_mode<synchronous>, transform_indices = @transform_7, window_bounds = array<i64: 1, 32>}, {pipeline_mode = #tpu.pipeline_mode<synchronous>, transform_indices = @transform_8, window_bounds = array<i64: 32, 24>}, {pipeline_mode = #tpu.pipeline_mode<synchronous>, transform_indices = @transform_9, window_bounds = array<i64: 1, 24>}, {pipeline_mode = #tpu.pipeline_mode<synchronous>, transform_indices = @transform_10, window_bounds = array<i64: 32, 32>}, {pipeline_mode = #tpu.pipeline_mode<synchronous>, transform_indices = @transform_11, window_bounds = array<i64: 1, 32>}, {pipeline_mode = #tpu.pipeline_mode<synchronous>, transform_indices = @transform_12, window_bounds = array<i64: 32, 64>}, {pipeline_mode = #tpu.pipeline_mode<synchronous>, transform_indices = @transform_13, window_bounds = array<i64: 1, 64>}, {pipeline_mode = #tpu.pipeline_mode<synchronous>, transform_indices = @transform_14, window_bounds = array<i64: 64, 32>}, {pipeline_mode = #tpu.pipeline_mode<synchronous>, transform_indices = @transform_15, window_bounds = array<i64: 1, 32>}, {pipeline_mode = #tpu.pipeline_mode<synchronous>, transform_indices = @transform_16, window_bounds = array<i64: 6, 32>}, {transform_indices = @transform_17, window_bounds = array<i64: 2, 8, 32>}]} {
    %c0 = arith.constant 0 : index
    %c0_0 = arith.constant 0 : index
    %c0_1 = arith.constant 0 : index
    %0 = vector.load %arg1[%c0, %c0_0, %c0_1] : memref<2x8x32xf32, #tpu.memory_space<vmem>>, vector<2x8x32xf32>
    %1 = vector.shape_cast %0 : vector<2x8x32xf32> to vector<16x32xf32>
    %c0_2 = arith.constant 0 : index
    %c0_3 = arith.constant 0 : index
    %c0_4 = arith.constant 0 : index
    %2 = vector.load %arg2[%c0_2, %c0_3, %c0_4] : memref<2x8x32xf32, #tpu.memory_space<vmem>>, vector<2x8x32xf32>
    %3 = vector.shape_cast %2 : vector<2x8x32xf32> to vector<16x32xf32>
    %4 = arith.addf %1, %3 : vector<16x32xf32>
    %5 = arith.truncf %4 : vector<16x32xf32> to vector<16x32xbf16>
    %c0_5 = arith.constant 0 : index
    %c0_6 = arith.constant 0 : index
    %6 = vector.load %arg5[%c0_5, %c0_6] : memref<32x96xbf16, #tpu.memory_space<vmem>>, vector<32x96xbf16>
    %cst = arith.constant dense<0.000000e+00> : vector<16x96xf32>
    %7 = tpu.matmul %5, %6, %cst {dimension_numbers = #tpu.dot_dimension_numbers<[1], [0], [0], [1], [0, 0, 1, 1], [], []>} : vector<16x32xbf16>, vector<32x96xbf16>, vector<16x96xf32> -> vector<16x96xf32>
    %c0_7 = arith.constant 0 : index
    %c0_8 = arith.constant 0 : index
    %8 = vector.load %arg6[%c0_7, %c0_8] : memref<1x96xf32, #tpu.memory_space<vmem>>, vector<1x96xf32>
    %9 = vector.broadcast %8 : vector<1x96xf32> to vector<16x96xf32>
    %10 = arith.addf %7, %9 : vector<16x96xf32>
    %11 = vector.shape_cast %10 : vector<16x96xf32> to vector<2x8x96xf32>
    %12 = vector.extract_strided_slice %11 {offsets = [0, 0, 0], sizes = [2, 8, 8], strides = [1, 1, 1]} : vector<2x8x96xf32> to vector<2x8x8xf32>
    %13 = arith.truncf %12 : vector<2x8x8xf32> to vector<2x8x8xbf16>
    %14 = vector.extract_strided_slice %11 {offsets = [0, 0, 32], sizes = [2, 8, 8], strides = [1, 1, 1]} : vector<2x8x96xf32> to vector<2x8x8xf32>
    %15 = arith.truncf %14 : vector<2x8x8xf32> to vector<2x8x8xbf16>
    %16 = vector.extract_strided_slice %11 {offsets = [0, 0, 64], sizes = [2, 8, 8], strides = [1, 1, 1]} : vector<2x8x96xf32> to vector<2x8x8xf32>
    %17 = arith.truncf %16 : vector<2x8x8xf32> to vector<2x8x8xbf16>
    %cst_9 = arith.constant dense<0.000000e+00> : vector<2x8x8xf32>
    %18 = tpu.matmul %13, %15, %cst_9 {dimension_numbers = #tpu.dot_dimension_numbers<[2], [2], [1], [1], [0, 0, 0, 1, 1, 1], [0], [0]>} : vector<2x8x8xbf16>, vector<2x8x8xbf16>, vector<2x8x8xf32> -> vector<2x8x8xf32>
    %cst_10 = arith.constant dense<0xFF800000> : vector<2x8xf32>
    %19 = vector.multi_reduction <maximumf>, %18, %cst_10 [2] : vector<2x8x8xf32> to vector<2x8xf32>
    %20 = vector.shape_cast %19 : vector<2x8xf32> to vector<2x8x1xf32>
    %21 = vector.broadcast %20 : vector<2x8x1xf32> to vector<2x8x8xf32>
    %22 = arith.subf %18, %21 : vector<2x8x8xf32>
    %23 = math.exp %22 : vector<2x8x8xf32>
    %cst_11 = arith.constant dense<0.000000e+00> : vector<2x8xf32>
    %24 = vector.multi_reduction <add>, %23, %cst_11 [2] : vector<2x8x8xf32> to vector<2x8xf32>
    %25 = vector.shape_cast %24 : vector<2x8xf32> to vector<2x8x1xf32>
    %26 = tpu.reciprocal %25 {approx = true} : vector<2x8x1xf32> -> vector<2x8x1xf32>
    %27 = vector.broadcast %26 : vector<2x8x1xf32> to vector<2x8x8xf32>
    %28 = arith.mulf %23, %27 : vector<2x8x8xf32>
    %29 = arith.truncf %28 : vector<2x8x8xf32> to vector<2x8x8xbf16>
    %cst_12 = arith.constant dense<0.000000e+00> : vector<2x8x8xf32>
    %30 = tpu.matmul %29, %17, %cst_12 {dimension_numbers = #tpu.dot_dimension_numbers<[2], [1], [1], [2], [0, 0, 0, 1, 1, 2], [0], [0]>} : vector<2x8x8xbf16>, vector<2x8x8xbf16>, vector<2x8x8xf32> -> vector<2x8x8xf32>
    %31 = vector.shape_cast %30 : vector<2x8x8xf32> to vector<16x8xf32>
    %c0_13 = arith.constant 0 : index
    %c0_14 = arith.constant 0 : index
    %32 = vector.load %arg19[%c0_13, %c0_14] : memref<16x32xf32, #tpu.memory_space<vmem>>, vector<16x8xf32>
    tpu.vector_store %arg19[%c0_13, %c0_14], %31 {strides = array<i32>} : memref<16x32xf32, #tpu.memory_space<vmem>>, vector<16x8xf32>,
    %33 = vector.extract_strided_slice %11 {offsets = [0, 0, 8], sizes = [2, 8, 8], strides = [1, 1, 1]} : vector<2x8x96xf32> to vector<2x8x8xf32>
    %34 = arith.truncf %33 : vector<2x8x8xf32> to vector<2x8x8xbf16>
    %35 = vector.extract_strided_slice %11 {offsets = [0, 0, 40], sizes = [2, 8, 8], strides = [1, 1, 1]} : vector<2x8x96xf32> to vector<2x8x8xf32>
    %36 = arith.truncf %35 : vector<2x8x8xf32> to vector<2x8x8xbf16>
    %37 = vector.extract_strided_slice %11 {offsets = [0, 0, 72], sizes = [2, 8, 8], strides = [1, 1, 1]} : vector<2x8x96xf32> to vector<2x8x8xf32>
    %38 = arith.truncf %37 : vector<2x8x8xf32> to vector<2x8x8xbf16>
    %cst_15 = arith.constant dense<0.000000e+00> : vector<2x8x8xf32>
    %39 = tpu.matmul %34, %36, %cst_15 {dimension_numbers = #tpu.dot_dimension_numbers<[2], [2], [1], [1], [0, 0, 0, 1, 1, 1], [0], [0]>} : vector<2x8x8xbf16>, vector<2x8x8xbf16>, vector<2x8x8xf32> -> vector<2x8x8xf32>
    %cst_16 = arith.constant dense<0xFF800000> : vector<2x8xf32>
    %40 = vector.multi_reduction <maximumf>, %39, %cst_16 [2] : vector<2x8x8xf32> to vector<2x8xf32>
    %41 = vector.shape_cast %40 : vector<2x8xf32> to vector<2x8x1xf32>
    %42 = vector.broadcast %41 : vector<2x8x1xf32> to vector<2x8x8xf32>
    %43 = arith.subf %39, %42 : vector<2x8x8xf32>
    %44 = math.exp %43 : vector<2x8x8xf32>
    %cst_17 = arith.constant dense<0.000000e+00> : vector<2x8xf32>
    %45 = vector.multi_reduction <add>, %44, %cst_17 [2] : vector<2x8x8xf32> to vector<2x8xf32>
    %46 = vector.shape_cast %45 : vector<2x8xf32> to vector<2x8x1xf32>
    %47 = tpu.reciprocal %46 {approx = true} : vector<2x8x1xf32> -> vector<2x8x1xf32>
    %48 = vector.broadcast %47 : vector<2x8x1xf32> to vector<2x8x8xf32>
    %49 = arith.mulf %44, %48 : vector<2x8x8xf32>
    %50 = arith.truncf %49 : vector<2x8x8xf32> to vector<2x8x8xbf16>
    %cst_18 = arith.constant dense<0.000000e+00> : vector<2x8x8xf32>
    %51 = tpu.matmul %50, %38, %cst_18 {dimension_numbers = #tpu.dot_dimension_numbers<[2], [1], [1], [2], [0, 0, 0, 1, 1, 2], [0], [0]>} : vector<2x8x8xbf16>, vector<2x8x8xbf16>, vector<2x8x8xf32> -> vector<2x8x8xf32>
    %52 = vector.shape_cast %51 : vector<2x8x8xf32> to vector<16x8xf32>
    %c0_19 = arith.constant 0 : index
    %c8 = arith.constant 8 : index
    %53 = vector.load %arg19[%c0_19, %c8] : memref<16x32xf32, #tpu.memory_space<vmem>>, vector<16x8xf32>
    tpu.vector_store %arg19[%c0_19, %c8], %52 {strides = array<i32>} : memref<16x32xf32, #tpu.memory_space<vmem>>, vector<16x8xf32>,
    %54 = vector.extract_strided_slice %11 {offsets = [0, 0, 16], sizes = [2, 8, 8], strides = [1, 1, 1]} : vector<2x8x96xf32> to vector<2x8x8xf32>
    %55 = arith.truncf %54 : vector<2x8x8xf32> to vector<2x8x8xbf16>
    %56 = vector.extract_strided_slice %11 {offsets = [0, 0, 48], sizes = [2, 8, 8], strides = [1, 1, 1]} : vector<2x8x96xf32> to vector<2x8x8xf32>
    %57 = arith.truncf %56 : vector<2x8x8xf32> to vector<2x8x8xbf16>
    %58 = vector.extract_strided_slice %11 {offsets = [0, 0, 80], sizes = [2, 8, 8], strides = [1, 1, 1]} : vector<2x8x96xf32> to vector<2x8x8xf32>
    %59 = arith.truncf %58 : vector<2x8x8xf32> to vector<2x8x8xbf16>
    %cst_20 = arith.constant dense<0.000000e+00> : vector<2x8x8xf32>
    %60 = tpu.matmul %55, %57, %cst_20 {dimension_numbers = #tpu.dot_dimension_numbers<[2], [2], [1], [1], [0, 0, 0, 1, 1, 1], [0], [0]>} : vector<2x8x8xbf16>, vector<2x8x8xbf16>, vector<2x8x8xf32> -> vector<2x8x8xf32>
    %cst_21 = arith.constant dense<0xFF800000> : vector<2x8xf32>
    %61 = vector.multi_reduction <maximumf>, %60, %cst_21 [2] : vector<2x8x8xf32> to vector<2x8xf32>
    %62 = vector.shape_cast %61 : vector<2x8xf32> to vector<2x8x1xf32>
    %63 = vector.broadcast %62 : vector<2x8x1xf32> to vector<2x8x8xf32>
    %64 = arith.subf %60, %63 : vector<2x8x8xf32>
    %65 = math.exp %64 : vector<2x8x8xf32>
    %cst_22 = arith.constant dense<0.000000e+00> : vector<2x8xf32>
    %66 = vector.multi_reduction <add>, %65, %cst_22 [2] : vector<2x8x8xf32> to vector<2x8xf32>
    %67 = vector.shape_cast %66 : vector<2x8xf32> to vector<2x8x1xf32>
    %68 = tpu.reciprocal %67 {approx = true} : vector<2x8x1xf32> -> vector<2x8x1xf32>
    %69 = vector.broadcast %68 : vector<2x8x1xf32> to vector<2x8x8xf32>
    %70 = arith.mulf %65, %69 : vector<2x8x8xf32>
    %71 = arith.truncf %70 : vector<2x8x8xf32> to vector<2x8x8xbf16>
    %cst_23 = arith.constant dense<0.000000e+00> : vector<2x8x8xf32>
    %72 = tpu.matmul %71, %59, %cst_23 {dimension_numbers = #tpu.dot_dimension_numbers<[2], [1], [1], [2], [0, 0, 0, 1, 1, 2], [0], [0]>} : vector<2x8x8xbf16>, vector<2x8x8xbf16>, vector<2x8x8xf32> -> vector<2x8x8xf32>
    %73 = vector.shape_cast %72 : vector<2x8x8xf32> to vector<16x8xf32>
    %c0_24 = arith.constant 0 : index
    %c16 = arith.constant 16 : index
    %74 = vector.load %arg19[%c0_24, %c16] : memref<16x32xf32, #tpu.memory_space<vmem>>, vector<16x8xf32>
    tpu.vector_store %arg19[%c0_24, %c16], %73 {strides = array<i32>} : memref<16x32xf32, #tpu.memory_space<vmem>>, vector<16x8xf32>,
    %75 = vector.extract_strided_slice %11 {offsets = [0, 0, 24], sizes = [2, 8, 8], strides = [1, 1, 1]} : vector<2x8x96xf32> to vector<2x8x8xf32>
    %76 = arith.truncf %75 : vector<2x8x8xf32> to vector<2x8x8xbf16>
    %77 = vector.extract_strided_slice %11 {offsets = [0, 0, 56], sizes = [2, 8, 8], strides = [1, 1, 1]} : vector<2x8x96xf32> to vector<2x8x8xf32>
    %78 = arith.truncf %77 : vector<2x8x8xf32> to vector<2x8x8xbf16>
    %79 = vector.extract_strided_slice %11 {offsets = [0, 0, 88], sizes = [2, 8, 8], strides = [1, 1, 1]} : vector<2x8x96xf32> to vector<2x8x8xf32>
    %80 = arith.truncf %79 : vector<2x8x8xf32> to vector<2x8x8xbf16>
    %cst_25 = arith.constant dense<0.000000e+00> : vector<2x8x8xf32>
    %81 = tpu.matmul %76, %78, %cst_25 {dimension_numbers = #tpu.dot_dimension_numbers<[2], [2], [1], [1], [0, 0, 0, 1, 1, 1], [0], [0]>} : vector<2x8x8xbf16>, vector<2x8x8xbf16>, vector<2x8x8xf32> -> vector<2x8x8xf32>
    %cst_26 = arith.constant dense<0xFF800000> : vector<2x8xf32>
    %82 = vector.multi_reduction <maximumf>, %81, %cst_26 [2] : vector<2x8x8xf32> to vector<2x8xf32>
    %83 = vector.shape_cast %82 : vector<2x8xf32> to vector<2x8x1xf32>
    %84 = vector.broadcast %83 : vector<2x8x1xf32> to vector<2x8x8xf32>
    %85 = arith.subf %81, %84 : vector<2x8x8xf32>
    %86 = math.exp %85 : vector<2x8x8xf32>
    %cst_27 = arith.constant dense<0.000000e+00> : vector<2x8xf32>
    %87 = vector.multi_reduction <add>, %86, %cst_27 [2] : vector<2x8x8xf32> to vector<2x8xf32>
    %88 = vector.shape_cast %87 : vector<2x8xf32> to vector<2x8x1xf32>
    %89 = tpu.reciprocal %88 {approx = true} : vector<2x8x1xf32> -> vector<2x8x1xf32>
    %90 = vector.broadcast %89 : vector<2x8x1xf32> to vector<2x8x8xf32>
    %91 = arith.mulf %86, %90 : vector<2x8x8xf32>
    %92 = arith.truncf %91 : vector<2x8x8xf32> to vector<2x8x8xbf16>
    %cst_28 = arith.constant dense<0.000000e+00> : vector<2x8x8xf32>
    %93 = tpu.matmul %92, %80, %cst_28 {dimension_numbers = #tpu.dot_dimension_numbers<[2], [1], [1], [2], [0, 0, 0, 1, 1, 2], [0], [0]>} : vector<2x8x8xbf16>, vector<2x8x8xbf16>, vector<2x8x8xf32> -> vector<2x8x8xf32>
    %94 = vector.shape_cast %93 : vector<2x8x8xf32> to vector<16x8xf32>
    %c0_29 = arith.constant 0 : index
    %c24 = arith.constant 24 : index
    %95 = vector.load %arg19[%c0_29, %c24] : memref<16x32xf32, #tpu.memory_space<vmem>>, vector<16x8xf32>
    tpu.vector_store %arg19[%c0_29, %c24], %94 {strides = array<i32>} : memref<16x32xf32, #tpu.memory_space<vmem>>, vector<16x8xf32>,
    %c0_30 = arith.constant 0 : index
    %c0_31 = arith.constant 0 : index
    %96 = vector.load %arg19[%c0_30, %c0_31] : memref<16x32xf32, #tpu.memory_space<vmem>>, vector<16x32xf32>
    %97 = arith.addf %96, %4 : vector<16x32xf32>
    %c0_32 = arith.constant 0 : index
    %c0_33 = arith.constant 0 : index
    %98 = vector.load %arg17[%c0_32, %c0_33] : memref<6x32xf32, #tpu.memory_space<vmem>>, vector<1x32xf32>
    %c1 = arith.constant 1 : index
    %c0_34 = arith.constant 0 : index
    %99 = vector.load %arg17[%c1, %c0_34] : memref<6x32xf32, #tpu.memory_space<vmem>>, vector<1x32xf32>
    %c2 = arith.constant 2 : index
    %c0_35 = arith.constant 0 : index
    %100 = vector.load %arg17[%c2, %c0_35] : memref<6x32xf32, #tpu.memory_space<vmem>>, vector<1x32xf32>
    %c3 = arith.constant 3 : index
    %c0_36 = arith.constant 0 : index
    %101 = vector.load %arg17[%c3, %c0_36] : memref<6x32xf32, #tpu.memory_space<vmem>>, vector<1x32xf32>
    %c4 = arith.constant 4 : index
    %c0_37 = arith.constant 0 : index
    %102 = vector.load %arg17[%c4, %c0_37] : memref<6x32xf32, #tpu.memory_space<vmem>>, vector<1x32xf32>
    %c5 = arith.constant 5 : index
    %c0_38 = arith.constant 0 : index
    %103 = vector.load %arg17[%c5, %c0_38] : memref<6x32xf32, #tpu.memory_space<vmem>>, vector<1x32xf32>
    %104 = arith.addf %1, %97 : vector<16x32xf32>
    %cst_39 = arith.constant dense<0.000000e+00> : vector<16xf32>
    %105 = vector.multi_reduction <add>, %104, %cst_39 [1] : vector<16x32xf32> to vector<16xf32>
    %106 = vector.shape_cast %105 : vector<16xf32> to vector<16x1xf32>
    %cst_40 = arith.constant 3.200000e+01 : f32
    %107 = vector.broadcast %cst_40 : f32 to vector<16x1xf32>
    %108 = arith.divf %106, %107 : vector<16x1xf32>
    %109 = vector.broadcast %108 : vector<16x1xf32> to vector<16x32xf32>
    %110 = arith.subf %104, %109 : vector<16x32xf32>
    %111 = arith.mulf %110, %110 : vector<16x32xf32>
    %cst_41 = arith.constant dense<0.000000e+00> : vector<16xf32>
    %112 = vector.multi_reduction <add>, %111, %cst_41 [1] : vector<16x32xf32> to vector<16xf32>
    %113 = vector.shape_cast %112 : vector<16xf32> to vector<16x1xf32>
    %cst_42 = arith.constant 3.200000e+01 : f32
    %114 = vector.broadcast %cst_42 : f32 to vector<16x1xf32>
    %115 = arith.divf %113, %114 : vector<16x1xf32>
    %cst_43 = arith.constant 9.99999974E-6 : f32
    %116 = vector.broadcast %cst_43 : f32 to vector<16x1xf32>
    %117 = arith.addf %115, %116 : vector<16x1xf32>
    %118 = math.rsqrt %117 : vector<16x1xf32>
    %119 = vector.broadcast %118 : vector<16x1xf32> to vector<16x32xf32>
    %120 = arith.mulf %110, %119 : vector<16x32xf32>
    %121 = vector.broadcast %98 : vector<1x32xf32> to vector<16x32xf32>
    %122 = arith.mulf %120, %121 : vector<16x32xf32>
    %123 = vector.broadcast %99 : vector<1x32xf32> to vector<16x32xf32>
    %124 = arith.addf %122, %123 : vector<16x32xf32>
    %c0_44 = arith.constant 0 : index
    %c0_45 = arith.constant 0 : index
    %c0_46 = arith.constant 0 : index
    %125 = vector.load %arg3[%c0_44, %c0_45, %c0_46] : memref<2x16x32xf32, #tpu.memory_space<vmem>>, vector<2x16x32xf32>
    %126 = vector.shape_cast %125 : vector<2x16x32xf32> to vector<32x32xf32>
    %127 = arith.truncf %126 : vector<32x32xf32> to vector<32x32xbf16>
    %c0_47 = arith.constant 0 : index
    %c0_48 = arith.constant 0 : index
    %128 = vector.load %arg7[%c0_47, %c0_48] : memref<32x32xbf16, #tpu.memory_space<vmem>>, vector<32x32xbf16>
    %cst_49 = arith.constant dense<0.000000e+00> : vector<32x32xf32>
    %129 = tpu.matmul %127, %128, %cst_49 {dimension_numbers = #tpu.dot_dimension_numbers<[1], [0], [0], [1], [0, 0, 1, 1], [], []>} : vector<32x32xbf16>, vector<32x32xbf16>, vector<32x32xf32> -> vector<32x32xf32>
    %c0_50 = arith.constant 0 : index
    %c0_51 = arith.constant 0 : index
    %130 = vector.load %arg8[%c0_50, %c0_51] : memref<1x32xf32, #tpu.memory_space<vmem>>, vector<1x32xf32>
    %131 = vector.broadcast %130 : vector<1x32xf32> to vector<32x32xf32>
    %132 = arith.addf %129, %131 : vector<32x32xf32>
    %133 = vector.shape_cast %132 : vector<32x32xf32> to vector<2x16x32xf32>
    %134 = arith.truncf %97 : vector<16x32xf32> to vector<16x32xbf16>
    %c0_52 = arith.constant 0 : index
    %c0_53 = arith.constant 0 : index
    %135 = vector.load %arg9[%c0_52, %c0_53] : memref<32x24xbf16, #tpu.memory_space<vmem>>, vector<32x24xbf16>
    %cst_54 = arith.constant dense<0.000000e+00> : vector<16x24xf32>
    %136 = tpu.matmul %134, %135, %cst_54 {dimension_numbers = #tpu.dot_dimension_numbers<[1], [0], [0], [1], [0, 0, 1, 1], [], []>} : vector<16x32xbf16>, vector<32x24xbf16>, vector<16x24xf32> -> vector<16x24xf32>
    %c0_55 = arith.constant 0 : index
    %c0_56 = arith.constant 0 : index
    %137 = vector.load %arg10[%c0_55, %c0_56] : memref<1x24xf32, #tpu.memory_space<vmem>>, vector<1x24xf32>
    %138 = vector.broadcast %137 : vector<1x24xf32> to vector<16x24xf32>
    %139 = arith.addf %136, %138 : vector<16x24xf32>
    %140 = vector.shape_cast %139 : vector<16x24xf32> to vector<2x8x24xf32>
    %c0_57 = arith.constant 0 : index
    %c0_58 = arith.constant 0 : index
    %c0_59 = arith.constant 0 : index
    %141 = vector.load %arg4[%c0_57, %c0_58, %c0_59] : memref<2x8x2xf32, #tpu.memory_space<vmem>>, vector<2x8x2xf32>
    %142 = vector.extract_strided_slice %141 {offsets = [0, 0, 0], sizes = [2, 8, 1], strides = [1, 1, 1]} : vector<2x8x2xf32> to vector<2x8x1xf32>
    %143 = vector.extract_strided_slice %141 {offsets = [0, 0, 1], sizes = [2, 8, 1], strides = [1, 1, 1]} : vector<2x8x2xf32> to vector<2x8x1xf32>
    %144 = tpu.iota {dimensions = array<i32: 2>} : vector<2x8x16xi32>
    %145 = vector.extract_strided_slice %140 {offsets = [0, 0, 0], sizes = [2, 8, 3], strides = [1, 1, 1]} : vector<2x8x24xf32> to vector<2x8x3xf32>
    %146 = vector.extract_strided_slice %140 {offsets = [0, 0, 12], sizes = [2, 8, 3], strides = [1, 1, 1]} : vector<2x8x24xf32> to vector<2x8x3xf32>
    %cst_60 = arith.constant dense<0xFF800000> : vector<2x8xf32>
    %147 = vector.multi_reduction <maximumf>, %146, %cst_60 [2] : vector<2x8x3xf32> to vector<2x8xf32>
    %148 = vector.shape_cast %147 : vector<2x8xf32> to vector<2x8x1xf32>
    %149 = vector.broadcast %148 : vector<2x8x1xf32> to vector<2x8x3xf32>
    %150 = arith.subf %146, %149 : vector<2x8x3xf32>
    %151 = math.exp %150 : vector<2x8x3xf32>
    %cst_61 = arith.constant dense<0.000000e+00> : vector<2x8xf32>
    %152 = vector.multi_reduction <add>, %151, %cst_61 [2] : vector<2x8x3xf32> to vector<2x8xf32>
    %153 = vector.shape_cast %152 : vector<2x8xf32> to vector<2x8x1xf32>
    %154 = tpu.reciprocal %153 {approx = true} : vector<2x8x1xf32> -> vector<2x8x1xf32>
    %155 = vector.broadcast %154 : vector<2x8x1xf32> to vector<2x8x3xf32>
    %156 = arith.mulf %151, %155 : vector<2x8x3xf32>
    %157 = vector.broadcast %143 : vector<2x8x1xf32> to vector<2x8x3xf32>
    %158 = arith.mulf %145, %157 : vector<2x8x3xf32>
    %159 = vector.broadcast %142 : vector<2x8x1xf32> to vector<2x8x3xf32>
    %160 = arith.addf %159, %158 : vector<2x8x3xf32>
    %161 = math.floor %160 : vector<2x8x3xf32>
    %162 = arith.subf %160, %161 : vector<2x8x3xf32>
    %163 = arith.mulf %156, %162 : vector<2x8x3xf32>
    %164 = arith.subf %156, %163 : vector<2x8x3xf32>
    %165 = arith.fptosi %161 : vector<2x8x3xf32> to vector<2x8x3xi32>
    %cst_62 = arith.constant 0.000000e+00 : f32
    %166 = vector.broadcast %cst_62 : f32 to vector<2x8x16xf32>
    %167 = vector.extract_strided_slice %165 {offsets = [0, 0, 0], sizes = [2, 8, 1], strides = [1, 1, 1]} : vector<2x8x3xi32> to vector<2x8x1xi32>
    %168 = vector.broadcast %167 : vector<2x8x1xi32> to vector<2x8x16xi32>
    %169 = arith.cmpi eq, %144, %168 : vector<2x8x16xi32>
    %170 = vector.extract_strided_slice %164 {offsets = [0, 0, 0], sizes = [2, 8, 1], strides = [1, 1, 1]} : vector<2x8x3xf32> to vector<2x8x1xf32>
    %cst_63 = arith.constant 0.000000e+00 : f32
    %171 = vector.shape_cast %170 : vector<2x8x1xf32> to vector<2x8x1xf32>
    %172 = vector.broadcast %171 : vector<2x8x1xf32> to vector<2x8x16xf32>
    %173 = vector.broadcast %cst_63 : f32 to vector<2x8x16xf32>
    %174 = arith.select %169, %172, %173 : vector<2x8x16xi1>, vector<2x8x16xf32>
    %175 = arith.addf %166, %174 : vector<2x8x16xf32>
    %c1_i32 = arith.constant 1 : i32
    %176 = vector.broadcast %c1_i32 : i32 to vector<2x8x1xi32>
    %177 = arith.addi %167, %176 : vector<2x8x1xi32>
    %178 = vector.broadcast %177 : vector<2x8x1xi32> to vector<2x8x16xi32>
    %179 = arith.cmpi eq, %144, %178 : vector<2x8x16xi32>
    %180 = vector.extract_strided_slice %163 {offsets = [0, 0, 0], sizes = [2, 8, 1], strides = [1, 1, 1]} : vector<2x8x3xf32> to vector<2x8x1xf32>
    %cst_64 = arith.constant 0.000000e+00 : f32
    %181 = vector.shape_cast %180 : vector<2x8x1xf32> to vector<2x8x1xf32>
    %182 = vector.broadcast %181 : vector<2x8x1xf32> to vector<2x8x16xf32>
    %183 = vector.broadcast %cst_64 : f32 to vector<2x8x16xf32>
    %184 = arith.select %179, %182, %183 : vector<2x8x16xi1>, vector<2x8x16xf32>
    %185 = arith.addf %175, %184 : vector<2x8x16xf32>
    %186 = vector.extract_strided_slice %165 {offsets = [0, 0, 1], sizes = [2, 8, 1], strides = [1, 1, 1]} : vector<2x8x3xi32> to vector<2x8x1xi32>
    %187 = vector.broadcast %186 : vector<2x8x1xi32> to vector<2x8x16xi32>
    %188 = arith.cmpi eq, %144, %187 : vector<2x8x16xi32>
    %189 = vector.extract_strided_slice %164 {offsets = [0, 0, 1], sizes = [2, 8, 1], strides = [1, 1, 1]} : vector<2x8x3xf32> to vector<2x8x1xf32>
    %cst_65 = arith.constant 0.000000e+00 : f32
    %190 = vector.shape_cast %189 : vector<2x8x1xf32> to vector<2x8x1xf32>
    %191 = vector.broadcast %190 : vector<2x8x1xf32> to vector<2x8x16xf32>
    %192 = vector.broadcast %cst_65 : f32 to vector<2x8x16xf32>
    %193 = arith.select %188, %191, %192 : vector<2x8x16xi1>, vector<2x8x16xf32>
    %194 = arith.addf %185, %193 : vector<2x8x16xf32>
    %c1_i32_66 = arith.constant 1 : i32
    %195 = vector.broadcast %c1_i32_66 : i32 to vector<2x8x1xi32>
    %196 = arith.addi %186, %195 : vector<2x8x1xi32>
    %197 = vector.broadcast %196 : vector<2x8x1xi32> to vector<2x8x16xi32>
    %198 = arith.cmpi eq, %144, %197 : vector<2x8x16xi32>
    %199 = vector.extract_strided_slice %163 {offsets = [0, 0, 1], sizes = [2, 8, 1], strides = [1, 1, 1]} : vector<2x8x3xf32> to vector<2x8x1xf32>
    %cst_67 = arith.constant 0.000000e+00 : f32
    %200 = vector.shape_cast %199 : vector<2x8x1xf32> to vector<2x8x1xf32>
    %201 = vector.broadcast %200 : vector<2x8x1xf32> to vector<2x8x16xf32>
    %202 = vector.broadcast %cst_67 : f32 to vector<2x8x16xf32>
    %203 = arith.select %198, %201, %202 : vector<2x8x16xi1>, vector<2x8x16xf32>
    %204 = arith.addf %194, %203 : vector<2x8x16xf32>
    %205 = vector.extract_strided_slice %165 {offsets = [0, 0, 2], sizes = [2, 8, 1], strides = [1, 1, 1]} : vector<2x8x3xi32> to vector<2x8x1xi32>
    %206 = vector.broadcast %205 : vector<2x8x1xi32> to vector<2x8x16xi32>
    %207 = arith.cmpi eq, %144, %206 : vector<2x8x16xi32>
    %208 = vector.extract_strided_slice %164 {offsets = [0, 0, 2], sizes = [2, 8, 1], strides = [1, 1, 1]} : vector<2x8x3xf32> to vector<2x8x1xf32>
    %cst_68 = arith.constant 0.000000e+00 : f32
    %209 = vector.shape_cast %208 : vector<2x8x1xf32> to vector<2x8x1xf32>
    %210 = vector.broadcast %209 : vector<2x8x1xf32> to vector<2x8x16xf32>
    %211 = vector.broadcast %cst_68 : f32 to vector<2x8x16xf32>
    %212 = arith.select %207, %210, %211 : vector<2x8x16xi1>, vector<2x8x16xf32>
    %213 = arith.addf %204, %212 : vector<2x8x16xf32>
    %c1_i32_69 = arith.constant 1 : i32
    %214 = vector.broadcast %c1_i32_69 : i32 to vector<2x8x1xi32>
    %215 = arith.addi %205, %214 : vector<2x8x1xi32>
    %216 = vector.broadcast %215 : vector<2x8x1xi32> to vector<2x8x16xi32>
    %217 = arith.cmpi eq, %144, %216 : vector<2x8x16xi32>
    %218 = vector.extract_strided_slice %163 {offsets = [0, 0, 2], sizes = [2, 8, 1], strides = [1, 1, 1]} : vector<2x8x3xf32> to vector<2x8x1xf32>
    %cst_70 = arith.constant 0.000000e+00 : f32
    %219 = vector.shape_cast %218 : vector<2x8x1xf32> to vector<2x8x1xf32>
    %220 = vector.broadcast %219 : vector<2x8x1xf32> to vector<2x8x16xf32>
    %221 = vector.broadcast %cst_70 : f32 to vector<2x8x16xf32>
    %222 = arith.select %217, %220, %221 : vector<2x8x16xi1>, vector<2x8x16xf32>
    %223 = arith.addf %213, %222 : vector<2x8x16xf32>
    %224 = vector.extract_strided_slice %133 {offsets = [0, 0, 0], sizes = [2, 16, 8], strides = [1, 1, 1]} : vector<2x16x32xf32> to vector<2x16x8xf32>
    %225 = arith.truncf %224 : vector<2x16x8xf32> to vector<2x16x8xbf16>
    %226 = arith.truncf %223 : vector<2x8x16xf32> to vector<2x8x16xbf16>
    %cst_71 = arith.constant dense<0.000000e+00> : vector<2x8x8xf32>
    %227 = tpu.matmul %226, %225, %cst_71 {dimension_numbers = #tpu.dot_dimension_numbers<[2], [1], [1], [2], [0, 0, 0, 1, 1, 2], [0], [0]>} : vector<2x8x16xbf16>, vector<2x16x8xbf16>, vector<2x8x8xf32> -> vector<2x8x8xf32>
    %228 = vector.shape_cast %227 : vector<2x8x8xf32> to vector<16x8xf32>
    %c0_72 = arith.constant 0 : index
    %c0_73 = arith.constant 0 : index
    %229 = vector.load %arg20[%c0_72, %c0_73] : memref<16x32xf32, #tpu.memory_space<vmem>>, vector<16x8xf32>
    tpu.vector_store %arg20[%c0_72, %c0_73], %228 {strides = array<i32>} : memref<16x32xf32, #tpu.memory_space<vmem>>, vector<16x8xf32>,
    %230 = vector.extract_strided_slice %140 {offsets = [0, 0, 3], sizes = [2, 8, 3], strides = [1, 1, 1]} : vector<2x8x24xf32> to vector<2x8x3xf32>
    %231 = vector.extract_strided_slice %140 {offsets = [0, 0, 15], sizes = [2, 8, 3], strides = [1, 1, 1]} : vector<2x8x24xf32> to vector<2x8x3xf32>
    %cst_74 = arith.constant dense<0xFF800000> : vector<2x8xf32>
    %232 = vector.multi_reduction <maximumf>, %231, %cst_74 [2] : vector<2x8x3xf32> to vector<2x8xf32>
    %233 = vector.shape_cast %232 : vector<2x8xf32> to vector<2x8x1xf32>
    %234 = vector.broadcast %233 : vector<2x8x1xf32> to vector<2x8x3xf32>
    %235 = arith.subf %231, %234 : vector<2x8x3xf32>
    %236 = math.exp %235 : vector<2x8x3xf32>
    %cst_75 = arith.constant dense<0.000000e+00> : vector<2x8xf32>
    %237 = vector.multi_reduction <add>, %236, %cst_75 [2] : vector<2x8x3xf32> to vector<2x8xf32>
    %238 = vector.shape_cast %237 : vector<2x8xf32> to vector<2x8x1xf32>
    %239 = tpu.reciprocal %238 {approx = true} : vector<2x8x1xf32> -> vector<2x8x1xf32>
    %240 = vector.broadcast %239 : vector<2x8x1xf32> to vector<2x8x3xf32>
    %241 = arith.mulf %236, %240 : vector<2x8x3xf32>
    %242 = vector.broadcast %143 : vector<2x8x1xf32> to vector<2x8x3xf32>
    %243 = arith.mulf %230, %242 : vector<2x8x3xf32>
    %244 = vector.broadcast %142 : vector<2x8x1xf32> to vector<2x8x3xf32>
    %245 = arith.addf %244, %243 : vector<2x8x3xf32>
    %246 = math.floor %245 : vector<2x8x3xf32>
    %247 = arith.subf %245, %246 : vector<2x8x3xf32>
    %248 = arith.mulf %241, %247 : vector<2x8x3xf32>
    %249 = arith.subf %241, %248 : vector<2x8x3xf32>
    %250 = arith.fptosi %246 : vector<2x8x3xf32> to vector<2x8x3xi32>
    %cst_76 = arith.constant 0.000000e+00 : f32
    %251 = vector.broadcast %cst_76 : f32 to vector<2x8x16xf32>
    %252 = vector.extract_strided_slice %250 {offsets = [0, 0, 0], sizes = [2, 8, 1], strides = [1, 1, 1]} : vector<2x8x3xi32> to vector<2x8x1xi32>
    %253 = vector.broadcast %252 : vector<2x8x1xi32> to vector<2x8x16xi32>
    %254 = arith.cmpi eq, %144, %253 : vector<2x8x16xi32>
    %255 = vector.extract_strided_slice %249 {offsets = [0, 0, 0], sizes = [2, 8, 1], strides = [1, 1, 1]} : vector<2x8x3xf32> to vector<2x8x1xf32>
    %cst_77 = arith.constant 0.000000e+00 : f32
    %256 = vector.shape_cast %255 : vector<2x8x1xf32> to vector<2x8x1xf32>
    %257 = vector.broadcast %256 : vector<2x8x1xf32> to vector<2x8x16xf32>
    %258 = vector.broadcast %cst_77 : f32 to vector<2x8x16xf32>
    %259 = arith.select %254, %257, %258 : vector<2x8x16xi1>, vector<2x8x16xf32>
    %260 = arith.addf %251, %259 : vector<2x8x16xf32>
    %c1_i32_78 = arith.constant 1 : i32
    %261 = vector.broadcast %c1_i32_78 : i32 to vector<2x8x1xi32>
    %262 = arith.addi %252, %261 : vector<2x8x1xi32>
    %263 = vector.broadcast %262 : vector<2x8x1xi32> to vector<2x8x16xi32>
    %264 = arith.cmpi eq, %144, %263 : vector<2x8x16xi32>
    %265 = vector.extract_strided_slice %248 {offsets = [0, 0, 0], sizes = [2, 8, 1], strides = [1, 1, 1]} : vector<2x8x3xf32> to vector<2x8x1xf32>
    %cst_79 = arith.constant 0.000000e+00 : f32
    %266 = vector.shape_cast %265 : vector<2x8x1xf32> to vector<2x8x1xf32>
    %267 = vector.broadcast %266 : vector<2x8x1xf32> to vector<2x8x16xf32>
    %268 = vector.broadcast %cst_79 : f32 to vector<2x8x16xf32>
    %269 = arith.select %264, %267, %268 : vector<2x8x16xi1>, vector<2x8x16xf32>
    %270 = arith.addf %260, %269 : vector<2x8x16xf32>
    %271 = vector.extract_strided_slice %250 {offsets = [0, 0, 1], sizes = [2, 8, 1], strides = [1, 1, 1]} : vector<2x8x3xi32> to vector<2x8x1xi32>
    %272 = vector.broadcast %271 : vector<2x8x1xi32> to vector<2x8x16xi32>
    %273 = arith.cmpi eq, %144, %272 : vector<2x8x16xi32>
    %274 = vector.extract_strided_slice %249 {offsets = [0, 0, 1], sizes = [2, 8, 1], strides = [1, 1, 1]} : vector<2x8x3xf32> to vector<2x8x1xf32>
    %cst_80 = arith.constant 0.000000e+00 : f32
    %275 = vector.shape_cast %274 : vector<2x8x1xf32> to vector<2x8x1xf32>
    %276 = vector.broadcast %275 : vector<2x8x1xf32> to vector<2x8x16xf32>
    %277 = vector.broadcast %cst_80 : f32 to vector<2x8x16xf32>
    %278 = arith.select %273, %276, %277 : vector<2x8x16xi1>, vector<2x8x16xf32>
    %279 = arith.addf %270, %278 : vector<2x8x16xf32>
    %c1_i32_81 = arith.constant 1 : i32
    %280 = vector.broadcast %c1_i32_81 : i32 to vector<2x8x1xi32>
    %281 = arith.addi %271, %280 : vector<2x8x1xi32>
    %282 = vector.broadcast %281 : vector<2x8x1xi32> to vector<2x8x16xi32>
    %283 = arith.cmpi eq, %144, %282 : vector<2x8x16xi32>
    %284 = vector.extract_strided_slice %248 {offsets = [0, 0, 1], sizes = [2, 8, 1], strides = [1, 1, 1]} : vector<2x8x3xf32> to vector<2x8x1xf32>
    %cst_82 = arith.constant 0.000000e+00 : f32
    %285 = vector.shape_cast %284 : vector<2x8x1xf32> to vector<2x8x1xf32>
    %286 = vector.broadcast %285 : vector<2x8x1xf32> to vector<2x8x16xf32>
    %287 = vector.broadcast %cst_82 : f32 to vector<2x8x16xf32>
    %288 = arith.select %283, %286, %287 : vector<2x8x16xi1>, vector<2x8x16xf32>
    %289 = arith.addf %279, %288 : vector<2x8x16xf32>
    %290 = vector.extract_strided_slice %250 {offsets = [0, 0, 2], sizes = [2, 8, 1], strides = [1, 1, 1]} : vector<2x8x3xi32> to vector<2x8x1xi32>
    %291 = vector.broadcast %290 : vector<2x8x1xi32> to vector<2x8x16xi32>
    %292 = arith.cmpi eq, %144, %291 : vector<2x8x16xi32>
    %293 = vector.extract_strided_slice %249 {offsets = [0, 0, 2], sizes = [2, 8, 1], strides = [1, 1, 1]} : vector<2x8x3xf32> to vector<2x8x1xf32>
    %cst_83 = arith.constant 0.000000e+00 : f32
    %294 = vector.shape_cast %293 : vector<2x8x1xf32> to vector<2x8x1xf32>
    %295 = vector.broadcast %294 : vector<2x8x1xf32> to vector<2x8x16xf32>
    %296 = vector.broadcast %cst_83 : f32 to vector<2x8x16xf32>
    %297 = arith.select %292, %295, %296 : vector<2x8x16xi1>, vector<2x8x16xf32>
    %298 = arith.addf %289, %297 : vector<2x8x16xf32>
    %c1_i32_84 = arith.constant 1 : i32
    %299 = vector.broadcast %c1_i32_84 : i32 to vector<2x8x1xi32>
    %300 = arith.addi %290, %299 : vector<2x8x1xi32>
    %301 = vector.broadcast %300 : vector<2x8x1xi32> to vector<2x8x16xi32>
    %302 = arith.cmpi eq, %144, %301 : vector<2x8x16xi32>
    %303 = vector.extract_strided_slice %248 {offsets = [0, 0, 2], sizes = [2, 8, 1], strides = [1, 1, 1]} : vector<2x8x3xf32> to vector<2x8x1xf32>
    %cst_85 = arith.constant 0.000000e+00 : f32
    %304 = vector.shape_cast %303 : vector<2x8x1xf32> to vector<2x8x1xf32>
    %305 = vector.broadcast %304 : vector<2x8x1xf32> to vector<2x8x16xf32>
    %306 = vector.broadcast %cst_85 : f32 to vector<2x8x16xf32>
    %307 = arith.select %302, %305, %306 : vector<2x8x16xi1>, vector<2x8x16xf32>
    %308 = arith.addf %298, %307 : vector<2x8x16xf32>
    %309 = vector.extract_strided_slice %133 {offsets = [0, 0, 8], sizes = [2, 16, 8], strides = [1, 1, 1]} : vector<2x16x32xf32> to vector<2x16x8xf32>
    %310 = arith.truncf %309 : vector<2x16x8xf32> to vector<2x16x8xbf16>
    %311 = arith.truncf %308 : vector<2x8x16xf32> to vector<2x8x16xbf16>
    %cst_86 = arith.constant dense<0.000000e+00> : vector<2x8x8xf32>
    %312 = tpu.matmul %311, %310, %cst_86 {dimension_numbers = #tpu.dot_dimension_numbers<[2], [1], [1], [2], [0, 0, 0, 1, 1, 2], [0], [0]>} : vector<2x8x16xbf16>, vector<2x16x8xbf16>, vector<2x8x8xf32> -> vector<2x8x8xf32>
    %313 = vector.shape_cast %312 : vector<2x8x8xf32> to vector<16x8xf32>
    %c0_87 = arith.constant 0 : index
    %c8_88 = arith.constant 8 : index
    %314 = vector.load %arg20[%c0_87, %c8_88] : memref<16x32xf32, #tpu.memory_space<vmem>>, vector<16x8xf32>
    tpu.vector_store %arg20[%c0_87, %c8_88], %313 {strides = array<i32>} : memref<16x32xf32, #tpu.memory_space<vmem>>, vector<16x8xf32>,
    %315 = vector.extract_strided_slice %140 {offsets = [0, 0, 6], sizes = [2, 8, 3], strides = [1, 1, 1]} : vector<2x8x24xf32> to vector<2x8x3xf32>
    %316 = vector.extract_strided_slice %140 {offsets = [0, 0, 18], sizes = [2, 8, 3], strides = [1, 1, 1]} : vector<2x8x24xf32> to vector<2x8x3xf32>
    %cst_89 = arith.constant dense<0xFF800000> : vector<2x8xf32>
    %317 = vector.multi_reduction <maximumf>, %316, %cst_89 [2] : vector<2x8x3xf32> to vector<2x8xf32>
    %318 = vector.shape_cast %317 : vector<2x8xf32> to vector<2x8x1xf32>
    %319 = vector.broadcast %318 : vector<2x8x1xf32> to vector<2x8x3xf32>
    %320 = arith.subf %316, %319 : vector<2x8x3xf32>
    %321 = math.exp %320 : vector<2x8x3xf32>
    %cst_90 = arith.constant dense<0.000000e+00> : vector<2x8xf32>
    %322 = vector.multi_reduction <add>, %321, %cst_90 [2] : vector<2x8x3xf32> to vector<2x8xf32>
    %323 = vector.shape_cast %322 : vector<2x8xf32> to vector<2x8x1xf32>
    %324 = tpu.reciprocal %323 {approx = true} : vector<2x8x1xf32> -> vector<2x8x1xf32>
    %325 = vector.broadcast %324 : vector<2x8x1xf32> to vector<2x8x3xf32>
    %326 = arith.mulf %321, %325 : vector<2x8x3xf32>
    %327 = vector.broadcast %143 : vector<2x8x1xf32> to vector<2x8x3xf32>
    %328 = arith.mulf %315, %327 : vector<2x8x3xf32>
    %329 = vector.broadcast %142 : vector<2x8x1xf32> to vector<2x8x3xf32>
    %330 = arith.addf %329, %328 : vector<2x8x3xf32>
    %331 = math.floor %330 : vector<2x8x3xf32>
    %332 = arith.subf %330, %331 : vector<2x8x3xf32>
    %333 = arith.mulf %326, %332 : vector<2x8x3xf32>
    %334 = arith.subf %326, %333 : vector<2x8x3xf32>
    %335 = arith.fptosi %331 : vector<2x8x3xf32> to vector<2x8x3xi32>
    %cst_91 = arith.constant 0.000000e+00 : f32
    %336 = vector.broadcast %cst_91 : f32 to vector<2x8x16xf32>
    %337 = vector.extract_strided_slice %335 {offsets = [0, 0, 0], sizes = [2, 8, 1], strides = [1, 1, 1]} : vector<2x8x3xi32> to vector<2x8x1xi32>
    %338 = vector.broadcast %337 : vector<2x8x1xi32> to vector<2x8x16xi32>
    %339 = arith.cmpi eq, %144, %338 : vector<2x8x16xi32>
    %340 = vector.extract_strided_slice %334 {offsets = [0, 0, 0], sizes = [2, 8, 1], strides = [1, 1, 1]} : vector<2x8x3xf32> to vector<2x8x1xf32>
    %cst_92 = arith.constant 0.000000e+00 : f32
    %341 = vector.shape_cast %340 : vector<2x8x1xf32> to vector<2x8x1xf32>
    %342 = vector.broadcast %341 : vector<2x8x1xf32> to vector<2x8x16xf32>
    %343 = vector.broadcast %cst_92 : f32 to vector<2x8x16xf32>
    %344 = arith.select %339, %342, %343 : vector<2x8x16xi1>, vector<2x8x16xf32>
    %345 = arith.addf %336, %344 : vector<2x8x16xf32>
    %c1_i32_93 = arith.constant 1 : i32
    %346 = vector.broadcast %c1_i32_93 : i32 to vector<2x8x1xi32>
    %347 = arith.addi %337, %346 : vector<2x8x1xi32>
    %348 = vector.broadcast %347 : vector<2x8x1xi32> to vector<2x8x16xi32>
    %349 = arith.cmpi eq, %144, %348 : vector<2x8x16xi32>
    %350 = vector.extract_strided_slice %333 {offsets = [0, 0, 0], sizes = [2, 8, 1], strides = [1, 1, 1]} : vector<2x8x3xf32> to vector<2x8x1xf32>
    %cst_94 = arith.constant 0.000000e+00 : f32
    %351 = vector.shape_cast %350 : vector<2x8x1xf32> to vector<2x8x1xf32>
    %352 = vector.broadcast %351 : vector<2x8x1xf32> to vector<2x8x16xf32>
    %353 = vector.broadcast %cst_94 : f32 to vector<2x8x16xf32>
    %354 = arith.select %349, %352, %353 : vector<2x8x16xi1>, vector<2x8x16xf32>
    %355 = arith.addf %345, %354 : vector<2x8x16xf32>
    %356 = vector.extract_strided_slice %335 {offsets = [0, 0, 1], sizes = [2, 8, 1], strides = [1, 1, 1]} : vector<2x8x3xi32> to vector<2x8x1xi32>
    %357 = vector.broadcast %356 : vector<2x8x1xi32> to vector<2x8x16xi32>
    %358 = arith.cmpi eq, %144, %357 : vector<2x8x16xi32>
    %359 = vector.extract_strided_slice %334 {offsets = [0, 0, 1], sizes = [2, 8, 1], strides = [1, 1, 1]} : vector<2x8x3xf32> to vector<2x8x1xf32>
    %cst_95 = arith.constant 0.000000e+00 : f32
    %360 = vector.shape_cast %359 : vector<2x8x1xf32> to vector<2x8x1xf32>
    %361 = vector.broadcast %360 : vector<2x8x1xf32> to vector<2x8x16xf32>
    %362 = vector.broadcast %cst_95 : f32 to vector<2x8x16xf32>
    %363 = arith.select %358, %361, %362 : vector<2x8x16xi1>, vector<2x8x16xf32>
    %364 = arith.addf %355, %363 : vector<2x8x16xf32>
    %c1_i32_96 = arith.constant 1 : i32
    %365 = vector.broadcast %c1_i32_96 : i32 to vector<2x8x1xi32>
    %366 = arith.addi %356, %365 : vector<2x8x1xi32>
    %367 = vector.broadcast %366 : vector<2x8x1xi32> to vector<2x8x16xi32>
    %368 = arith.cmpi eq, %144, %367 : vector<2x8x16xi32>
    %369 = vector.extract_strided_slice %333 {offsets = [0, 0, 1], sizes = [2, 8, 1], strides = [1, 1, 1]} : vector<2x8x3xf32> to vector<2x8x1xf32>
    %cst_97 = arith.constant 0.000000e+00 : f32
    %370 = vector.shape_cast %369 : vector<2x8x1xf32> to vector<2x8x1xf32>
    %371 = vector.broadcast %370 : vector<2x8x1xf32> to vector<2x8x16xf32>
    %372 = vector.broadcast %cst_97 : f32 to vector<2x8x16xf32>
    %373 = arith.select %368, %371, %372 : vector<2x8x16xi1>, vector<2x8x16xf32>
    %374 = arith.addf %364, %373 : vector<2x8x16xf32>
    %375 = vector.extract_strided_slice %335 {offsets = [0, 0, 2], sizes = [2, 8, 1], strides = [1, 1, 1]} : vector<2x8x3xi32> to vector<2x8x1xi32>
    %376 = vector.broadcast %375 : vector<2x8x1xi32> to vector<2x8x16xi32>
    %377 = arith.cmpi eq, %144, %376 : vector<2x8x16xi32>
    %378 = vector.extract_strided_slice %334 {offsets = [0, 0, 2], sizes = [2, 8, 1], strides = [1, 1, 1]} : vector<2x8x3xf32> to vector<2x8x1xf32>
    %cst_98 = arith.constant 0.000000e+00 : f32
    %379 = vector.shape_cast %378 : vector<2x8x1xf32> to vector<2x8x1xf32>
    %380 = vector.broadcast %379 : vector<2x8x1xf32> to vector<2x8x16xf32>
    %381 = vector.broadcast %cst_98 : f32 to vector<2x8x16xf32>
    %382 = arith.select %377, %380, %381 : vector<2x8x16xi1>, vector<2x8x16xf32>
    %383 = arith.addf %374, %382 : vector<2x8x16xf32>
    %c1_i32_99 = arith.constant 1 : i32
    %384 = vector.broadcast %c1_i32_99 : i32 to vector<2x8x1xi32>
    %385 = arith.addi %375, %384 : vector<2x8x1xi32>
    %386 = vector.broadcast %385 : vector<2x8x1xi32> to vector<2x8x16xi32>
    %387 = arith.cmpi eq, %144, %386 : vector<2x8x16xi32>
    %388 = vector.extract_strided_slice %333 {offsets = [0, 0, 2], sizes = [2, 8, 1], strides = [1, 1, 1]} : vector<2x8x3xf32> to vector<2x8x1xf32>
    %cst_100 = arith.constant 0.000000e+00 : f32
    %389 = vector.shape_cast %388 : vector<2x8x1xf32> to vector<2x8x1xf32>
    %390 = vector.broadcast %389 : vector<2x8x1xf32> to vector<2x8x16xf32>
    %391 = vector.broadcast %cst_100 : f32 to vector<2x8x16xf32>
    %392 = arith.select %387, %390, %391 : vector<2x8x16xi1>, vector<2x8x16xf32>
    %393 = arith.addf %383, %392 : vector<2x8x16xf32>
    %394 = vector.extract_strided_slice %133 {offsets = [0, 0, 16], sizes = [2, 16, 8], strides = [1, 1, 1]} : vector<2x16x32xf32> to vector<2x16x8xf32>
    %395 = arith.truncf %394 : vector<2x16x8xf32> to vector<2x16x8xbf16>
    %396 = arith.truncf %393 : vector<2x8x16xf32> to vector<2x8x16xbf16>
    %cst_101 = arith.constant dense<0.000000e+00> : vector<2x8x8xf32>
    %397 = tpu.matmul %396, %395, %cst_101 {dimension_numbers = #tpu.dot_dimension_numbers<[2], [1], [1], [2], [0, 0, 0, 1, 1, 2], [0], [0]>} : vector<2x8x16xbf16>, vector<2x16x8xbf16>, vector<2x8x8xf32> -> vector<2x8x8xf32>
    %398 = vector.shape_cast %397 : vector<2x8x8xf32> to vector<16x8xf32>
    %c0_102 = arith.constant 0 : index
    %c16_103 = arith.constant 16 : index
    %399 = vector.load %arg20[%c0_102, %c16_103] : memref<16x32xf32, #tpu.memory_space<vmem>>, vector<16x8xf32>
    tpu.vector_store %arg20[%c0_102, %c16_103], %398 {strides = array<i32>} : memref<16x32xf32, #tpu.memory_space<vmem>>, vector<16x8xf32>,
    %400 = vector.extract_strided_slice %140 {offsets = [0, 0, 9], sizes = [2, 8, 3], strides = [1, 1, 1]} : vector<2x8x24xf32> to vector<2x8x3xf32>
    %401 = vector.extract_strided_slice %140 {offsets = [0, 0, 21], sizes = [2, 8, 3], strides = [1, 1, 1]} : vector<2x8x24xf32> to vector<2x8x3xf32>
    %cst_104 = arith.constant dense<0xFF800000> : vector<2x8xf32>
    %402 = vector.multi_reduction <maximumf>, %401, %cst_104 [2] : vector<2x8x3xf32> to vector<2x8xf32>
    %403 = vector.shape_cast %402 : vector<2x8xf32> to vector<2x8x1xf32>
    %404 = vector.broadcast %403 : vector<2x8x1xf32> to vector<2x8x3xf32>
    %405 = arith.subf %401, %404 : vector<2x8x3xf32>
    %406 = math.exp %405 : vector<2x8x3xf32>
    %cst_105 = arith.constant dense<0.000000e+00> : vector<2x8xf32>
    %407 = vector.multi_reduction <add>, %406, %cst_105 [2] : vector<2x8x3xf32> to vector<2x8xf32>
    %408 = vector.shape_cast %407 : vector<2x8xf32> to vector<2x8x1xf32>
    %409 = tpu.reciprocal %408 {approx = true} : vector<2x8x1xf32> -> vector<2x8x1xf32>
    %410 = vector.broadcast %409 : vector<2x8x1xf32> to vector<2x8x3xf32>
    %411 = arith.mulf %406, %410 : vector<2x8x3xf32>
    %412 = vector.broadcast %143 : vector<2x8x1xf32> to vector<2x8x3xf32>
    %413 = arith.mulf %400, %412 : vector<2x8x3xf32>
    %414 = vector.broadcast %142 : vector<2x8x1xf32> to vector<2x8x3xf32>
    %415 = arith.addf %414, %413 : vector<2x8x3xf32>
    %416 = math.floor %415 : vector<2x8x3xf32>
    %417 = arith.subf %415, %416 : vector<2x8x3xf32>
    %418 = arith.mulf %411, %417 : vector<2x8x3xf32>
    %419 = arith.subf %411, %418 : vector<2x8x3xf32>
    %420 = arith.fptosi %416 : vector<2x8x3xf32> to vector<2x8x3xi32>
    %cst_106 = arith.constant 0.000000e+00 : f32
    %421 = vector.broadcast %cst_106 : f32 to vector<2x8x16xf32>
    %422 = vector.extract_strided_slice %420 {offsets = [0, 0, 0], sizes = [2, 8, 1], strides = [1, 1, 1]} : vector<2x8x3xi32> to vector<2x8x1xi32>
    %423 = vector.broadcast %422 : vector<2x8x1xi32> to vector<2x8x16xi32>
    %424 = arith.cmpi eq, %144, %423 : vector<2x8x16xi32>
    %425 = vector.extract_strided_slice %419 {offsets = [0, 0, 0], sizes = [2, 8, 1], strides = [1, 1, 1]} : vector<2x8x3xf32> to vector<2x8x1xf32>
    %cst_107 = arith.constant 0.000000e+00 : f32
    %426 = vector.shape_cast %425 : vector<2x8x1xf32> to vector<2x8x1xf32>
    %427 = vector.broadcast %426 : vector<2x8x1xf32> to vector<2x8x16xf32>
    %428 = vector.broadcast %cst_107 : f32 to vector<2x8x16xf32>
    %429 = arith.select %424, %427, %428 : vector<2x8x16xi1>, vector<2x8x16xf32>
    %430 = arith.addf %421, %429 : vector<2x8x16xf32>
    %c1_i32_108 = arith.constant 1 : i32
    %431 = vector.broadcast %c1_i32_108 : i32 to vector<2x8x1xi32>
    %432 = arith.addi %422, %431 : vector<2x8x1xi32>
    %433 = vector.broadcast %432 : vector<2x8x1xi32> to vector<2x8x16xi32>
    %434 = arith.cmpi eq, %144, %433 : vector<2x8x16xi32>
    %435 = vector.extract_strided_slice %418 {offsets = [0, 0, 0], sizes = [2, 8, 1], strides = [1, 1, 1]} : vector<2x8x3xf32> to vector<2x8x1xf32>
    %cst_109 = arith.constant 0.000000e+00 : f32
    %436 = vector.shape_cast %435 : vector<2x8x1xf32> to vector<2x8x1xf32>
    %437 = vector.broadcast %436 : vector<2x8x1xf32> to vector<2x8x16xf32>
    %438 = vector.broadcast %cst_109 : f32 to vector<2x8x16xf32>
    %439 = arith.select %434, %437, %438 : vector<2x8x16xi1>, vector<2x8x16xf32>
    %440 = arith.addf %430, %439 : vector<2x8x16xf32>
    %441 = vector.extract_strided_slice %420 {offsets = [0, 0, 1], sizes = [2, 8, 1], strides = [1, 1, 1]} : vector<2x8x3xi32> to vector<2x8x1xi32>
    %442 = vector.broadcast %441 : vector<2x8x1xi32> to vector<2x8x16xi32>
    %443 = arith.cmpi eq, %144, %442 : vector<2x8x16xi32>
    %444 = vector.extract_strided_slice %419 {offsets = [0, 0, 1], sizes = [2, 8, 1], strides = [1, 1, 1]} : vector<2x8x3xf32> to vector<2x8x1xf32>
    %cst_110 = arith.constant 0.000000e+00 : f32
    %445 = vector.shape_cast %444 : vector<2x8x1xf32> to vector<2x8x1xf32>
    %446 = vector.broadcast %445 : vector<2x8x1xf32> to vector<2x8x16xf32>
    %447 = vector.broadcast %cst_110 : f32 to vector<2x8x16xf32>
    %448 = arith.select %443, %446, %447 : vector<2x8x16xi1>, vector<2x8x16xf32>
    %449 = arith.addf %440, %448 : vector<2x8x16xf32>
    %c1_i32_111 = arith.constant 1 : i32
    %450 = vector.broadcast %c1_i32_111 : i32 to vector<2x8x1xi32>
    %451 = arith.addi %441, %450 : vector<2x8x1xi32>
    %452 = vector.broadcast %451 : vector<2x8x1xi32> to vector<2x8x16xi32>
    %453 = arith.cmpi eq, %144, %452 : vector<2x8x16xi32>
    %454 = vector.extract_strided_slice %418 {offsets = [0, 0, 1], sizes = [2, 8, 1], strides = [1, 1, 1]} : vector<2x8x3xf32> to vector<2x8x1xf32>
    %cst_112 = arith.constant 0.000000e+00 : f32
    %455 = vector.shape_cast %454 : vector<2x8x1xf32> to vector<2x8x1xf32>
    %456 = vector.broadcast %455 : vector<2x8x1xf32> to vector<2x8x16xf32>
    %457 = vector.broadcast %cst_112 : f32 to vector<2x8x16xf32>
    %458 = arith.select %453, %456, %457 : vector<2x8x16xi1>, vector<2x8x16xf32>
    %459 = arith.addf %449, %458 : vector<2x8x16xf32>
    %460 = vector.extract_strided_slice %420 {offsets = [0, 0, 2], sizes = [2, 8, 1], strides = [1, 1, 1]} : vector<2x8x3xi32> to vector<2x8x1xi32>
    %461 = vector.broadcast %460 : vector<2x8x1xi32> to vector<2x8x16xi32>
    %462 = arith.cmpi eq, %144, %461 : vector<2x8x16xi32>
    %463 = vector.extract_strided_slice %419 {offsets = [0, 0, 2], sizes = [2, 8, 1], strides = [1, 1, 1]} : vector<2x8x3xf32> to vector<2x8x1xf32>
    %cst_113 = arith.constant 0.000000e+00 : f32
    %464 = vector.shape_cast %463 : vector<2x8x1xf32> to vector<2x8x1xf32>
    %465 = vector.broadcast %464 : vector<2x8x1xf32> to vector<2x8x16xf32>
    %466 = vector.broadcast %cst_113 : f32 to vector<2x8x16xf32>
    %467 = arith.select %462, %465, %466 : vector<2x8x16xi1>, vector<2x8x16xf32>
    %468 = arith.addf %459, %467 : vector<2x8x16xf32>
    %c1_i32_114 = arith.constant 1 : i32
    %469 = vector.broadcast %c1_i32_114 : i32 to vector<2x8x1xi32>
    %470 = arith.addi %460, %469 : vector<2x8x1xi32>
    %471 = vector.broadcast %470 : vector<2x8x1xi32> to vector<2x8x16xi32>
    %472 = arith.cmpi eq, %144, %471 : vector<2x8x16xi32>
    %473 = vector.extract_strided_slice %418 {offsets = [0, 0, 2], sizes = [2, 8, 1], strides = [1, 1, 1]} : vector<2x8x3xf32> to vector<2x8x1xf32>
    %cst_115 = arith.constant 0.000000e+00 : f32
    %474 = vector.shape_cast %473 : vector<2x8x1xf32> to vector<2x8x1xf32>
    %475 = vector.broadcast %474 : vector<2x8x1xf32> to vector<2x8x16xf32>
    %476 = vector.broadcast %cst_115 : f32 to vector<2x8x16xf32>
    %477 = arith.select %472, %475, %476 : vector<2x8x16xi1>, vector<2x8x16xf32>
    %478 = arith.addf %468, %477 : vector<2x8x16xf32>
    %479 = vector.extract_strided_slice %133 {offsets = [0, 0, 24], sizes = [2, 16, 8], strides = [1, 1, 1]} : vector<2x16x32xf32> to vector<2x16x8xf32>
    %480 = arith.truncf %479 : vector<2x16x8xf32> to vector<2x16x8xbf16>
    %481 = arith.truncf %478 : vector<2x8x16xf32> to vector<2x8x16xbf16>
    %cst_116 = arith.constant dense<0.000000e+00> : vector<2x8x8xf32>
    %482 = tpu.matmul %481, %480, %cst_116 {dimension_numbers = #tpu.dot_dimension_numbers<[2], [1], [1], [2], [0, 0, 0, 1, 1, 2], [0], [0]>} : vector<2x8x16xbf16>, vector<2x16x8xbf16>, vector<2x8x8xf32> -> vector<2x8x8xf32>
    %483 = vector.shape_cast %482 : vector<2x8x8xf32> to vector<16x8xf32>
    %c0_117 = arith.constant 0 : index
    %c24_118 = arith.constant 24 : index
    %484 = vector.load %arg20[%c0_117, %c24_118] : memref<16x32xf32, #tpu.memory_space<vmem>>, vector<16x8xf32>
    tpu.vector_store %arg20[%c0_117, %c24_118], %483 {strides = array<i32>} : memref<16x32xf32, #tpu.memory_space<vmem>>, vector<16x8xf32>,
    %c0_119 = arith.constant 0 : index
    %c0_120 = arith.constant 0 : index
    %485 = vector.load %arg20[%c0_119, %c0_120] : memref<16x32xf32, #tpu.memory_space<vmem>>, vector<16x32xf32>
    %486 = arith.truncf %485 : vector<16x32xf32> to vector<16x32xbf16>
    %c0_121 = arith.constant 0 : index
    %c0_122 = arith.constant 0 : index
    %487 = vector.load %arg11[%c0_121, %c0_122] : memref<32x32xbf16, #tpu.memory_space<vmem>>, vector<32x32xbf16>
    %cst_123 = arith.constant dense<0.000000e+00> : vector<16x32xf32>
    %488 = tpu.matmul %486, %487, %cst_123 {dimension_numbers = #tpu.dot_dimension_numbers<[1], [0], [0], [1], [0, 0, 1, 1], [], []>} : vector<16x32xbf16>, vector<32x32xbf16>, vector<16x32xf32> -> vector<16x32xf32>
    %c0_124 = arith.constant 0 : index
    %c0_125 = arith.constant 0 : index
    %489 = vector.load %arg12[%c0_124, %c0_125] : memref<1x32xf32, #tpu.memory_space<vmem>>, vector<1x32xf32>
    %490 = vector.broadcast %489 : vector<1x32xf32> to vector<16x32xf32>
    %491 = arith.addf %488, %490 : vector<16x32xf32>
    %492 = arith.addf %124, %491 : vector<16x32xf32>
    %cst_126 = arith.constant dense<0.000000e+00> : vector<16xf32>
    %493 = vector.multi_reduction <add>, %492, %cst_126 [1] : vector<16x32xf32> to vector<16xf32>
    %494 = vector.shape_cast %493 : vector<16xf32> to vector<16x1xf32>
    %cst_127 = arith.constant 3.200000e+01 : f32
    %495 = vector.broadcast %cst_127 : f32 to vector<16x1xf32>
    %496 = arith.divf %494, %495 : vector<16x1xf32>
    %497 = vector.broadcast %496 : vector<16x1xf32> to vector<16x32xf32>
    %498 = arith.subf %492, %497 : vector<16x32xf32>
    %499 = arith.mulf %498, %498 : vector<16x32xf32>
    %cst_128 = arith.constant dense<0.000000e+00> : vector<16xf32>
    %500 = vector.multi_reduction <add>, %499, %cst_128 [1] : vector<16x32xf32> to vector<16xf32>
    %501 = vector.shape_cast %500 : vector<16xf32> to vector<16x1xf32>
    %cst_129 = arith.constant 3.200000e+01 : f32
    %502 = vector.broadcast %cst_129 : f32 to vector<16x1xf32>
    %503 = arith.divf %501, %502 : vector<16x1xf32>
    %cst_130 = arith.constant 9.99999974E-6 : f32
    %504 = vector.broadcast %cst_130 : f32 to vector<16x1xf32>
    %505 = arith.addf %503, %504 : vector<16x1xf32>
    %506 = math.rsqrt %505 : vector<16x1xf32>
    %507 = vector.broadcast %506 : vector<16x1xf32> to vector<16x32xf32>
    %508 = arith.mulf %498, %507 : vector<16x32xf32>
    %509 = vector.broadcast %100 : vector<1x32xf32> to vector<16x32xf32>
    %510 = arith.mulf %508, %509 : vector<16x32xf32>
    %511 = vector.broadcast %101 : vector<1x32xf32> to vector<16x32xf32>
    %512 = arith.addf %510, %511 : vector<16x32xf32>
    %513 = arith.truncf %512 : vector<16x32xf32> to vector<16x32xbf16>
    %c0_131 = arith.constant 0 : index
    %c0_132 = arith.constant 0 : index
    %514 = vector.load %arg13[%c0_131, %c0_132] : memref<32x64xbf16, #tpu.memory_space<vmem>>, vector<32x64xbf16>
    %cst_133 = arith.constant dense<0.000000e+00> : vector<16x64xf32>
    %515 = tpu.matmul %513, %514, %cst_133 {dimension_numbers = #tpu.dot_dimension_numbers<[1], [0], [0], [1], [0, 0, 1, 1], [], []>} : vector<16x32xbf16>, vector<32x64xbf16>, vector<16x64xf32> -> vector<16x64xf32>
    %c0_134 = arith.constant 0 : index
    %c0_135 = arith.constant 0 : index
    %516 = vector.load %arg14[%c0_134, %c0_135] : memref<1x64xf32, #tpu.memory_space<vmem>>, vector<1x64xf32>
    %517 = vector.broadcast %516 : vector<1x64xf32> to vector<16x64xf32>
    %518 = arith.addf %515, %517 : vector<16x64xf32>
    %cst_136 = arith.constant 0.000000e+00 : f32
    %519 = vector.broadcast %cst_136 : f32 to vector<16x64xf32>
    %520 = arith.maximumf %518, %519 : vector<16x64xf32>
    %521 = arith.truncf %520 : vector<16x64xf32> to vector<16x64xbf16>
    %c0_137 = arith.constant 0 : index
    %c0_138 = arith.constant 0 : index
    %522 = vector.load %arg15[%c0_137, %c0_138] : memref<64x32xbf16, #tpu.memory_space<vmem>>, vector<64x32xbf16>
    %cst_139 = arith.constant dense<0.000000e+00> : vector<16x32xf32>
    %523 = tpu.matmul %521, %522, %cst_139 {dimension_numbers = #tpu.dot_dimension_numbers<[1], [0], [0], [1], [0, 0, 1, 1], [], []>} : vector<16x64xbf16>, vector<64x32xbf16>, vector<16x32xf32> -> vector<16x32xf32>
    %c0_140 = arith.constant 0 : index
    %c0_141 = arith.constant 0 : index
    %524 = vector.load %arg16[%c0_140, %c0_141] : memref<1x32xf32, #tpu.memory_space<vmem>>, vector<1x32xf32>
    %525 = vector.broadcast %524 : vector<1x32xf32> to vector<16x32xf32>
    %526 = arith.addf %523, %525 : vector<16x32xf32>
    %527 = arith.addf %512, %526 : vector<16x32xf32>
    %cst_142 = arith.constant dense<0.000000e+00> : vector<16xf32>
    %528 = vector.multi_reduction <add>, %527, %cst_142 [1] : vector<16x32xf32> to vector<16xf32>
    %529 = vector.shape_cast %528 : vector<16xf32> to vector<16x1xf32>
    %cst_143 = arith.constant 3.200000e+01 : f32
    %530 = vector.broadcast %cst_143 : f32 to vector<16x1xf32>
    %531 = arith.divf %529, %530 : vector<16x1xf32>
    %532 = vector.broadcast %531 : vector<16x1xf32> to vector<16x32xf32>
    %533 = arith.subf %527, %532 : vector<16x32xf32>
    %534 = arith.mulf %533, %533 : vector<16x32xf32>
    %cst_144 = arith.constant dense<0.000000e+00> : vector<16xf32>
    %535 = vector.multi_reduction <add>, %534, %cst_144 [1] : vector<16x32xf32> to vector<16xf32>
    %536 = vector.shape_cast %535 : vector<16xf32> to vector<16x1xf32>
    %cst_145 = arith.constant 3.200000e+01 : f32
    %537 = vector.broadcast %cst_145 : f32 to vector<16x1xf32>
    %538 = arith.divf %536, %537 : vector<16x1xf32>
    %cst_146 = arith.constant 9.99999974E-6 : f32
    %539 = vector.broadcast %cst_146 : f32 to vector<16x1xf32>
    %540 = arith.addf %538, %539 : vector<16x1xf32>
    %541 = math.rsqrt %540 : vector<16x1xf32>
    %542 = vector.broadcast %541 : vector<16x1xf32> to vector<16x32xf32>
    %543 = arith.mulf %533, %542 : vector<16x32xf32>
    %544 = vector.broadcast %102 : vector<1x32xf32> to vector<16x32xf32>
    %545 = arith.mulf %543, %544 : vector<16x32xf32>
    %546 = vector.broadcast %103 : vector<1x32xf32> to vector<16x32xf32>
    %547 = arith.addf %545, %546 : vector<16x32xf32>
    %548 = vector.shape_cast %547 : vector<16x32xf32> to vector<2x8x32xf32>
    %c0_147 = arith.constant 0 : index
    %c0_148 = arith.constant 0 : index
    %c0_149 = arith.constant 0 : index
    %549 = vector.load %arg18[%c0_147, %c0_148, %c0_149] : memref<2x8x32xf32, #tpu.memory_space<vmem>>, vector<2x8x32xf32>
    tpu.vector_store %arg18[%c0_147, %c0_148, %c0_149], %548 {strides = array<i32>} : memref<2x8x32xf32, #tpu.memory_space<vmem>>, vector<2x8x32xf32>,
    return
  }
  func.func @transform_0(%arg0: i32) -> (i32, i32, i32) {
    %c0_i32 = arith.constant 0 : i32
    %c0_i32_0 = arith.constant 0 : i32
    %c0_i32_1 = arith.constant 0 : i32
    return %arg0, %c0_i32, %c0_i32_0 : i32, i32, i32
  }
  func.func @transform_1(%arg0: i32) -> (i32, i32, i32) {
    %c0_i32 = arith.constant 0 : i32
    %c0_i32_0 = arith.constant 0 : i32
    %c0_i32_1 = arith.constant 0 : i32
    return %arg0, %c0_i32, %c0_i32_0 : i32, i32, i32
  }
  func.func @transform_2(%arg0: i32) -> (i32, i32, i32) {
    %c0_i32 = arith.constant 0 : i32
    %c0_i32_0 = arith.constant 0 : i32
    %c0_i32_1 = arith.constant 0 : i32
    return %arg0, %c0_i32, %c0_i32_0 : i32, i32, i32
  }
  func.func @transform_3(%arg0: i32) -> (i32, i32, i32) {
    %c0_i32 = arith.constant 0 : i32
    %c0_i32_0 = arith.constant 0 : i32
    %c0_i32_1 = arith.constant 0 : i32
    return %arg0, %c0_i32, %c0_i32_0 : i32, i32, i32
  }
  func.func @transform_4(%arg0: i32) -> (i32, i32) {
    %c0_i32 = arith.constant 0 : i32
    %c0_i32_0 = arith.constant 0 : i32
    %c0_i32_1 = arith.constant 0 : i32
    return %c0_i32, %c0_i32_0 : i32, i32
  }
  func.func @transform_5(%arg0: i32) -> (i32, i32) {
    %c0_i32 = arith.constant 0 : i32
    %c0_i32_0 = arith.constant 0 : i32
    %c0_i32_1 = arith.constant 0 : i32
    return %c0_i32, %c0_i32_0 : i32, i32
  }
  func.func @transform_6(%arg0: i32) -> (i32, i32) {
    %c0_i32 = arith.constant 0 : i32
    %c0_i32_0 = arith.constant 0 : i32
    %c0_i32_1 = arith.constant 0 : i32
    return %c0_i32, %c0_i32_0 : i32, i32
  }
  func.func @transform_7(%arg0: i32) -> (i32, i32) {
    %c0_i32 = arith.constant 0 : i32
    %c0_i32_0 = arith.constant 0 : i32
    %c0_i32_1 = arith.constant 0 : i32
    return %c0_i32, %c0_i32_0 : i32, i32
  }
  func.func @transform_8(%arg0: i32) -> (i32, i32) {
    %c0_i32 = arith.constant 0 : i32
    %c0_i32_0 = arith.constant 0 : i32
    %c0_i32_1 = arith.constant 0 : i32
    return %c0_i32, %c0_i32_0 : i32, i32
  }
  func.func @transform_9(%arg0: i32) -> (i32, i32) {
    %c0_i32 = arith.constant 0 : i32
    %c0_i32_0 = arith.constant 0 : i32
    %c0_i32_1 = arith.constant 0 : i32
    return %c0_i32, %c0_i32_0 : i32, i32
  }
  func.func @transform_10(%arg0: i32) -> (i32, i32) {
    %c0_i32 = arith.constant 0 : i32
    %c0_i32_0 = arith.constant 0 : i32
    %c0_i32_1 = arith.constant 0 : i32
    return %c0_i32, %c0_i32_0 : i32, i32
  }
  func.func @transform_11(%arg0: i32) -> (i32, i32) {
    %c0_i32 = arith.constant 0 : i32
    %c0_i32_0 = arith.constant 0 : i32
    %c0_i32_1 = arith.constant 0 : i32
    return %c0_i32, %c0_i32_0 : i32, i32
  }
  func.func @transform_12(%arg0: i32) -> (i32, i32) {
    %c0_i32 = arith.constant 0 : i32
    %c0_i32_0 = arith.constant 0 : i32
    %c0_i32_1 = arith.constant 0 : i32
    return %c0_i32, %c0_i32_0 : i32, i32
  }
  func.func @transform_13(%arg0: i32) -> (i32, i32) {
    %c0_i32 = arith.constant 0 : i32
    %c0_i32_0 = arith.constant 0 : i32
    %c0_i32_1 = arith.constant 0 : i32
    return %c0_i32, %c0_i32_0 : i32, i32
  }
  func.func @transform_14(%arg0: i32) -> (i32, i32) {
    %c0_i32 = arith.constant 0 : i32
    %c0_i32_0 = arith.constant 0 : i32
    %c0_i32_1 = arith.constant 0 : i32
    return %c0_i32, %c0_i32_0 : i32, i32
  }
  func.func @transform_15(%arg0: i32) -> (i32, i32) {
    %c0_i32 = arith.constant 0 : i32
    %c0_i32_0 = arith.constant 0 : i32
    %c0_i32_1 = arith.constant 0 : i32
    return %c0_i32, %c0_i32_0 : i32, i32
  }
  func.func @transform_16(%arg0: i32) -> (i32, i32) {
    %c0_i32 = arith.constant 0 : i32
    %c0_i32_0 = arith.constant 0 : i32
    %c0_i32_1 = arith.constant 0 : i32
    return %c0_i32, %c0_i32_0 : i32, i32
  }
  func.func @transform_17(%arg0: i32) -> (i32, i32, i32) {
    %c0_i32 = arith.constant 0 : i32
    %c0_i32_0 = arith.constant 0 : i32
    %c0_i32_1 = arith.constant 0 : i32
    return %arg0, %c0_i32, %c0_i32_0 : i32, i32, i32
  }
}

</mosaic_0001>

<bundles_post_ra>
// kernel: transformer_decoder_layer.1
= control target key start
LH: loop header
LB: loop body
LE: loop exit
PB: predicated region body
PF: predicated region fallthrough
CT: control target
= control target key end

     0   :  { %vm84_vm0 = vcmask 261120   ;;  %s2216_s24 = smov 88   ;;  %s2217_s25 = smov 96   ;;  %vm109_vm1 = vcmask 64512   ;;  %vm182_vm2 = vcmask 1043456   ;;  %vm342_vm3 = vcmask 130112   ;;  %s3220_s4 = inlined_call_operand.vmem [shape: bf16[32,96], index: 4, kind: input, shape index: {}]   ;;  %s3221_s0 = inlined_call_operand.vmem [shape: f32[2,8,32], index: 0, kind: input, shape index: {}]   ;;  %s3222_s1 = inlined_call_operand.vmem [shape: f32[2,8,32], index: 1, kind: input, shape index: {}]   ;;  %s3223_s5 = inlined_call_operand.vmem [shape: f32[1,96], index: 5, kind: input, shape index: {}]   ;;  %s3224_s6 = inlined_call_operand.vmem [shape: bf16[32,32], index: 6, kind: input, shape index: {}]   ;;  %s3225_s2 = inlined_call_operand.vmem [shape: f32[2,16,32], index: 2, kind: input, shape index: {}]   ;;  %s3226_s7 = inlined_call_operand.vmem [shape: f32[1,32], index: 7, kind: input, shape index: {}]   ;;  %s3227_s3 = inlined_call_operand.vmem [shape: f32[2,8,2], index: 3, kind: input, shape index: {}]   ;;  %s3228_s9 = inlined_call_operand.vmem [shape: f32[1,24], index: 9, kind: input, shape index: {}]   ;;  %s3229_s8 = inlined_call_operand.vmem [shape: bf16[32,24], index: 8, kind: input, shape index: {}]   ;;  %s3230_s11 = inlined_call_operand.vmem [shape: f32[1,32], index: 11, kind: input, shape index: {}]   ;;  %s3231_s10 = inlined_call_operand.vmem [shape: bf16[32,32], index: 10, kind: input, shape index: {}]   ;;  %s3232_s16 = inlined_call_operand.vmem [shape: f32[6,32], index: 16, kind: input, shape index: {}]   ;;  %s3233_s13 = inlined_call_operand.vmem [shape: f32[1,64], index: 13, kind: input, shape index: {}]   ;;  %s3234_s12 = inlined_call_operand.vmem [shape: bf16[32,64], index: 12, kind: input, shape index: {}]   ;;  %s3235_s15 = inlined_call_operand.vmem [shape: f32[1,32], index: 15, kind: input, shape index: {}]   ;;  %s3236_s14 = inlined_call_operand.vmem [shape: bf16[64,32], index: 14, kind: input, shape index: {}]   ;;  %s3237_s17 = inlined_call_operand.vmem [shape: f32[2,8,32], index: 17, kind: output, shape index: {}]  }
   0x1   :  { %3265 = sst [smem:[#allocation20_spill]] %s3220_s4  ;;  %v59_v3 = vld [vmem:[%s3222_s1] sm:$0xff]  ;;  %v60_v4 = vld [vmem:[%s3222_s1 + $0x8] sm:$0xff]  ;;  %s2215_s1 = smov 120   ;;  %vm465_vm4 = vcmask 195712   ;;  %vm588_vm5 = vcmask 261312  }
   0x2   :  { %3266 = sst [smem:[#allocation21_spill]] %s3221_s0  ;;  %v2123_v9 = vld [vmem:[%s3223_s5] ss:$0 sm:$0xff]  ;;  %s2218_s5 = smov 112   ;;  %vm1213_vm6 = vcmask 171152   ;;  %vm753_vm7 = vcmask 121952  }
   0x3   :  { %3267 = sst [smem:[#allocation22_spill]] %s3230_s11  ;;  %s2220_s27 = smov 72   ;;  %vm1004_vm8 = vcmask 146552   ;;  %vm1422_vm9 = vcmask 195752   ;;  %vm774_vm10 = vcmask 23552  }
   0x4   :  { %s3268_s26 = sld [smem:[#allocation20_spill]]  ;;  %s2221_s28 = smov 104  }
   0x5   :  { %s3269_s11 = sld [smem:[#allocation21_spill]]  ;;  %s2222_s29 = smov 64  }
   0x6   :  { %s2223_s4 = smov 56   ;;  %s2224_s30 = smov 48  }
   0x7   :  { %s2228_s0 = smov 8  }
   0xa   :  { %v1964_v0 = vld [vmem:[%s3268_s26 + $0x8] sm:$0xff]  ;;  %v1963_v5 = vld [vmem:[%s3268_s26] sm:$0xff]  ;;  %s2219_s26 = smov 80  }
   0xb   :  { %v57_v1 = vld [vmem:[%s3269_s11] sm:$0xff]  ;;  %v58_v2 = vld [vmem:[%s3269_s11 + $0x8] sm:$0xff]  ;;  %94 = vmatpush.bf16.msra.mxu0 %v1964_v0 }
   0xc   :  { %v2367_v6 = vadd.f32 %v59_v3, %v57_v1  ;;  %v2369_v7 = vadd.f32 %v60_v4, %v58_v2 }
   0xe   :  { %v63_v8 = vpack.c.bf16 %v2369_v7, %v2367_v6 }
   0xf   :  { %95 = vmatpush.bf16.msra.mxu0 %v1963_v5 }
  0x12   :  { %1884 = vmatmul.msk.bf16.vlgmr.msra.gmra.mxu0 %vm84_vm0, %v63_v8 }
  0x8f   :  { %v97_v10 = vpop.f32.mrf.mxu0 }
  0x90   :  { %v98_v11 = vadd.f32 %v2123_v9, %v97_v10 }
  0x92   :  { %v102_v12 = vpack.c.bf16 %v98_v11, %v98_v11 }
  0x94   :  { %v105_v13 = vunpack.c.l.b16 %v102_v12 }
  0x96   :  { %v2377_v14 = vpack.c.b16 %v105_v13, %v105_v13 }
  0x97   :  { %v99_v15 = vpop.f32.mrf.mxu0 }
  0x98   :  { %v100_v16 = vadd.f32 %v2123_v9, %v99_v15  ;;  %222 = vrot.lane.b32.xlu2 %v2377_v14, %s2215_s1  ;;  %224 = vrot.lane.b32.xlu1 %v2377_v14, %s2216_s24 }
  0x99   :  { %107 = vrot.lane.b32.xlu0 %v2377_v14, %s2217_s25 }
  0x9a   :  { %v103_v17 = vpack.c.bf16 %v100_v16, %v100_v16 }
  0x9c   :  { %v130_v18 = vunpack.c.l.b16 %v103_v17 }
  0x9e   :  { %v2383_v19 = vpack.c.b16 %v130_v18, %v130_v18 }
  0xa0   :  { %245 = vrot.lane.b32.xlu2 %v2383_v19, %s2215_s1  ;;  %247 = vrot.lane.b32.xlu1 %v2383_v19, %s2216_s24 }
  0xa1   :  { %132 = vrot.lane.b32.xlu0 %v2383_v19, %s2217_s25  ;;  %s2242_s25 = smov 110  }
  0xa8   :  { %345 = vrot.lane.b32.xlu2 %v2377_v14, %s2218_s5  ;;  %370 = vrot.lane.b32.xlu1 %v2383_v19, %s2219_s26 }
  0xa9   :  { %347 = vrot.lane.b32.xlu0 %v2377_v14, %s2219_s26  ;;  %s2243_s26 = smov 107  }
  0xb0   :  { %493 = vrot.lane.b32.xlu2 %v2383_v19, %s2220_s27  ;;  %470 = vrot.lane.b32.xlu1 %v2377_v14, %s2220_s27  ;;  %s2245_s27 = smov 113  }
  0xb1   :  { %368 = vrot.lane.b32.xlu0 %v2383_v19, %s2218_s5 }
  0xb8   :  { %491 = vrot.lane.b32.xlu1 %v2383_v19, %s2221_s28 }
  0xb9   :  { %468 = vrot.lane.b32.xlu0 %v2377_v14, %s2221_s28 }
  0xf2   :  { %v223_v20 = vpop.permute.xlu2 %222 }
  0xfa   :  { %v246_v25 = vpop.permute.xlu2 %245 }
 0x102   :  { %v346_v30 = vpop.permute.xlu2 %345 }
 0x10a   :  { %v225_v21 = vpop.permute.xlu1 %224  ;;  %v494_v35 = vpop.permute.xlu2 %493 }
 0x10b   :  { %v108_v22 = vpop.permute.xlu0 %107  ;;  %v230_v23 = vsel %vm109_vm1, %v225_v21, 0  ;;  %v499_v38 = vsel %vm109_vm1, %v494_v35, 0  ;;  %v661_v35 = vld [vmem:[%s3225_s2 + $0x8] sm:$0xff] }
 0x10c   :  { %v114_v24 = vsel %vm109_vm1, %v108_v22, 0  ;;  %239 = vmatpush.bf16.xpose.msrb.mxu0 %v230_v23 }
 0x10d   :  { %123 = vmatpush.bf16.xpose.msra.mxu1 %v114_v24 }
 0x112   :  { %v248_v26 = vpop.permute.xlu1 %247 }
 0x113   :  { %v133_v27 = vpop.permute.xlu0 %132  ;;  %1889 = vmatmul.msk.bf16.vlgmr.msrb.gmra.mxu0 %vm109_vm1, %v223_v20  ;;  %v253_v28 = vsel %vm109_vm1, %v248_v26, 0 }
 0x114   :  { %1885 = vmatmul.msk.bf16.vlgmr.msra.gmra.mxu1 %vm109_vm1, %v102_v12  ;;  %v138_v29 = vsel %vm109_vm1, %v133_v27, 0 }
 0x115   :  { %147 = vmatpush.bf16.xpose.msra.mxu2 %v138_v29  ;;  %262 = vmatpush.bf16.xpose.msrb.mxu1 %v253_v28 }
 0x11a   :  { %v371_v31 = vpop.permute.xlu1 %370 }
 0x11b   :  { %v376_v32 = vsel %vm109_vm1, %v371_v31, 0  ;;  %v348_v33 = vpop.permute.xlu0 %347 }
 0x11c   :  { %v353_v34 = vsel %vm109_vm1, %v348_v33, 0  ;;  %1886 = vmatmul.msk.bf16.vlgmr.msra.gmra.mxu2 %vm109_vm1, %v103_v17  ;;  %v1965_v33 = vld [vmem:[%s3224_s6] sm:$0xff] }
 0x11d   :  { %385 = vmatpush.bf16.xpose.msra.mxu1 %v376_v32  ;;  %362 = vmatpush.bf16.xpose.msra.mxu0 %v353_v34  ;;  %v1966_v32 = vld [vmem:[%s3224_s6 + $0x8] sm:$0xff]  ;;  %v660_v34 = vld [vmem:[%s3225_s2] sm:$0xff]  ;;  %s2244_s6 = smov 116  }
 0x122   :  { %v471_v36 = vpop.permute.xlu1 %470 }
 0x123   :  { %v476_v37 = vsel %vm109_vm1, %v471_v36, 0  ;;  %v369_v39 = vpop.permute.xlu0 %368  ;;  %v664_v36 = vpack.c.bf16 %v661_v35, %v660_v34 }
 0x124   :  { %1890 = vmatmul.msk.bf16.vlgmr.msrb.gmra.mxu1 %vm109_vm1, %v246_v25  ;;  %1893 = vmatmul.msk.bf16.vlgmr.msra.gmra.mxu0 %vm109_vm1, %v346_v30 }
 0x125   :  { %508 = vmatpush.bf16.xpose.msrb.mxu1 %v499_v38  ;;  %485 = vmatpush.bf16.xpose.msrb.mxu0 %v476_v37 }
 0x12a   :  { %v492_v41 = vpop.permute.xlu1 %491 }
 0x12b   :  { %v469_v40 = vpop.permute.xlu0 %468 }
 0x12d   :  { %698 = vmatpush.bf16.msra.mxu0 %v1966_v32 }
 0x131   :  { %699 = vmatpush.bf16.msra.mxu0 %v1965_v33 }
 0x134   :  { %1894 = vmatmul.msk.bf16.vlgmr.msra.gmra.mxu1 %vm109_vm1, %v369_v39  ;;  %1897 = vmatmul.msk.bf16.vlgmr.msrb.gmra.mxu0 %vm109_vm1, %v469_v40 }
 0x144   :  { %1898 = vmatmul.msk.bf16.vlgmr.msrb.gmra.mxu1 %vm109_vm1, %v492_v41  ;;  %1909 = vmatmul.msk.bf16.vlgmr.msra.gmra.mxu0 %vm84_vm0, %v664_v36  ;;  %v662_v41 = vld [vmem:[%s3225_s2 + $0x10] sm:$0xff] }
 0x190   :  { %v241_v42 = vpop.f32.mrf.mxu0 }
 0x191   :  { %v125_v43 = vpop.f32.mrf.mxu1  ;;  %v268_v44 = vsel %vm109_vm1, %v241_v42, -inf }
 0x192   :  { %269 = vmax.xlane.f32.xlu1 %v268_v44  ;;  %v153_v45 = vsel %vm109_vm1, %v125_v43, -inf }
 0x193   :  { %154 = vmax.xlane.f32.xlu2 %v153_v45 }
 0x198   :  { %v243_v46 = vpop.f32.mrf.mxu0 }
 0x199   :  { %v127_v47 = vpop.f32.mrf.mxu1 }
 0x19f   :  { %v149_v48 = vpop.f32.mrf.mxu2 }
 0x1a0   :  { %v156_v49 = vsel %vm109_vm1, %v149_v48, -inf }
 0x1a1   :  { %v264_v50 = vpop.f32.mrf.mxu1  ;;  %157 = vmax.xlane.f32.xlu0 %v156_v49  ;;  %v2420_v51 = vpop.f32.mrf.mxu0 }
 0x1a2   :  { %v271_v52 = vsel %vm109_vm1, %v264_v50, -inf  ;;  %v391_v0 = vsel %vm109_vm1, %v2420_v51, -inf }
 0x1a3   :  { %272 = vmax.xlane.f32.xlu2 %v271_v52 }
 0x1a7   :  { %v151_v53 = vpop.f32.mrf.mxu2 }
 0x1a9   :  { %v266_v54 = vpop.f32.mrf.mxu1  ;;  %v366_v55 = vpop.f32.mrf.mxu0 }
 0x1ab   :  { %199 = vrot.lane.b32.xlu1 %v2383_v19, %s2222_s29 }
 0x1b1   :  { %v2424_v56 = vpop.f32.mrf.mxu1  ;;  %v2426_v57 = vpop.f32.mrf.mxu0 }
 0x1b2   :  { %v394_v63 = vsel %vm109_vm1, %v2424_v56, -inf  ;;  %v514_v1 = vsel %vm109_vm1, %v2426_v57, -inf }
 0x1b3   :  { %313 = vrot.lane.b32.xlu1 %v2383_v19, %s2223_s4 }
 0x1b5   :  { %292 = vrot.lane.b32.xlu0 %v2377_v14, %s2223_s4 }
 0x1b9   :  { %v389_v58 = vpop.f32.mrf.mxu1  ;;  %v489_v59 = vpop.f32.mrf.mxu0 }
 0x1bb   :  { %177 = vrot.lane.b32.xlu2 %v2377_v14, %s2222_s29 }
 0x1c1   :  { %v2431_v60 = vpop.f32.mrf.mxu1 }
 0x1c2   :  { %v517_v62 = vsel %vm109_vm1, %v2431_v60, -inf }
 0x1c9   :  { %v512_v61 = vpop.f32.mrf.mxu1 }
 0x1dd   :  { %518 = vmax.xlane.f32.xlu1 %v517_v62 }
 0x1df   :  { %395 = vmax.xlane.f32.xlu0 %v394_v63 }
 0x1e4   :  { %392 = vmax.xlane.f32.xlu2 %v391_v0 }
 0x1e7   :  { %515 = vmax.xlane.f32.xlu0 %v514_v1 }
 0x205   :  { %v270_v2 = vpop.xlane.xlu1 %269 }
 0x206   :  { %v274_v3 = vsub.f32 %v241_v42, %v270_v2  ;;  %v155_v4 = vpop.xlane.xlu2 %154  ;;  %v663_v42 = vld [vmem:[%s3225_s2 + $0x18] sm:$0xff]  ;;  %s2225_s2 = smov 40  }
 0x207   :  { %v159_v5 = vsub.f32 %v125_v43, %v155_v4  ;;  %v665_v45 = vpack.c.bf16 %v663_v42, %v662_v41 }
 0x208   :  { %v276_v8 = vmul.f32 1.442695, %v274_v3 }
 0x209   :  { %v161_v9 = vmul.f32 1.442695, %v159_v5  ;;  %1910 = vmatmul.msk.bf16.gmra.mxu0 %vm84_vm0, %v665_v45 }
 0x20a   :  { %2135 = vpow2.f32 %v276_v8 }
 0x20b   :  { %2137 = vpow2.f32 %v161_v9 }
 0x210   :  { %v2441_v10 = vpop.eup %2135 }
 0x211   :  { %v2443_v11 = vpop.eup %2137  ;;  %v280_v12 = vsel %vm109_vm1, %v2441_v10, 0.0 }
 0x212   :  { %v165_v13 = vsel %vm109_vm1, %v2443_v11, 0.0  ;;  %281 = vadd.xlane.f32.xlu0 %v280_v12 }
 0x213   :  { %166 = vadd.xlane.f32.xlu1 %v165_v13 }
 0x214   :  { %v158_v15 = vpop.xlane.xlu0 %157 }
 0x215   :  { %v160_v16 = vsub.f32 %v149_v48, %v158_v15 }
 0x216   :  { %v273_v17 = vpop.xlane.xlu2 %272 }
 0x217   :  { %v163_v18 = vmul.f32 1.442695, %v160_v16  ;;  %v275_v20 = vsub.f32 %v264_v50, %v273_v17 }
 0x219   :  { %2139 = vpow2.f32 %v163_v18  ;;  %v278_v21 = vmul.f32 1.442695, %v275_v20  ;;  %v701_v20 = vpop.f32.mrf.mxu0 }
 0x21b   :  { %2141 = vpow2.f32 %v278_v21 }
 0x21d   :  { %v200_v22 = vpop.permute.xlu1 %199 }
 0x21e   :  { %v178_v23 = vpop.permute.xlu2 %177  ;;  %v205_v24 = vsel %vm182_vm2, %v200_v22, 0 }
 0x21f   :  { %v2450_v25 = vpop.eup %2139  ;;  %v184_v26 = vsel %vm182_vm2, %v178_v23, 0  ;;  %v749_v23 = vld [vmem:[%s3227_s3] sm:$0xff] }
 0x220   :  { %193 = vmatpush.bf16.msra.mxu3 %v184_v26  ;;  %v168_v27 = vsel %vm109_vm1, %v2450_v25, 0.0  ;;  %v2227_v26 = vmov 0  }
 0x221   :  { %v2455_v28 = vpop.eup %2141  ;;  %169 = vadd.xlane.f32.xlu0 %v168_v27  ;;  %v703_v21 = vpop.f32.mrf.mxu0  ;;  %2026 = vset.pattern.permute.xlu1 %v2227_v26 }
 0x222   :  { %v283_v29 = vsel %vm109_vm1, %v2455_v28, 0.0 }
 0x223   :  { %284 = vadd.xlane.f32.xlu2 %v283_v29 }
 0x224   :  { %214 = vmatpush.bf16.msrb.mxu3 %v205_v24  ;;  %v2124_v24 = vld [vmem:[%s3226_s7] ss:$0 sm:$0xff] }
 0x225   :  { %v314_v37 = vpop.permute.xlu1 %313 }
 0x226   :  { %v319_v5 = vsel %vm182_vm2, %v314_v37, 0 }
 0x227   :  { %v293_v30 = vpop.permute.xlu0 %292 }
 0x228   :  { %v298_v31 = vsel %vm182_vm2, %v293_v30, 0 }
 0x229   :  { %307 = vmatpush.bf16.msrb.mxu2 %v298_v31 }
 0x22c   :  { %436 = vrot.lane.b32.xlu1 %v2383_v19, %s2224_s30 }
 0x23b   :  { %415 = vrot.lane.b32.xlu2 %v2377_v14, %s2224_s30 }
 0x250   :  { %v519_v38 = vpop.xlane.xlu1 %518 }
 0x251   :  { %v521_v39 = vsub.f32 %v2431_v60, %v519_v38 }
 0x252   :  { %v396_v40 = vpop.xlane.xlu0 %395 }
 0x253   :  { %v398_v43 = vsub.f32 %v2424_v56, %v396_v40  ;;  %v524_v46 = vmul.f32 1.442695, %v521_v39 }
 0x255   :  { %v401_v44 = vmul.f32 1.442695, %v398_v43  ;;  %v702_v43 = vadd.f32 %v2124_v24, %v701_v20 }
 0x257   :  { %2143 = vpow2.f32 %v401_v44  ;;  %v393_v47 = vpop.xlane.xlu2 %392  ;;  %v704_v44 = vadd.f32 %v2124_v24, %v703_v21 }
 0x258   :  { %v397_v48 = vsub.f32 %v2420_v51, %v393_v47  ;;  %2145 = vpow2.f32 %v524_v46  ;;  %v951_v47 = vpack.c.bf16 %v702_v43, %v702_v43 }
 0x25a   :  { %v399_v49 = vmul.f32 1.442695, %v397_v48  ;;  %v516_v50 = vpop.xlane.xlu0 %515  ;;  %v952_v48 = vpack.c.bf16 %v704_v44, %v704_v44 }
 0x25b   :  { %v520_v52 = vsub.f32 %v2426_v57, %v516_v50  ;;  %v959_v50 = vunpack.c.l.b16 %v951_v47 }
 0x25c   :  { %2147 = vpow2.f32 %v399_v49 }
 0x25d   :  { %v2486_v53 = vpop.eup %2143  ;;  %v522_v54 = vmul.f32 1.442695, %v520_v52  ;;  %v960_v52 = vunpack.c.l.b16 %v952_v48 }
 0x25e   :  { %v406_v55 = vsel %vm109_vm1, %v2486_v53, 0.0  ;;  %v2490_v56 = vpop.eup %2145 }
 0x25f   :  { %2149 = vpow2.f32 %v522_v54  ;;  %407 = vadd.xlane.f32.xlu0 %v406_v55  ;;  %v529_v59 = vsel %vm109_vm1, %v2490_v56, 0.0 }
 0x262   :  { %v2492_v58 = vpop.eup %2147 }
 0x263   :  { %v403_v51 = vsel %vm109_vm1, %v2492_v58, 0.0 }
 0x264   :  { %404 = vadd.xlane.f32.xlu1 %v403_v51  ;;  %530 = vadd.xlane.f32.xlu2 %v529_v59  ;;  %v2534_v51 = vpack.c.b16 %v960_v52, %v959_v50 }
 0x265   :  { %v2498_v57 = vpop.eup %2149 }
 0x266   :  { %v526_v60 = vsel %vm109_vm1, %v2498_v57, 0.0 }
 0x267   :  { %527 = vadd.xlane.f32.xlu0 %v526_v60 }
 0x27b   :  { %538 = vrot.lane.b32.xlu0 %v2377_v14, %s2225_s2 }
 0x27d   :  { %559 = vrot.lane.b32.xlu1 %v2383_v19, %s2225_s2 }
 0x285   :  { %v282_v61 = vpop.xlane.xlu0 %281  ;;  %798 = vperm.xlu1 %2026, %v749_v23  }
 0x286   :  { %v167_v62 = vpop.xlane.xlu1 %166  ;;  %2151 = vrcp.f32 %v282_v61  ;;  %v706_v27 = vpop.f32.mrf.mxu0 }
 0x287   :  { %2153 = vrcp.f32 %v167_v62  ;;  %v707_v30 = vadd.f32 %v2124_v24, %v706_v27  ;;  %v1968_v27 = vld [vmem:[%s3229_s8 + $0x8] sm:$0xff] }
 0x288   :  { %741 = vmatpush.bf16.msra.mxu1 %v1968_v27 }
 0x289   :  { %v953_v33 = vpack.c.bf16 %v707_v30, %v707_v30 }
 0x28b   :  { %v982_v39 = vunpack.c.l.b16 %v953_v33 }
 0x28c   :  { %v2152_v63 = vpop.eup %2151 }
 0x28d   :  { %v2154_v0 = vpop.eup %2153  ;;  %v288_v1 = vmul.f32 %v2152_v63, %v2441_v10 }
 0x28e   :  { %v173_v2 = vmul.f32 %v2154_v0, %v2443_v11  ;;  %v708_v34 = vpop.f32.mrf.mxu0 }
 0x28f   :  { %v290_v3 = vpack.c.bf16 %v288_v1, %v288_v1  ;;  %v709_v36 = vadd.f32 %v2124_v24, %v708_v34 }
 0x290   :  { %v175_v4 = vpack.c.bf16 %v173_v2, %v173_v2 }
 0x291   :  { %1891 = vmatmul.msk.bf16.vlgmr.msrb.gmra.mxu2 %vm109_vm1, %v290_v3  ;;  %v954_v40 = vpack.c.bf16 %v709_v36, %v709_v36 }
 0x292   :  { %1887 = vmatmul.msk.bf16.vlgmr.msra.gmra.mxu3 %vm109_vm1, %v175_v4 }
 0x293   :  { %328 = vmatpush.bf16.msra.mxu3 %v319_v5  ;;  %v983_v45 = vunpack.c.l.b16 %v954_v40  ;;  %v2231_v40 = vmov 2  }
 0x294   :  { %v170_v14 = vpop.xlane.xlu0 %169 }
 0x295   :  { %2155 = vrcp.f32 %v170_v14  ;;  %v2528_v46 = vpack.c.b16 %v983_v45, %v982_v39 }
 0x296   :  { %v285_v19 = vpop.xlane.xlu2 %284 }
 0x297   :  { %2157 = vrcp.f32 %v285_v19 }
 0x29b   :  { %v2156_v8 = vpop.eup %2155 }
 0x29c   :  { %v174_v9 = vmul.f32 %v2156_v8, %v2450_v25  ;;  %v2226_v25 = vmov 1  }
 0x29d   :  { %v2158_v16 = vpop.eup %2157  ;;  %2025 = vset.pattern.permute.xlu0 %v2226_v25  ;;  %2027 = vset.pattern.permute.xlu2 %v2226_v25 }
 0x29e   :  { %v416_v12 = vpop.permute.xlu2 %415  ;;  %v437_v13 = vpop.permute.xlu1 %436  ;;  %v176_v11 = vpack.c.bf16 %v174_v9, %v174_v9  ;;  %v289_v17 = vmul.f32 %v2158_v16, %v2455_v28  ;;  %787 = vperm.xlu0 %2025, %v749_v23  }
 0x29f   :  { %v421_v10 = vsel %vm182_vm2, %v416_v12, 0  ;;  %v442_v15 = vsel %vm182_vm2, %v437_v13, 0 }
 0x2a0   :  { %430 = vmatpush.bf16.msra.mxu2 %v421_v10  ;;  %v291_v18 = vpack.c.bf16 %v289_v17, %v289_v17 }
 0x2a2   :  { %1888 = vmatmul.msk.bf16.vlgmr.msrb.gmra.mxu3 %vm109_vm1, %v176_v11 }
 0x2a3   :  { %451 = vmatpush.bf16.msrb.mxu3 %v442_v15 }
 0x2a6   :  { %1184 = vrot.lane.b32.xlu0 %v2528_v46, %s2215_s1 }
 0x2ae   :  { %1602 = vrot.lane.b32.xlu0 %v2528_v46, %s2221_s28 }
 0x2b2   :  { %1892 = vmatmul.msk.bf16.vlgmr.msra.gmra.mxu3 %vm109_vm1, %v291_v18 }
 0x2d2   :  { %v408_v22 = vpop.xlane.xlu0 %407 }
 0x2d3   :  { %2159 = vrcp.f32 %v408_v22 }
 0x2d7   :  { %v405_v28 = vpop.xlane.xlu1 %404  ;;  %v531_v38 = vpop.xlane.xlu2 %530 }
 0x2d8   :  { %2161 = vrcp.f32 %v405_v28  ;;  %v1967_v28 = vld [vmem:[%s3229_s8] sm:$0xff] }
 0x2d9   :  { %v2160_v29 = vpop.eup %2159  ;;  %2163 = vrcp.f32 %v531_v38  ;;  %742 = vmatpush.bf16.msra.mxu1 %v1967_v28 }
 0x2da   :  { %v412_v31 = vmul.f32 %v2160_v29, %v2486_v53  ;;  %v528_v42 = vpop.xlane.xlu0 %527 }
 0x2db   :  { %2165 = vrcp.f32 %v528_v42  ;;  %v2125_v42 = vld [vmem:[%s3228_s9] ss:$0 sm:$0xff]  ;;  %s2233_s9 = smov 12  }
 0x2dc   :  { %v414_v32 = vpack.c.bf16 %v412_v31, %v412_v31 }
 0x2de   :  { %1896 = vmatmul.msk.bf16.vlgmr.msrb.gmra.mxu3 %vm109_vm1, %v414_v32  ;;  %v2162_v35 = vpop.eup %2161 }
 0x2df   :  { %v411_v37 = vmul.f32 %v2162_v35, %v2492_v58  ;;  %v2164_v49 = vpop.eup %2163 }
 0x2e0   :  { %v535_v55 = vmul.f32 %v2164_v49, %v2490_v56  ;;  %v750_v56 = vld [vmem:[%s3227_s3 + $0x8] sm:$0xff]  ;;  %s2229_s3 = smov 16  }
 0x2e1   :  { %v413_v41 = vpack.c.bf16 %v411_v37, %v411_v37  ;;  %v2166_v53 = vpop.eup %2165  ;;  %802 = vperm.xlu1 %2026, %v750_v56   ;;  %792 = vperm.xlu2 %2027, %v750_v56  }
 0x2e2   :  { %v534_v58 = vmul.f32 %v2166_v53, %v2498_v57  ;;  %v537_v62 = vpack.c.bf16 %v535_v55, %v535_v55  ;;  %v2235_v55 = vmov 9  }
 0x2e3   :  { %1895 = vmatmul.msk.bf16.vlgmr.msra.gmra.mxu2 %vm109_vm1, %v413_v41  ;;  %v2232_v41 = vmov 8  }
 0x2e4   :  { %v536_v63 = vpack.c.bf16 %v534_v58, %v534_v58  ;;  %2035 = vset.pattern.permute.xlu0 %v2232_v41  ;;  %v2236_v58 = vmov 4  }
 0x2e9   :  { %1165 = vrot.lane.b32.xlu1 %v2534_v51, %s2215_s1  ;;  %s2230_s1 = smov 24   ;;  %2029 = vset.pattern.permute.xlu2 %v2231_v40 }
 0x2ed   :  { %v539_v54 = vpop.permute.xlu0 %538 }
 0x2ee   :  { %v544_v59 = vsel %vm182_vm2, %v539_v54, 0  ;;  %v2234_v54 = vmov 3  }
 0x2ef   :  { %v560_v60 = vpop.permute.xlu1 %559  ;;  %553 = vmatpush.bf16.msrb.mxu2 %v544_v59  ;;  %v2237_v59 = vmov 10  }
 0x2f0   :  { %v565_v61 = vsel %vm182_vm2, %v560_v60, 0  ;;  %v2238_v60 = vmov 6  }
 0x2f1   :  { %574 = vmatpush.bf16.msra.mxu3 %v565_v61  ;;  %1374 = vrot.lane.b32.xlu1 %v2534_v51, %s2218_s5  ;;  %v2239_v61 = vmov 7  }
 0x2f3   :  { %974 = vmatpush.bf16.msra.mxu2 %v2534_v51 }
 0x2f4   :  { %1899 = vmatmul.msk.bf16.vlgmr.msrb.gmra.mxu2 %vm109_vm1, %v536_v63  ;;  %1900 = vmatmul.msk.bf16.vlgmr.msra.gmra.mxu3 %vm109_vm1, %v537_v62  ;;  %v2240_v62 = vmov 5   ;;  %v3240_v63 = vmov 11  }
 0x2f5   :  { %996 = vmatpush.bf16.msrb.mxu3 %v2528_v46 }
 0x2f7   :  { %v799_v12 = vpop.permute.xlu1 %798 }
 0x310   :  { %v2555_v19 = vpop.permute.xlu0 %787 }
 0x314   :  { %v309_v57 = vpop.f32.mrf.mxu2 }
 0x315   :  { %v195_v0 = vpop.f32.mrf.mxu3  ;;  %336 = vrot.lane.b32.xlu0 %v309_v57, %s2228_s0 }
 0x316   :  { %220 = vst.msk [vmem:[#allocation2] sm:$0xff] %vm109_vm1, %v195_v0 }
 0x318   :  { %v1185_v8 = vpop.permute.xlu0 %1184 }
 0x319   :  { %1197 = vmatpush.bf16.msrb.mxu2 %v1185_v8 }
 0x31c   :  { %v311_v1 = vpop.f32.mrf.mxu2 }
 0x31d   :  { %v197_v2 = vpop.f32.mrf.mxu3 }
 0x320   :  { %v2563_v20 = vpop.permute.xlu0 %1602 }
 0x325   :  { %v216_v3 = vpop.f32.mrf.mxu3 }
 0x326   :  { %221 = vst.msk [vmem:[#allocation2 + $0x8] sm:$0xff] %vm109_vm1, %v216_v3 }
 0x32d   :  { %v218_v4 = vpop.f32.mrf.mxu3 }
 0x335   :  { %v330_v5 = vpop.f32.mrf.mxu3 }
 0x336   :  { %338 = vrot.lane.b32.xlu1 %v330_v5, %s2228_s0 }
 0x33b   :  { %v2573_v30 = vpop.permute.xlu2 %792 }
 0x33d   :  { %v332_v14 = vpop.f32.mrf.mxu3 }
 0x353   :  { %v2559_v15 = vpop.permute.xlu1 %802 }
 0x35b   :  { %v1166_v18 = vpop.permute.xlu1 %1165 }
 0x35c   :  { %1178 = vmatpush.bf16.msrb.mxu1 %v1166_v18 }
 0x361   :  { %v453_v9 = vpop.f32.mrf.mxu3 }
 0x362   :  { %461 = vrot.lane.b32.xlu1 %v453_v9, %s2229_s3 }
 0x363   :  { %v1375_v23 = vpop.permute.xlu1 %1374 }
 0x364   :  { %1387 = vmatpush.bf16.msra.mxu3 %v1375_v23 }
 0x366   :  { %v432_v10 = vpop.f32.mrf.mxu2 }
 0x367   :  { %459 = vrot.lane.b32.xlu0 %v432_v10, %s2229_s3 }
 0x369   :  { %v455_v13 = vpop.f32.mrf.mxu3 }
 0x36e   :  { %v434_v11 = vpop.f32.mrf.mxu2 }
 0x377   :  { %v555_v16 = vpop.f32.mrf.mxu2  ;;  %v576_v17 = vpop.f32.mrf.mxu3 }
 0x378   :  { %582 = vrot.lane.b32.xlu2 %v555_v16, %s2230_s1  ;;  %584 = vrot.lane.b32.xlu0 %v576_v17, %s2230_s1 }
 0x37f   :  { %v557_v21 = vpop.f32.mrf.mxu2  ;;  %v578_v22 = vpop.f32.mrf.mxu3 }
 0x387   :  { %v337_v24 = vpop.permute.xlu0 %336 }
 0x388   :  { %343 = vst.msk [vmem:[#allocation2] sm:$0xff] %vm342_vm3, %v337_v24 }
 0x3a8   :  { %v339_v29 = vpop.permute.xlu1 %338 }
 0x3a9   :  { %344 = vst.msk [vmem:[#allocation2 + $0x8] sm:$0xff] %vm342_vm3, %v339_v29 }
 0x3d2   :  { %v583_v33 = vpop.permute.xlu2 %582 }
 0x3d4   :  { %v462_v31 = vpop.permute.xlu1 %461 }
 0x3d5   :  { %467 = vst.msk [vmem:[#allocation2 + $0x8] sm:$0xff] %vm465_vm4, %v462_v31 }
 0x3d9   :  { %v460_v32 = vpop.permute.xlu0 %459 }
 0x3da   :  { %466 = vst.msk [vmem:[#allocation2] sm:$0xff] %vm465_vm4, %v460_v32 }
 0x3db   :  { %589 = vst.msk [vmem:[#allocation2] sm:$0xff] %vm588_vm5, %v583_v33 }
 0x3e2   :  { %v591_v35 = vld [vmem:[#allocation2] sm:$0xff] }
 0x3e3   :  { %v2580_v37 = vadd.f32 %v591_v35, %v2367_v6 }
 0x3e5   :  { %3270 = vst [vmem:[#allocation4_spill] sm:$0xff] %v2580_v37 }
 0x3ea   :  { %v585_v34 = vpop.permute.xlu0 %584 }
 0x3eb   :  { %590 = vst.msk [vmem:[#allocation2 + $0x8] sm:$0xff] %vm588_vm5, %v585_v34 }
 0x3f2   :  { %v592_v36 = vld [vmem:[#allocation2 + $0x8] sm:$0xff] }
 0x3f3   :  { %v2583_v38 = vadd.f32 %v592_v36, %v2369_v7 }
 0x3f5   :  { %3271 = vst [vmem:[#allocation5_spill] sm:$0xff] %v2583_v38  ;;  %v711_v39 = vpack.c.bf16 %v2583_v38, %v2580_v37 }
 0x3f7   :  { %1919 = vmatmul.msk.bf16.vlgmr.msra.gmra.mxu1 %vm84_vm0, %v711_v39 }
 0x474   :  { %v744_v6 = vpop.f32.mrf.mxu1 }
 0x475   :  { %v2593_v7 = vadd.f32 %v2125_v42, %v744_v6 }
 0x477   :  { %v1214_v43 = vsel %vm1213_vm6, %v2593_v7, -inf  ;;  %v754_v44 = vsel %vm753_vm7, %v2593_v7, -inf  ;;  %v795_v45 = vmul.f32 %v2555_v19, %v2593_v7  ;;  %v1005_v50 = vsel %vm1004_vm8, %v2593_v7, -inf }
 0x478   :  { %1215 = vmax.xlane.f32.xlu0 %v1214_v43  ;;  %755 = vmax.xlane.f32.xlu1 %v754_v44  ;;  %v1423_v53 = vsel %vm1422_vm9, %v2593_v7, -inf }
 0x479   :  { %v805_v47 = vadd.f32 %v799_v12, %v795_v45 }
 0x47b   :  { %v807_v48 = vfloor.f32 %v805_v47 }
 0x47c   :  { %v746_v56 = vpop.f32.mrf.mxu1 }
 0x47d   :  { %v809_v49 = vsub.f32 %v805_v47, %v807_v48  ;;  %v1978_v52 = vcvt.f32.s32 %v807_v48  ;;  %v2618_v57 = vadd.f32 %v2125_v42, %v746_v56 }
 0x47f   :  { %813 = vrot.lane.b32.xlu2 %v809_v49, %s2233_s9  ;;  %v757_v0 = vsel %vm753_vm7, %v2618_v57, -inf  ;;  %v1217_v1 = vsel %vm1213_vm6, %v2618_v57, -inf  ;;  %v1008_v2 = vsel %vm1004_vm8, %v2618_v57, -inf  ;;  %v1426_v3 = vsel %vm1422_vm9, %v2618_v57, -inf }
 0x480   :  { %1006 = vmax.xlane.f32.xlu1 %v1005_v50  ;;  %v2628_v4 = vadd.s32 1, %v1978_v52  ;;  %v796_v5 = vmul.f32 %v2573_v30, %v2618_v57 }
 0x482   :  { %v806_v14 = vadd.f32 %v2559_v15, %v796_v5 }
 0x484   :  { %v808_v19 = vfloor.f32 %v806_v14 }
 0x486   :  { %v810_v8 = vsub.f32 %v806_v14, %v808_v19  ;;  %v2656_v10 = vcvt.f32.s32 %v808_v19 }
 0x487   :  { %912 = vperm.xlu2 %2029, %v1978_v52  }
 0x488   :  { %1424 = vmax.xlane.f32.xlu1 %v1423_v53  ;;  %v2668_v15 = vadd.s32 1, %v2656_v10 }
 0x48c   :  { %1333 = vperm.xlu0 %2035, %v1978_v52  }
 0x48f   :  { %2030 = vset.pattern.permute.xlu2 %v2234_v54 }
 0x490   :  { %1040 = vperm.xlu2 %2030, %v1978_v52  }
 0x494   :  { %2036 = vset.pattern.permute.xlu0 %v2235_v55 }
 0x495   :  { %1458 = vperm.xlu0 %2036, %v1978_v52  }
 0x498   :  { %2031 = vset.pattern.permute.xlu2 %v2236_v58 }
 0x499   :  { %1084 = vperm.xlu2 %2031, %v1978_v52  }
 0x49d   :  { %2037 = vset.pattern.permute.xlu0 %v2237_v59 }
 0x49e   :  { %1502 = vperm.xlu0 %2037, %v1978_v52  }
 0x4a1   :  { %2033 = vset.pattern.permute.xlu2 %v2238_v60  ;;  %826 = vperm.xlu1 %2026, %v1978_v52  }
 0x4a2   :  { %1249 = vperm.xlu2 %2033, %v1978_v52  }
 0x4a6   :  { %2039 = vset.pattern.permute.xlu0 %v2227_v26 }
 0x4a9   :  { %2028 = vset.pattern.permute.xlu1 %v2226_v25 }
 0x4aa   :  { %2034 = vset.pattern.permute.xlu2 %v2239_v61  ;;  %872 = vperm.xlu1 %2028, %v1978_v52  }
 0x4ab   :  { %1293 = vperm.xlu2 %2034, %v1978_v52  }
 0x4b2   :  { %2032 = vset.pattern.permute.xlu1 %v2240_v62 }
 0x4b3   :  { %2038 = vset.pattern.permute.xlu2 %v3240_v63  ;;  %1124 = vperm.xlu1 %2032, %v1978_v52  }
 0x4b4   :  { %1542 = vperm.xlu2 %2038, %v1978_v52  }
 0x4bb   :  { %2043 = vset.pattern.permute.xlu1 %v2236_v58 }
 0x4bc   :  { %2041 = vset.pattern.permute.xlu2 %v2231_v40 }
 0x4c8   :  { %758 = vmax.xlane.f32.xlu0 %v757_v0 }
 0x4d0   :  { %1218 = vmax.xlane.f32.xlu0 %v1217_v1 }
 0x4d9   :  { %v2654_v12 = vpop.permute.xlu2 %813 }
 0x4dd   :  { %1009 = vmax.xlane.f32.xlu2 %v1008_v2  ;;  %1427 = vmax.xlane.f32.xlu1 %v1426_v3 }
 0x4e1   :  { %v2665_v11 = vpop.permute.xlu2 %912 }
 0x4e4   :  { %850 = vperm.xlu0 %2039, %v2628_v4  }
 0x4ea   :  { %v2677_v22 = vpop.permute.xlu2 %1040 }
 0x4eb   :  { %v2652_v9 = vpop.xlane.xlu1 %755  ;;  %v1216_v16 = vpop.xlane.xlu0 %1215 }
 0x4ec   :  { %2040 = vset.pattern.permute.xlu0 %v2226_v25  ;;  %v1220_v17 = vsub.f32 %v2593_v7, %v1216_v16  ;;  %v760_v44 = vsub.f32 %v2593_v7, %v2652_v9 }
 0x4ed   :  { %892 = vperm.xlu0 %2040, %v2628_v4  }
 0x4ee   :  { %v1222_v18 = vmul.f32 1.442695, %v1220_v17  ;;  %v762_v45 = vmul.f32 1.442695, %v760_v44 }
 0x4f0   :  { %2167 = vpow2.f32 %v1222_v18 }
 0x4f3   :  { %v2663_v13 = vpop.xlane.xlu1 %1006  ;;  %v2692_v29 = vpop.permute.xlu2 %1084 }
 0x4f4   :  { %v1011_v50 = vsub.f32 %v2593_v7, %v2663_v13 }
 0x4f5   :  { %2042 = vset.pattern.permute.xlu0 %v2234_v54  ;;  %932 = vperm.xlu2 %2041, %v2628_v4  }
 0x4f6   :  { %1062 = vperm.xlu0 %2042, %v2628_v4   ;;  %1104 = vperm.xlu1 %2043, %v2628_v4   ;;  %v2686_v27 = vpop.eup %2167 }
 0x4fb   :  { %v1425_v21 = vpop.xlane.xlu1 %1424 }
 0x4fc   :  { %v1429_v23 = vsub.f32 %v2593_v7, %v1425_v21  ;;  %v2705_v32 = vpop.permute.xlu2 %1249 }
 0x4fd   :  { %2046 = vset.pattern.permute.xlu2 %v2239_v61 }
 0x4fe   :  { %2044 = vset.pattern.permute.xlu0 %v2240_v62  ;;  %1313 = vperm.xlu2 %2046, %v2628_v4   ;;  %v1431_v24 = vmul.f32 1.442695, %v1429_v23  ;;  %v2688_v28 = vpop.permute.xlu0 %1333 }
 0x4ff   :  { %2045 = vset.pattern.permute.xlu1 %v2238_v60  ;;  %1144 = vperm.xlu0 %2044, %v2628_v4  }
 0x500   :  { %1271 = vperm.xlu1 %2045, %v2628_v4   ;;  %2169 = vpow2.f32 %v1431_v24 }
 0x501   :  { %2171 = vpow2.f32 %v762_v45 }
 0x505   :  { %v2714_v33 = vpop.permute.xlu2 %1293 }
 0x506   :  { %2048 = vset.pattern.permute.xlu2 %v2232_v41  ;;  %v2698_v30 = vpop.eup %2169 }
 0x507   :  { %815 = vrot.lane.b32.xlu0 %v810_v8, %s2233_s9  ;;  %1353 = vperm.xlu2 %2048, %v2628_v4   ;;  %v2702_v31 = vpop.permute.xlu0 %1458  ;;  %v2754_v52 = vpop.eup %2171 }
 0x508   :  { %2047 = vset.pattern.permute.xlu1 %v2235_v55  ;;  %2051 = vset.pattern.permute.xlu0 %v2234_v54 }
 0x509   :  { %1480 = vperm.xlu1 %2047, %v2628_v4  }
 0x50e   :  { %v2723_v35 = vpop.permute.xlu2 %1542 }
 0x50f   :  { %1043 = vperm.xlu0 %2051, %v2656_v10   ;;  %2049 = vset.pattern.permute.xlu2 %v2237_v59 }
 0x510   :  { %1522 = vperm.xlu2 %2049, %v2628_v4  }
 0x511   :  { %2050 = vset.pattern.permute.xlu1 %v2227_v26 }
 0x512   :  { %829 = vperm.xlu1 %2050, %v2656_v10  }
 0x513   :  { %v2718_v34 = vpop.permute.xlu1 %826 }
 0x517   :  { %2065 = vset.pattern.permute.xlu0 %v2236_v58 }
 0x518   :  { %1107 = vperm.xlu0 %2065, %v2668_v15   ;;  %2052 = vset.pattern.permute.xlu2 %v2226_v25 }
 0x519   :  { %875 = vperm.xlu2 %2052, %v2656_v10  }
 0x51a   :  { %2053 = vset.pattern.permute.xlu1 %v2236_v58 }
 0x51b   :  { %1087 = vperm.xlu1 %2053, %v2656_v10  }
 0x51c   :  { %v2727_v39 = vpop.permute.xlu1 %872 }
 0x520   :  { %2073 = vset.pattern.permute.xlu0 %v2232_v41 }
 0x521   :  { %1356 = vperm.xlu0 %2073, %v2668_v15   ;;  %2059 = vset.pattern.permute.xlu2 %v3240_v63 }
 0x522   :  { %1545 = vperm.xlu2 %2059, %v2656_v10  }
 0x523   :  { %2054 = vset.pattern.permute.xlu1 %v2231_v40 }
 0x524   :  { %915 = vperm.xlu1 %2054, %v2656_v10  }
 0x525   :  { %v2738_v43 = vpop.permute.xlu1 %1124 }
 0x529   :  { %1228 = vrot.lane.b32.xlu0 %v2686_v27, %s2242_s25 }
 0x52a   :  { %2062 = vset.pattern.permute.xlu2 %v2227_v26  ;;  %v2710_v26 = vpop.permute.xlu0 %1502 }
 0x52b   :  { %853 = vperm.xlu2 %2062, %v2668_v15  }
 0x52c   :  { %2055 = vset.pattern.permute.xlu1 %v2240_v62 }
 0x52d   :  { %1127 = vperm.xlu1 %2055, %v2656_v10  }
 0x531   :  { %1437 = vrot.lane.b32.xlu0 %v2698_v30, %s2243_s26 }
 0x533   :  { %2064 = vset.pattern.permute.xlu2 %v2226_v25 }
 0x534   :  { %895 = vperm.xlu2 %2064, %v2668_v15  }
 0x535   :  { %2056 = vset.pattern.permute.xlu1 %v2235_v55 }
 0x536   :  { %1461 = vperm.xlu1 %2056, %v2656_v10  }
 0x53b   :  { %v759_v25 = vpop.xlane.xlu0 %758 }
 0x53c   :  { %2066 = vset.pattern.permute.xlu2 %v2231_v40 }
 0x53d   :  { %935 = vperm.xlu2 %2066, %v2668_v15  }
 0x53e   :  { %2057 = vset.pattern.permute.xlu1 %v2237_v59 }
 0x53f   :  { %1505 = vperm.xlu1 %2057, %v2656_v10  }
 0x543   :  { %v1219_v36 = vpop.xlane.xlu0 %1218 }
 0x544   :  { %v1221_v0 = vsub.f32 %v2618_v57, %v1219_v36 }
 0x545   :  { %2068 = vset.pattern.permute.xlu2 %v2235_v55 }
 0x546   :  { %1483 = vperm.xlu2 %2068, %v2668_v15  }
 0x547   :  { %2058 = vset.pattern.permute.xlu1 %v2238_v60 }
 0x548   :  { %1252 = vperm.xlu1 %2058, %v2656_v10  }
 0x54e   :  { %2069 = vset.pattern.permute.xlu2 %v2237_v59  ;;  %v761_v59 = vsub.f32 %v2618_v57, %v759_v25 }
 0x54f   :  { %1525 = vperm.xlu2 %2069, %v2668_v15  }
 0x550   :  { %2060 = vset.pattern.permute.xlu1 %v2239_v61  ;;  %v1010_v40 = vpop.xlane.xlu2 %1009  ;;  %v1428_v49 = vpop.xlane.xlu1 %1427  ;;  %v764_v7 = vmul.f32 1.442695, %v761_v59 }
 0x551   :  { %1296 = vperm.xlu1 %2060, %v2656_v10   ;;  %v1430_v3 = vsub.f32 %v2618_v57, %v1428_v49 }
 0x553   :  { %v1433_v8 = vmul.f32 1.442695, %v1430_v3 }
 0x556   :  { %v2732_v42 = vpop.permute.xlu0 %850 }
 0x557   :  { %2070 = vset.pattern.permute.xlu2 %v2238_v60 }
 0x558   :  { %1274 = vperm.xlu2 %2070, %v2668_v15   ;;  %v2736_v6 = vpop.permute.xlu2 %932 }
 0x559   :  { %2061 = vset.pattern.permute.xlu1 %v2232_v41  ;;  %v1013_v41 = vmul.f32 1.442695, %v1011_v50 }
 0x55a   :  { %1336 = vperm.xlu1 %2061, %v2656_v10  }
 0x55b   :  { %2173 = vpow2.f32 %v1013_v41 }
 0x55c   :  { %2175 = vpow2.f32 %v764_v7 }
 0x55f   :  { %v2744_v47 = vpop.permute.xlu0 %892 }
 0x560   :  { %2072 = vset.pattern.permute.xlu2 %v2239_v61  ;;  %v2747_v48 = vpop.permute.xlu2 %1313 }
 0x561   :  { %1316 = vperm.xlu2 %2072, %v2668_v15   ;;  %v2767_v60 = vpop.eup %2173 }
 0x562   :  { %2063 = vset.pattern.permute.xlu1 %v2234_v54  ;;  %v1012_v54 = vsub.f32 %v2618_v57, %v1010_v40  ;;  %v2780_v5 = vpop.eup %2175 }
 0x563   :  { %1065 = vperm.xlu1 %2063, %v2668_v15  }
 0x564   :  { %v1015_v1 = vmul.f32 1.442695, %v1012_v54 }
 0x566   :  { %2177 = vpow2.f32 %v1015_v1 }
 0x568   :  { %v2756_v53 = vpop.permute.xlu0 %1062  ;;  %v2758_v55 = vpop.permute.xlu2 %1353 }
 0x569   :  { %v2760_v58 = vpop.permute.xlu1 %1104  ;;  %768 = vrot.lane.b32.xlu2 %v2754_v52, %s2244_s6 }
 0x56b   :  { %2067 = vset.pattern.permute.xlu1 %v2240_v62  ;;  %v1224_v62 = vmul.f32 1.442695, %v1221_v0 }
 0x56c   :  { %1147 = vperm.xlu1 %2067, %v2668_v15   ;;  %v2789_v10 = vpop.eup %2177 }
 0x56d   :  { %2179 = vpow2.f32 %v1224_v62 }
 0x56e   :  { %2181 = vpow2.f32 %v1433_v8 }
 0x570   :  { %v2769_v61 = vpop.permute.xlu2 %1522 }
 0x571   :  { %v2771_v56 = vpop.permute.xlu0 %1144  ;;  %1019 = vrot.lane.b32.xlu2 %v2767_v60, %s2245_s27 }
 0x572   :  { %v2775_v2 = vpop.permute.xlu1 %1271 }
 0x573   :  { %v2792_v13 = vpop.eup %2179 }
 0x574   :  { %2071 = vset.pattern.permute.xlu1 %v3240_v63  ;;  %v2800_v16 = vpop.eup %2181 }
 0x575   :  { %1565 = vperm.xlu1 %2071, %v2668_v15  }
 0x578   :  { %v2782_v14 = vpop.permute.xlu2 %875 }
 0x579   :  { %v2784_v19 = vpop.permute.xlu0 %815  ;;  %770 = vrot.lane.b32.xlu2 %v2780_v5, %s2244_s6 }
 0x57b   :  { %v2787_v9 = vpop.permute.xlu1 %1480 }
 0x57d   :  { %1021 = vrot.lane.b32.xlu1 %v2789_v10, %s2245_s27 }
 0x580   :  { %v2794_v57 = vpop.permute.xlu2 %1545 }
 0x581   :  { %3272 = vst [vmem:[#allocation6_spill] sm:$0xff] %v2794_v57  ;;  %v2796_v15 = vpop.permute.xlu0 %1043  ;;  %1230 = vrot.lane.b32.xlu2 %v2792_v13, %s2242_s25 }
 0x582   :  { %3273 = vst [vmem:[#allocation7_spill] sm:$0xff] %v2796_v15  ;;  %v3294_v15 = vmov 18  }
 0x584   :  { %v2802_v17 = vpop.permute.xlu1 %829 }
 0x585   :  { %1439 = vrot.lane.b32.xlu1 %v2800_v16, %s2243_s26 }
 0x588   :  { %v2806_v18 = vpop.permute.xlu2 %853 }
 0x58a   :  { %v2808_v21 = vpop.permute.xlu0 %1107 }
 0x58b   :  { %3274 = vst [vmem:[#allocation8_spill] sm:$0xff] %v2808_v21  ;;  %v3287_v21 = vmov 12  }
 0x58d   :  { %v2810_v23 = vpop.permute.xlu1 %1087 }
 0x58e   :  { %3275 = vst [vmem:[#allocation9_spill] sm:$0xff] %v2810_v23  ;;  %v3290_v23 = vmov 13  }
 0x590   :  { %v2812_v24 = vpop.permute.xlu2 %895 }
 0x593   :  { %v2814_v25 = vpop.permute.xlu0 %1356 }
 0x594   :  { %3276 = vst [vmem:[#allocation10_spill] sm:$0xff] %v2814_v25 }
 0x596   :  { %v2816_v36 = vpop.permute.xlu1 %915 }
 0x597   :  { %3277 = vst [vmem:[#allocation11_spill] sm:$0xff] %v2816_v36 }
 0x598   :  { %v2818_v40 = vpop.permute.xlu2 %935 }
 0x599   :  { %3278 = vst [vmem:[#allocation12_spill] sm:$0xff] %v2818_v40 }
 0x59b   :  { %v1229_v44 = vpop.permute.xlu0 %1228 }
 0x59c   :  { %v1234_v57 = vsel %vm774_vm10, %v1229_v44, 0.0  ;;  %v3243_v44 = vmov 12  }
 0x59d   :  { %2074 = vset.pattern.permute.xlu0 %v3243_v44 }
 0x59f   :  { %v2820_v45 = vpop.permute.xlu1 %1127 }
 0x5a0   :  { %3279 = vst [vmem:[#allocation13_spill] sm:$0xff] %v2820_v45  ;;  %v2822_v49 = vpop.permute.xlu2 %1483 }
 0x5a3   :  { %v1438_v50 = vpop.permute.xlu0 %1437 }
 0x5a4   :  { %v1443_v7 = vsel %vm774_vm10, %v1438_v50, 0.0 }
 0x5a8   :  { %v2824_v41 = vpop.permute.xlu1 %1461 }
 0x5a9   :  { %v2826_v59 = vpop.permute.xlu2 %1525 }
 0x5aa   :  { %1444 = vadd.xlane.f32.xlu2 %v1443_v7 }
 0x5b1   :  { %v2829_v54 = vpop.permute.xlu1 %1505 }
 0x5b2   :  { %v2831_v0 = vpop.permute.xlu2 %1274 }
 0x5b3   :  { %3280 = vst [vmem:[#allocation14_spill] sm:$0xff] %v2831_v0 }
 0x5ba   :  { %v2833_v1 = vpop.permute.xlu1 %1252 }
 0x5bb   :  { %3281 = vst [vmem:[#allocation15_spill] sm:$0xff] %v2833_v1  ;;  %v2835_v62 = vpop.permute.xlu2 %1316 }
 0x5c3   :  { %v2837_v3 = vpop.permute.xlu1 %1296  ;;  %v769_v8 = vpop.permute.xlu2 %768 }
 0x5c4   :  { %3282 = vst [vmem:[#allocation16_spill] sm:$0xff] %v2837_v3  ;;  %v775_v63 = vsel %vm774_vm10, %v769_v8, 0.0 }
 0x5c5   :  { %776 = vadd.xlane.f32.xlu1 %v775_v63 }
 0x5cb   :  { %v1020_v38 = vpop.permute.xlu2 %1019 }
 0x5cc   :  { %v2840_v37 = vpop.permute.xlu1 %1336  ;;  %v1025_v50 = vsel %vm774_vm10, %v1020_v38, 0.0 }
 0x5cd   :  { %3283 = vst [vmem:[#allocation17_spill] sm:$0xff] %v2840_v37  ;;  %1026 = vadd.xlane.f32.xlu1 %v1025_v50 }
 0x5d3   :  { %v771_v7 = vpop.permute.xlu2 %770 }
 0x5d4   :  { %v778_v25 = vsel %vm774_vm10, %v771_v7, 0.0 }
 0x5d5   :  { %v2845_v1 = vpop.permute.xlu1 %1065  ;;  %779 = vadd.xlane.f32.xlu0 %v778_v25  ;;  %1235 = vadd.xlane.f32.xlu1 %v1234_v57  ;;  %v3245_v57 = vmov 13   ;;  %v3247_v25 = vmov 15  }
 0x5d6   :  { %3284 = vst [vmem:[#allocation18_spill] sm:$0xff] %v2845_v1  ;;  %2075 = vset.pattern.permute.xlu1 %v3245_v57  ;;  %2077 = vset.pattern.permute.xlu2 %v3247_v25  ;;  %v3249_v25 = vmov 17  }
 0x5db   :  { %v1231_v3 = vpop.permute.xlu2 %1230 }
 0x5dc   :  { %v1237_v0 = vsel %vm774_vm10, %v1231_v3, 0.0 }
 0x5dd   :  { %1238 = vadd.xlane.f32.xlu1 %v1237_v0 }
 0x5de   :  { %v2848_v63 = vpop.permute.xlu1 %1147 }
 0x5e7   :  { %v2850_v8 = vpop.permute.xlu1 %1565 }
 0x5e8   :  { %3285 = vst [vmem:[#allocation19_spill] sm:$0xff] %v2850_v8 }
 0x5ef   :  { %v1022_v37 = vpop.permute.xlu1 %1021 }
 0x5f0   :  { %v1028_v38 = vsel %vm774_vm10, %v1022_v37, 0.0 }
 0x5f1   :  { %1029 = vadd.xlane.f32.xlu2 %v1028_v38 }
 0x5f7   :  { %v1440_v50 = vpop.permute.xlu1 %1439 }
 0x5f8   :  { %v1446_v7 = vsel %vm774_vm10, %v1440_v50, 0.0 }
 0x5f9   :  { %1447 = vadd.xlane.f32.xlu2 %v1446_v7 }
 0x61d   :  { %v1445_v40 = vpop.xlane.xlu2 %1444 }
 0x638   :  { %v777_v0 = vpop.xlane.xlu1 %776 }
 0x639   :  { %2183 = vrcp.f32 %v777_v0  ;;  %v3261_v0 = vmov 14  }
 0x63f   :  { %v2184_v3 = vpop.eup %2183 }
 0x640   :  { %v783_v8 = vmul.f32 %v2184_v3, %v2754_v52  ;;  %v1027_v37 = vpop.xlane.xlu1 %1026 }
 0x641   :  { %2185 = vrcp.f32 %v1027_v37  ;;  %v3253_v37 = vmov 16  }
 0x642   :  { %v819_v38 = vmul.f32 %v2654_v12, %v783_v8 }
 0x644   :  { %900 = vperm.xlu1 %2075, %v819_v38   ;;  %859 = vperm.xlu0 %2074, %v819_v38  }
 0x647   :  { %v2186_v50 = vpop.eup %2185 }
 0x648   :  { %v1033_v7 = vmul.f32 %v2186_v50, %v2767_v60  ;;  %v1236_v44 = vpop.xlane.xlu1 %1235  ;;  %v780_v36 = vpop.xlane.xlu0 %779 }
 0x649   :  { %2187 = vrcp.f32 %v1236_v44  ;;  %v3251_v44 = vmov 18  }
 0x64a   :  { %v1035_v57 = vmul.f32 %v1033_v7, %v2654_v12  ;;  %2189 = vrcp.f32 %v1445_v40 }
 0x64c   :  { %2079 = vset.pattern.permute.xlu1 %v3249_v25  ;;  %2076 = vset.pattern.permute.xlu0 %v3261_v0  ;;  %v3255_v25 = vmov 19  }
 0x64d   :  { %1071 = vperm.xlu2 %2077, %v1035_v57   ;;  %940 = vperm.xlu0 %2076, %v819_v38  }
 0x64e   :  { %1152 = vperm.xlu1 %2079, %v1035_v57  }
 0x64f   :  { %v2188_v52 = vpop.eup %2187 }
 0x650   :  { %v2864_v3 = vmul.f32 %v2188_v52, %v2686_v27  ;;  %v2190_v60 = vpop.eup %2189  ;;  %v3257_v52 = vmov 20  }
 0x651   :  { %v1451_v40 = vmul.f32 %v2190_v60, %v2698_v30  ;;  %v1239_v60 = vpop.xlane.xlu1 %1238 }
 0x652   :  { %v2870_v50 = vmul.f32 %v2864_v3, %v2654_v12 }
 0x653   :  { %v2877_v27 = vmul.f32 %v1451_v40, %v2654_v12  ;;  %v2256_v12 = vmov 22  }
 0x655   :  { %2078 = vset.pattern.permute.xlu2 %v3253_v37  ;;  %2080 = vset.pattern.permute.xlu0 %v3251_v44  ;;  %v3259_v44 = vmov 21   ;;  %v1455_v37 = vsub.f32 %v1451_v40, %v2877_v27 }
 0x656   :  { %2081 = vset.pattern.permute.xlu1 %v3255_v25  ;;  %1112 = vperm.xlu2 %2078, %v1035_v57   ;;  %v821_v25 = vsub.f32 %v783_v8, %v819_v38  ;;  %v1037_v8 = vsub.f32 %v1033_v7, %v1035_v57  ;;  %v3288_v38 = vmov 15  }
 0x657   :  { %1321 = vperm.xlu1 %2081, %v2870_v50   ;;  %1280 = vperm.xlu0 %2080, %v2870_v50  }
 0x65e   :  { %2083 = vset.pattern.permute.xlu2 %v3257_v52  ;;  %v3286_v52 = vmov 17  }
 0x65f   :  { %1361 = vperm.xlu2 %2083, %v2870_v50   ;;  %2082 = vset.pattern.permute.xlu1 %v3259_v44 }
 0x660   :  { %2094 = vset.pattern.permute.xlu0 %v3259_v44  ;;  %1489 = vperm.xlu1 %2082, %v2877_v27  }
 0x661   :  { %1467 = vperm.xlu0 %2094, %v1455_v37  }
 0x664   :  { %v1030_v30 = vpop.xlane.xlu2 %1029 }
 0x665   :  { %2191 = vrcp.f32 %v1030_v30 }
 0x666   :  { %2193 = vrcp.f32 %v1239_v60 }
 0x667   :  { %2084 = vset.pattern.permute.xlu2 %v2256_v12  ;;  %2195 = vrcp.f32 %v780_v36 }
 0x668   :  { %1530 = vperm.xlu2 %2084, %v2877_v27   ;;  %2087 = vset.pattern.permute.xlu1 %v3261_v0 }
 0x669   :  { %920 = vperm.xlu1 %2087, %v821_v25   ;;  %2102 = vset.pattern.permute.xlu0 %v3286_v52 }
 0x66b   :  { %v2192_v40 = vpop.eup %2191 }
 0x66c   :  { %v1034_v44 = vmul.f32 %v2192_v40, %v2789_v10  ;;  %v2194_v30 = vpop.eup %2193  ;;  %v3289_v40 = vmov 19  }
 0x66d   :  { %v2896_v60 = vmul.f32 %v2194_v30, %v2792_v13  ;;  %v2196_v0 = vpop.eup %2195  ;;  %v1448_v13 = vpop.xlane.xlu2 %1447  ;;  %v3291_v30 = vmov 16  }
 0x66e   :  { %v2890_v45 = vmul.f32 %v1034_v44, %v2784_v19  ;;  %v784_v36 = vmul.f32 %v2196_v0, %v2780_v5  ;;  %2197 = vrcp.f32 %v1448_v13  ;;  %v3263_v5 = vmov 23  }
 0x66f   :  { %v2900_v10 = vmul.f32 %v2896_v60, %v2784_v19  ;;  %v3292_v13 = vmov 14  }
 0x670   :  { %2085 = vset.pattern.permute.xlu2 %v3287_v21  ;;  %1156 = vperm.xlu0 %2102, %v2890_v45   ;;  %v820_v57 = vmul.f32 %v2784_v19, %v784_v36  ;;  %v1038_v0 = vsub.f32 %v1034_v44, %v2890_v45  ;;  %v1246_v44 = vsub.f32 %v2864_v3, %v2870_v50 }
 0x671   :  { %835 = vperm.xlu2 %2085, %v821_v25   ;;  %2088 = vset.pattern.permute.xlu1 %v3288_v38 }
 0x672   :  { %1049 = vperm.xlu1 %2088, %v1037_v8   ;;  %v2907_v7 = vsub.f32 %v784_v36, %v820_v57 }
 0x678   :  { %2107 = vset.pattern.permute.xlu0 %v3289_v40 }
 0x679   :  { %2086 = vset.pattern.permute.xlu2 %v3290_v23  ;;  %1325 = vperm.xlu0 %2107, %v2900_v10  }
 0x67a   :  { %880 = vperm.xlu2 %2086, %v821_v25   ;;  %2095 = vset.pattern.permute.xlu1 %v2256_v12  ;;  %v2198_v25 = vpop.eup %2197 }
 0x67b   :  { %1510 = vperm.xlu1 %2095, %v1455_v37   ;;  %v1452_v36 = vmul.f32 %v2198_v25, %v2800_v16  ;;  %v3296_v16 = vmov 23  }
 0x67d   :  { %v2919_v1 = vmul.f32 %v1452_v36, %v2784_v19  ;;  %v3295_v19 = vmov 20  }
 0x681   :  { %2111 = vset.pattern.permute.xlu0 %v3290_v23 }
 0x682   :  { %2089 = vset.pattern.permute.xlu2 %v3291_v30  ;;  %884 = vperm.xlu0 %2111, %v2907_v7  }
 0x683   :  { %1092 = vperm.xlu2 %2089, %v1037_v8   ;;  %2096 = vset.pattern.permute.xlu1 %v3263_v5  ;;  %v2922_v5 = vsub.f32 %v1452_v36, %v2919_v1 }
 0x684   :  { %1550 = vperm.xlu1 %2096, %v1455_v37   ;;  %v3293_v37 = vmov 21  }
 0x68a   :  { %2115 = vset.pattern.permute.xlu0 %v3286_v52 }
 0x68b   :  { %2090 = vset.pattern.permute.xlu2 %v3286_v52  ;;  %1136 = vperm.xlu0 %2115, %v1038_v0  }
 0x68c   :  { %1132 = vperm.xlu2 %2090, %v1037_v8   ;;  %2101 = vset.pattern.permute.xlu1 %v3292_v13 }
 0x68d   :  { %944 = vperm.xlu1 %2101, %v820_v57  }
 0x693   :  { %2116 = vset.pattern.permute.xlu0 %v3293_v37 }
 0x694   :  { %2091 = vset.pattern.permute.xlu2 %v3294_v15  ;;  %1472 = vperm.xlu0 %2116, %v2922_v5  }
 0x695   :  { %2103 = vset.pattern.permute.xlu1 %v3293_v37  ;;  %1258 = vperm.xlu2 %2091, %v1246_v44  }
 0x696   :  { %1494 = vperm.xlu1 %2103, %v2919_v1  }
 0x69c   :  { %2117 = vset.pattern.permute.xlu0 %v2256_v12 }
 0x69d   :  { %2092 = vset.pattern.permute.xlu2 %v3289_v40  ;;  %1514 = vperm.xlu0 %2117, %v2922_v5  }
 0x69e   :  { %2104 = vset.pattern.permute.xlu1 %v2256_v12  ;;  %1301 = vperm.xlu2 %2092, %v1246_v44  }
 0x69f   :  { %1534 = vperm.xlu1 %2104, %v2919_v1  }
 0x6a5   :  { %1393 = vrot.lane.b32.xlu0 %v2528_v46, %s2218_s5  ;;  %v751_v46 = vlaneseq }
 0x6a6   :  { %2093 = vset.pattern.permute.xlu2 %v3295_v19  ;;  %2122 = vset.pattern.permute.xlu0 %v3296_v16 }
 0x6a7   :  { %v2938_v3 = vpop.permute.xlu2 %1071  ;;  %2105 = vset.pattern.permute.xlu1 %v3294_v15  ;;  %1341 = vperm.xlu2 %2093, %v1246_v44   ;;  %v2947_v8 = vand.u32 127, %v751_v46 }
 0x6a8   :  { %1285 = vperm.xlu1 %2105, %v2900_v10  }
 0x6a9   :  { %vm1358_vm11 = vcmp.eq.s32.totalorder %v2947_v8, %v2758_v55  ;;  %vm1527_vm12 = vcmp.eq.s32.totalorder %v2947_v8, %v2769_v61  ;;  %vm1318_vm13 = vcmp.eq.s32.totalorder %v2947_v8, %v2747_v48  ;;  %vm1276_vm14 = vcmp.eq.s32.totalorder %v2947_v8, %v2775_v2 }
 0x6aa   :  { %vm831_vm15 = vcmp.eq.s32.totalorder %v2947_v8, %v2718_v34  ;;  %vm855_vm2 = vcmp.eq.s32.totalorder %v2947_v8, %v2732_v42  ;;  %vm1485_vm6 = vcmp.eq.s32.totalorder %v2947_v8, %v2787_v9  ;;  %vm1463_vm7 = vcmp.eq.s32.totalorder %v2947_v8, %v2702_v31 }
 0x6ab   :  { %vm877_vm8 = vcmp.eq.s32.totalorder %v2947_v8, %v2727_v39  ;;  %v3297_v42 = vmov 11   ;;  %vm897_vm9 = vcmp.eq.s32.totalorder %v2947_v8, %v2744_v47  ;;  %vm917_vm10 = vcmp.eq.s32.totalorder %v2947_v8, %v2665_v11 }
 0x6af   :  { %2097 = vset.pattern.permute.xlu2 %v3287_v21 }
 0x6b0   :  { %v2943_v50 = vpop.permute.xlu2 %1112  ;;  %864 = vperm.xlu2 %2097, %v820_v57   ;;  %2109 = vset.pattern.permute.xlu1 %v3287_v21 }
 0x6b1   :  { %840 = vperm.xlu1 %2109, %v2907_v7  }
 0x6b6   :  { %v860_v52 = vpop.permute.xlu0 %859  ;;  %v901_v12 = vpop.permute.xlu1 %900 }
 0x6b8   :  { %2098 = vset.pattern.permute.xlu2 %v3288_v38 }
 0x6b9   :  { %v1362_v25 = vpop.permute.xlu2 %1361  ;;  %1076 = vperm.xlu2 %2098, %v2890_v45   ;;  %2110 = vset.pattern.permute.xlu1 %v3288_v38 }
 0x6ba   :  { %v2954_v36 = vsel %vm1358_vm11, %v1362_v25, 0.0  ;;  %1054 = vperm.xlu1 %2110, %v1038_v0   ;;  %vm937_vm11 = vcmp.eq.s32.totalorder %v2947_v8, %v2736_v6 }
 0x6bf   :  { %v941_v21 = vpop.permute.xlu0 %940 }
 0x6c0   :  { %v2956_v37 = vpop.permute.xlu1 %1152  ;;  %v947_v47 = vsel %vm937_vm11, %v941_v21, 0.0  ;;  %vm1254_vm11 = vcmp.eq.s32.totalorder %v2947_v8, %v2705_v32 }
 0x6c1   :  { %2099 = vset.pattern.permute.xlu2 %v3290_v23 }
 0x6c2   :  { %v1531_v44 = vpop.permute.xlu2 %1530  ;;  %904 = vperm.xlu2 %2099, %v820_v57   ;;  %2112 = vset.pattern.permute.xlu1 %v3291_v30  ;;  %v867_v57 = vsel %vm855_vm2, %v860_v52, 0.0  ;;  %v907_v52 = vsel %vm897_vm9, %v901_v12, 0.0  ;;  %vm1089_vm2 = vcmp.eq.s32.totalorder %v2947_v8, %v2692_v29  ;;  %vm1149_vm9 = vcmp.eq.s32.totalorder %v2947_v8, %v2771_v56 }
 0x6c3   :  { %v2962_v55 = vsel %vm1527_vm12, %v1531_v44, 0.0  ;;  %1096 = vperm.xlu1 %2112, %v1038_v0   ;;  %vm963_vm12 = vcmask 130048  }
 0x6c9   :  { %v1281_v38 = vpop.permute.xlu0 %1280  ;;  %v1322_v46 = vpop.permute.xlu1 %1321 }
 0x6ca   :  { %v2968_v25 = vsel %vm1276_vm14, %v1281_v38, 0.0  ;;  %v2970_v23 = vsel %vm1318_vm13, %v1322_v46, 0.0  ;;  %2100 = vset.pattern.permute.xlu2 %v3291_v30  ;;  %vm1150_vm13 = vcmp.eq.s32.totalorder %v2947_v8, %v2848_v63  ;;  %vm1067_vm14 = vcmp.eq.s32.totalorder %v2947_v8, %v2756_v53 }
 0x6cb   :  { %v836_v61 = vpop.permute.xlu2 %835  ;;  %1116 = vperm.xlu2 %2100, %v2890_v45   ;;  %2113 = vset.pattern.permute.xlu1 %v3292_v13 }
 0x6cc   :  { %924 = vperm.xlu1 %2113, %v2907_v7   ;;  %v843_v48 = vsel %vm831_vm15, %v836_v61, 0.0  ;;  %vm1045_vm15 = vcmp.eq.s32.totalorder %v2947_v8, %v2677_v22 }
 0x6cd   :  { %v869_v7 = vadd.f32 %v867_v57, %v843_v48 }
 0x6d2   :  { %v1490_v2 = vpop.permute.xlu1 %1489 }
 0x6d3   :  { %v1468_v45 = vpop.permute.xlu0 %1467  ;;  %v1497_v30 = vsel %vm1485_vm6, %v1490_v2, 0.0  ;;  %2106 = vset.pattern.permute.xlu2 %v3296_v16  ;;  %vm1109_vm6 = vcmp.eq.s32.totalorder %v2947_v8, %v2760_v58  ;;  %v1159_v58 = vsel %vm1149_vm9, %v2956_v37, 0.0  ;;  %vm1528_vm9 = vcmp.eq.s32.totalorder %v2947_v8, %v2826_v59 }
 0x6d4   :  { %v1475_v0 = vsel %vm1463_vm7, %v1468_v45, 0.0  ;;  %v881_v34 = vpop.permute.xlu2 %880  ;;  %1574 = vperm.xlu2 %2106, %v2919_v1   ;;  %2114 = vset.pattern.permute.xlu1 %v3297_v42  ;;  %v1247_v1 = vsub.f32 %v2896_v60, %v2900_v10  ;;  %v1079_v60 = vsel %vm1067_vm14, %v2938_v3, 0.0  ;;  %v1119_v22 = vsel %vm1109_vm6, %v2943_v50, 0.0 }
 0x6d5   :  { %v1499_v9 = vadd.f32 %v1497_v30, %v1475_v0  ;;  %v887_v13 = vsel %vm877_vm8, %v881_v34, 0.0  ;;  %1562 = vperm.xlu1 %2114, %v2628_v4   ;;  %vm1129_vm7 = vcmp.eq.s32.totalorder %v2947_v8, %v2738_v43  ;;  %vm1319_vm8 = vcmp.eq.s32.totalorder %v2947_v8, %v2835_v62 }
 0x6d6   :  { %v889_v31 = vadd.f32 %v887_v13, %v869_v7  ;;  %vm1547_vm14 = vcmp.eq.s32.totalorder %v2947_v8, %v2723_v35  ;;  %vm1486_vm6 = vcmp.eq.s32.totalorder %v2947_v8, %v2822_v49 }
 0x6d8   :  { %v909_v44 = vadd.f32 %v907_v52, %v889_v31 }
 0x6db   :  { %v921_v38 = vpop.permute.xlu1 %920 }
 0x6dc   :  { %v927_v39 = vsel %vm917_vm10, %v921_v38, 0.0  ;;  %2108 = vset.pattern.permute.xlu2 %v3295_v19  ;;  %vm1507_vm10 = vcmp.eq.s32.totalorder %v2947_v8, %v2710_v26 }
 0x6dd   :  { %v929_v4 = vadd.f32 %v927_v39, %v909_v44  ;;  %v1093_v46 = vpop.permute.xlu2 %1092  ;;  %1365 = vperm.xlu2 %2108, %v2900_v10   ;;  %2120 = vset.pattern.permute.xlu1 %v3289_v40 }
 0x6de   :  { %1305 = vperm.xlu1 %2120, %v1247_v1   ;;  %v1099_v53 = vsel %vm1089_vm2, %v1093_v46, 0.0  ;;  %vm1338_vm2 = vcmp.eq.s32.totalorder %v2947_v8, %v2688_v28 }
 0x6df   :  { %v949_v12 = vadd.f32 %v947_v47, %v929_v4 }
 0x6e1   :  { %v955_v11 = vpack.c.bf16 %v949_v12, %v949_v12 }
 0x6e2   :  { %v1157_v61 = vpop.permute.xlu0 %1156 }
 0x6e3   :  { %v3003_v48 = vsel %vm1150_vm13, %v1157_v61, 0.0  ;;  %1920 = vmatmul.msk.bf16.vlgmr.msra.gmra.mxu2 %vm963_vm12, %v955_v11  ;;  %vm878_vm13 = vcmp.eq.s32.totalorder %v2947_v8, %v2782_v14 }
 0x6e4   :  { %1615 = vmatpush.bf16.msra.mxu2 %v2563_v20  ;;  %v1050_v6 = vpop.permute.xlu1 %1049 }
 0x6e5   :  { %v1057_v10 = vsel %vm1045_vm15, %v1050_v6, 0.0  ;;  %2118 = vset.pattern.permute.xlu2 %v3294_v15  ;;  %vm1298_vm15 = vcmp.eq.s32.totalorder %v2947_v8, %v2714_v33 }
 0x6e6   :  { %v1081_v63 = vadd.f32 %v1079_v60, %v1057_v10  ;;  %v1133_v40 = vpop.permute.xlu2 %1132  ;;  %2121 = vset.pattern.permute.xlu1 %v3295_v19  ;;  %1263 = vperm.xlu2 %2118, %v1247_v1  }
 0x6e7   :  { %1345 = vperm.xlu1 %2121, %v1247_v1   ;;  %v1139_v29 = vsel %vm1129_vm7, %v1133_v40, 0.0  ;;  %vm1464_vm7 = vcmp.eq.s32.totalorder %v2947_v8, %v2824_v41  ;;  %v3299_v40 = vld [vmem:[#allocation18_spill] sm:$0xff] }
 0x6e8   :  { %v1101_v20 = vadd.f32 %v1099_v53, %v1081_v63  ;;  %v3298_v63 = vld [vmem:[#allocation7_spill] sm:$0xff] }
 0x6ea   :  { %v1121_v15 = vadd.f32 %v1119_v22, %v1101_v20 }
 0x6eb   :  { %v1326_v3 = vpop.permute.xlu0 %1325 }
 0x6ec   :  { %v1141_v19 = vadd.f32 %v1139_v29, %v1121_v15  ;;  %v3025_v21 = vsel %vm1319_vm8, %v1326_v3, 0.0  ;;  %vm1508_vm8 = vcmp.eq.s32.totalorder %v2947_v8, %v2829_v54  ;;  %v3300_v15 = vld [vmem:[#allocation9_spill] sm:$0xff] }
 0x6ed   :  { %v1511_v50 = vpop.permute.xlu1 %1510 }
 0x6ee   :  { %v1161_v2 = vadd.f32 %v1159_v58, %v1141_v19  ;;  %v1517_v43 = vsel %vm1507_vm10, %v1511_v50, 0.0  ;;  %2119 = vset.pattern.permute.xlu2 %v3296_v16  ;;  %vm832_vm10 = vcmp.eq.s32.totalorder %v2947_v8, %v2802_v17 }
 0x6ef   :  { %v1519_v57 = vadd.f32 %v1517_v43, %v1499_v9  ;;  %v1259_v62 = vpop.permute.xlu2 %1258  ;;  %1583 = vrot.lane.b32.xlu1 %v2534_v51, %s2221_s28  ;;  %1554 = vperm.xlu2 %2119, %v2922_v5  }
 0x6f0   :  { %v1163_v56 = vpack.c.bf16 %v1161_v2, %v1161_v2  ;;  %v1266_v45 = vsel %vm1254_vm11, %v1259_v62, 0.0  ;;  %vm856_vm11 = vcmp.eq.s32.totalorder %v2947_v8, %v2806_v18  ;;  %v3302_v2 = vld [vmem:[#allocation13_spill] sm:$0xff] }
 0x6f1   :  { %v1290_v26 = vadd.f32 %v2968_v25, %v1266_v45  ;;  %v1539_v37 = vadd.f32 %v2962_v55, %v1519_v57  ;;  %v3303_v45 = vld [vmem:[#allocation11_spill] sm:$0xff] }
 0x6f2   :  { %1922 = vmatmul.msk.bf16.vlgmr.msrb.gmra.mxu1 %vm963_vm12, %v1163_v56 }
 0x6f4   :  { %v885_v16 = vpop.permute.xlu0 %884 }
 0x6f5   :  { %v888_v30 = vsel %vm878_vm13, %v885_v16, 0.0  ;;  %vm898_vm13 = vcmp.eq.s32.totalorder %v2947_v8, %v2812_v24  ;;  %v3301_v24 = vld [vmem:[#allocation8_spill] sm:$0xff] }
 0x6f6   :  { %v1551_v32 = vpop.permute.xlu1 %1550 }
 0x6f7   :  { %v1557_v51 = vsel %vm1547_vm14, %v1551_v32, 0.0  ;;  %1570 = vperm.xlu2 %2119, %v2877_v27   ;;  %vm1046_vm14 = vcmp.eq.s32.totalorder %v2947_v8, %v3298_v63  ;;  %v3305_v32 = vld [vmem:[#allocation14_spill] sm:$0xff] }
 0x6f8   :  { %v3046_v5 = vadd.f32 %v1557_v51, %v1539_v37  ;;  %v1302_v55 = vpop.permute.xlu2 %1301  ;;  %v3306_v51 = vld [vmem:[#allocation15_spill] sm:$0xff] }
 0x6f9   :  { %v1308_v25 = vsel %vm1298_vm15, %v1302_v55, 0.0  ;;  %vm1068_vm15 = vcmp.eq.s32.totalorder %v2947_v8, %v3299_v40 }
 0x6fa   :  { %v1310_v7 = vadd.f32 %v1308_v25, %v1290_v26 }
 0x6fc   :  { %v1330_v0 = vadd.f32 %v2970_v23, %v1310_v7 }
 0x6fd   :  { %v1137_v14 = vpop.permute.xlu0 %1136 }
 0x6ff   :  { %v3049_v34 = vpop.permute.xlu1 %944 }
 0x701   :  { %v1342_v35 = vpop.permute.xlu2 %1341 }
 0x702   :  { %v1348_v42 = vsel %vm1338_vm2, %v1342_v35, 0.0  ;;  %vm1090_vm2 = vcmp.eq.s32.totalorder %v2947_v8, %v3300_v15 }
 0x703   :  { %v1350_v9 = vadd.f32 %v1348_v42, %v1330_v0 }
 0x705   :  { %v3054_v27 = vadd.f32 %v2954_v36, %v1350_v9 }
 0x706   :  { %v1473_v33 = vpop.permute.xlu0 %1472 }
 0x707   :  { %v1476_v13 = vsel %vm1464_vm7, %v1473_v33, 0.0  ;;  %vm1130_vm7 = vcmp.eq.s32.totalorder %v2947_v8, %v3302_v2  ;;  %v3307_v33 = vld [vmem:[#allocation6_spill] sm:$0xff] }
 0x708   :  { %v1495_v23 = vpop.permute.xlu1 %1494  ;;  %v1140_v57 = vsel %vm1130_vm7, %v1137_v14, 0.0 }
 0x709   :  { %v1498_v31 = vsel %vm1486_vm6, %v1495_v23, 0.0  ;;  %vm1110_vm6 = vcmp.eq.s32.totalorder %v2947_v8, %v3301_v24 }
 0x70a   :  { %v1500_v52 = vadd.f32 %v1498_v31, %v1476_v13  ;;  %v865_v44 = vpop.permute.xlu2 %864  ;;  %v3308_v31 = vld [vmem:[#allocation19_spill] sm:$0xff] }
 0x70b   :  { %v868_v12 = vsel %vm856_vm11, %v865_v44, 0.0  ;;  %vm1255_vm11 = vcmp.eq.s32.totalorder %v2947_v8, %v3306_v51  ;;  %v1969_v51 = vld [vmem:[%s3231_s10] sm:$0xff] }
 0x70f   :  { %v1515_v28 = vpop.permute.xlu0 %1514 }
 0x710   :  { %v1518_v38 = vsel %vm1508_vm8, %v1515_v28, 0.0  ;;  %vm918_vm8 = vcmp.eq.s32.totalorder %v2947_v8, %v3303_v45  ;;  %v2214_v45 = vld [vmem:[%s3269_s11 + $0x8] sm:$0xff] }
 0x711   :  { %v1520_v36 = vadd.f32 %v1518_v38, %v1500_v52  ;;  %v1535_v39 = vpop.permute.xlu1 %1534  ;;  %v3309_v38 = vld [vmem:[#allocation16_spill] sm:$0xff] }
 0x712   :  { %v1538_v1 = vsel %vm1528_vm9, %v1535_v39, 0.0 }
 0x713   :  { %v1540_v49 = vadd.f32 %v1538_v1, %v1520_v36  ;;  %v1077_v4 = vpop.permute.xlu2 %1076 }
 0x714   :  { %v1080_v53 = vsel %vm1068_vm15, %v1077_v4, 0.0  ;;  %vm1299_vm15 = vcmp.eq.s32.totalorder %v2947_v8, %v3309_v38  ;;  %v1372_v4 = vpack.c.bf16 %v3054_v27, %v3054_v27 }
 0x717   :  { %v1394_v46 = vpop.permute.xlu0 %1393 }
 0x718   :  { %1406 = vmatpush.bf16.msrb.mxu0 %v1394_v46 }
 0x71a   :  { %v1286_v41 = vpop.permute.xlu1 %1285 }
 0x71c   :  { %v905_v47 = vpop.permute.xlu2 %904 }
 0x71d   :  { %v908_v60 = vsel %vm898_vm13, %v905_v47, 0.0  ;;  %vm1548_vm13 = vcmp.eq.s32.totalorder %v2947_v8, %v3307_v33 }
 0x723   :  { %v841_v54 = vpop.permute.xlu1 %840 }
 0x724   :  { %v844_v11 = vsel %vm832_vm10, %v841_v54, 0.0  ;;  %vm1277_vm10 = vcmp.eq.s32.totalorder %v2947_v8, %v3305_v32 }
 0x725   :  { %v870_v61 = vadd.f32 %v868_v12, %v844_v11  ;;  %v1117_v59 = vpop.permute.xlu2 %1116  ;;  %v3311_v12 = vld [vmem:[#allocation10_spill] sm:$0xff] }
 0x726   :  { %v1120_v50 = vsel %vm1110_vm6, %v1117_v59, 0.0  ;;  %vm1359_vm6 = vcmp.eq.s32.totalorder %v2947_v8, %v3311_v12 }
 0x727   :  { %v890_v6 = vadd.f32 %v888_v30, %v870_v61  ;;  %v3304_v30 = vld [vmem:[#allocation12_spill] sm:$0xff] }
 0x728   :  { %vm938_vm9 = vcmp.eq.s32.totalorder %v2947_v8, %v3304_v30  ;;  %v1970_v30 = vld [vmem:[%s3231_s10 + $0x8] sm:$0xff] }
 0x729   :  { %v910_v10 = vadd.f32 %v908_v60, %v890_v6  ;;  %v948_v7 = vsel %vm938_vm9, %v3049_v34, 0.0 }
 0x72c   :  { %v1055_v17 = vpop.permute.xlu1 %1054 }
 0x72d   :  { %v1058_v18 = vsel %vm1046_vm14, %v1055_v17, 0.0  ;;  %vm1568_vm14 = vcmp.eq.s32.totalorder %v2947_v8, %v3308_v31 }
 0x72e   :  { %v1082_v20 = vadd.f32 %v1080_v53, %v1058_v18  ;;  %v1575_v22 = vpop.permute.xlu2 %1574 }
 0x72f   :  { %v1578_v34 = vsel %vm1568_vm14, %v1575_v22, 0.0 }
 0x735   :  { %v1097_v29 = vpop.permute.xlu1 %1096 }
 0x736   :  { %v1100_v3 = vsel %vm1090_vm2, %v1097_v29, 0.0 }
 0x737   :  { %v1102_v19 = vadd.f32 %v1100_v3, %v1082_v20  ;;  %v1366_v58 = vpop.permute.xlu2 %1365 }
 0x738   :  { %v1369_v61 = vsel %vm1359_vm6, %v1366_v58, 0.0  ;;  %vm1800_vm6 = vcmask 523264  }
 0x739   :  { %v1122_v43 = vadd.f32 %v1120_v50, %v1102_v19 }
 0x73b   :  { %v1142_v62 = vadd.f32 %v1140_v57, %v1122_v43  ;;  %v2213_v43 = vld [vmem:[%s3269_s11] sm:$0xff] }
 0x73c   :  { %v3312_v57 = vld [vmem:[#allocation4_spill] sm:$0xff] }
 0x73d   :  { %v1162_v56 = vadd.f32 %v3003_v48, %v1142_v62  ;;  %v1289_v48 = vsel %vm1277_vm10, %v1286_v41, 0.0  ;;  %v3310_v41 = vld [vmem:[#allocation17_spill] sm:$0xff]  ;;  %v601_v62 = vadd.f32 %v2213_v43, %v3312_v57 }
 0x73e   :  { %v925_v26 = vpop.permute.xlu1 %924  ;;  %vm1339_vm2 = vcmp.eq.s32.totalorder %v2947_v8, %v3310_v41 }
 0x73f   :  { %v1164_v37 = vpack.c.bf16 %v1162_v56, %v1162_v56  ;;  %v928_v16 = vsel %vm918_vm8, %v925_v26, 0.0  ;;  %v603_v56 = vsel %vm84_vm0, %v601_v62, 0.0  ;;  %v3313_v26 = vld [vmem:[#allocation5_spill] sm:$0xff] }
 0x740   :  { %v930_v55 = vadd.f32 %v928_v16, %v910_v10  ;;  %v1264_v25 = vpop.permute.xlu2 %1263 }
 0x741   :  { %v1267_v0 = vsel %vm1255_vm11, %v1264_v25, 0.0  ;;  %1923 = vmatmul.msk.bf16.vlgmr.msrb.gmra.mxu2 %vm963_vm12, %v1164_v37  ;;  %v602_v37 = vadd.f32 %v2214_v45, %v3313_v26 }
 0x742   :  { %v950_v14 = vadd.f32 %v948_v7, %v930_v55  ;;  %v1291_v35 = vadd.f32 %v1289_v48, %v1267_v0 }
 0x743   :  { %v606_v16 = vsel %vm84_vm0, %v602_v37, 0.0 }
 0x744   :  { %v956_v42 = vpack.c.bf16 %v950_v14, %v950_v14 }
 0x746   :  { %1921 = vmatmul.msk.bf16.vlgmr.msrb.gmra.mxu3 %vm963_vm12, %v956_v42  ;;  %v2258_v42 = vmov 32.0  }
 0x747   :  { %v1563_v9 = vpop.permute.xlu1 %1562  ;;  %1663 = vmatpush.bf16.msrb.mxu3 %v1970_v30  ;;  %2199 = vrcp.f32 %v2258_v42  ;;  %v1972_v42 = vld [vmem:[%s3234_s12 + $0x8] sm:$0xff] }
 0x748   :  { %vm1567_vm7 = vcmp.eq.s32.totalorder %v2947_v8, %v1563_v9  ;;  %1753 = vmatpush.bf16.msra.mxu0 %v1972_v42 }
 0x749   :  { %v1555_v23 = vpop.permute.xlu2 %1554 }
 0x74a   :  { %v1558_v13 = vsel %vm1548_vm13, %v1555_v23, 0.0 }
 0x74b   :  { %v1560_v52 = vadd.f32 %v1558_v13, %v1540_v49  ;;  %1664 = vmatpush.bf16.msrb.mxu3 %v1969_v51 }
 0x74d   :  { %v1580_v44 = vadd.f32 %v1578_v34, %v1560_v52  ;;  %v2200_v9 = vpop.eup %2199 }
 0x74e   :  { %v610_v33 = vmul.f32 32.0, %v2200_v9 }
 0x74f   :  { %v1582_v28 = vpack.c.bf16 %v1580_v44, %v1580_v44 }
 0x750   :  { %v1306_v36 = vpop.permute.xlu1 %1305  ;;  %v611_v23 = vsub.f32 1.0, %v610_v33  ;;  %v1971_v33 = vld [vmem:[%s3234_s12] sm:$0xff] }
 0x751   :  { %v1309_v39 = vsel %vm1299_vm15, %v1306_v36, 0.0  ;;  %1927 = vmatmul.msk.bf16.vlgmr.msra.gmra.mxu2 %vm963_vm12, %v1582_v28  ;;  %v1571_v49 = vpop.permute.xlu2 %1570  ;;  %1754 = vmatpush.bf16.msra.mxu0 %v1971_v33 }
 0x752   :  { %v1311_v1 = vadd.f32 %v1309_v39, %v1291_v35  ;;  %v1577_v59 = vsel %vm1567_vm7, %v1571_v49, 0.0  ;;  %v612_v13 = vmul.f32 %v2200_v9, %v611_v23 }
 0x753   :  { %v1579_v27 = vadd.f32 %v1577_v59, %v3046_v5 }
 0x754   :  { %v1331_v46 = vadd.f32 %v3025_v21, %v1311_v1  ;;  %v613_v31 = vadd.f32 %v2200_v9, %v612_v13 }
 0x755   :  { %v1581_v10 = vpack.c.bf16 %v1579_v27, %v1579_v27 }
 0x756   :  { %1924 = vmatmul.msk.bf16.vlgmr.msra.gmra.mxu3 %vm963_vm12, %v1372_v4 }
 0x759   :  { %v1346_v47 = vpop.permute.xlu1 %1345 }
 0x75a   :  { %v1349_v54 = vsel %vm1339_vm2, %v1346_v47, 0.0 }
 0x75b   :  { %v1351_v11 = vadd.f32 %v1349_v54, %v1331_v46 }
 0x75d   :  { %v1371_v6 = vadd.f32 %v1369_v61, %v1351_v11 }
 0x75f   :  { %v1373_v21 = vpack.c.bf16 %v1371_v6, %v1371_v6 }
 0x761   :  { %1925 = vmatmul.msk.bf16.vlgmr.msrb.gmra.mxu0 %vm963_vm12, %v1373_v21  ;;  %v1584_v60 = vpop.permute.xlu1 %1583 }
 0x762   :  { %1596 = vmatpush.bf16.msra.mxu1 %v1584_v60 }
 0x765   :  { %1926 = vmatmul.msk.bf16.vlgmr.msra.gmra.mxu1 %vm963_vm12, %v1581_v10 }
 0x766   :  { %v976_v63 = vpop.f32.mrf.mxu2 }
 0x767   :  { %1002 = vst.msk [vmem:[#allocation3] sm:$0xff] %vm109_vm1, %v976_v63 }
 0x76e   :  { %v978_v40 = vpop.f32.mrf.mxu2 }
 0x76f   :  { %v1180_v17 = vpop.f32.mrf.mxu1 }
 0x770   :  { %1205 = vrot.lane.b32.xlu2 %v1180_v17, %s2228_s0 }
 0x777   :  { %v1182_v8 = vpop.f32.mrf.mxu1 }
 0x7c4   :  { %v1199_v53 = vpop.f32.mrf.mxu2 }
 0x7c5   :  { %1207 = vrot.lane.b32.xlu0 %v1199_v53, %s2228_s0 }
 0x7c9   :  { %v998_v5 = vpop.f32.mrf.mxu3 }
 0x7ca   :  { %1003 = vst.msk [vmem:[#allocation3 + $0x8] sm:$0xff] %vm109_vm1, %v998_v5  ;;  %v1206_v18 = vpop.permute.xlu2 %1205  ;;  %vm614_vm1 = vweird.f32 %v2200_v9  ;;  %v2127_v5 = vld [vmem:[%s3232_s16] ss:$0 sm:$0xff] }
 0x7cb   :  { %1211 = vst.msk [vmem:[#allocation3] sm:$0xff] %vm342_vm3, %v1206_v18  ;;  %v3142_v52 = vsel %vm614_vm1, %v2200_v9, %v613_v31 }
 0x7cc   :  { %v1201_v20 = vpop.f32.mrf.mxu2 }
 0x7d1   :  { %v1000_v22 = vpop.f32.mrf.mxu3 }
 0x7d4   :  { %v1617_v15 = vpop.f32.mrf.mxu2 }
 0x7d9   :  { %v1389_v29 = vpop.f32.mrf.mxu3 }
 0x7da   :  { %1414 = vrot.lane.b32.xlu1 %v1389_v29, %s2229_s3  ;;  %v2128_v29 = vld [vmem:[%s3232_s16 + $0x1] ss:$0 sm:$0xff] }
 0x7dc   :  { %v1619_v3 = vpop.f32.mrf.mxu2 }
 0x7de   :  { %v1408_v24 = vpop.f32.mrf.mxu0 }
 0x7df   :  { %1416 = vrot.lane.b32.xlu2 %v1408_v24, %s2229_s3  ;;  %s3314_s3 = sld [smem:[#allocation22_spill]] }
 0x7e1   :  { %v1391_v19 = vpop.f32.mrf.mxu3 }
 0x7e2   :  { %1625 = vrot.lane.b32.xlu1 %v1617_v15, %s2230_s1  ;;  %v1598_v58 = vpop.f32.mrf.mxu1 }
 0x7e3   :  { %1623 = vrot.lane.b32.xlu0 %v1598_v58, %s2230_s1 }
 0x7e5   :  { %v2126_v20 = vld [vmem:[%s3314_s3] ss:$0 sm:$0xff] }
 0x7e6   :  { %v1410_v50 = vpop.f32.mrf.mxu0 }
 0x7ea   :  { %v1600_v2 = vpop.f32.mrf.mxu1 }
 0x808   :  { %604 = vadd.xlane.f32.xlu2 %v603_v56 }
 0x80d   :  { %607 = vadd.xlane.f32.xlu0 %v606_v16 }
 0x837   :  { %v1208_v32 = vpop.permute.xlu0 %1207 }
 0x838   :  { %1212 = vst.msk [vmem:[#allocation3 + $0x8] sm:$0xff] %vm342_vm3, %v1208_v32 }
 0x839   :  { %v1417_v55 = vpop.permute.xlu2 %1416 }
 0x83a   :  { %1421 = vst.msk [vmem:[#allocation3 + $0x8] sm:$0xff] %vm465_vm4, %v1417_v55 }
 0x84c   :  { %v1415_v25 = vpop.permute.xlu1 %1414 }
 0x84d   :  { %1420 = vst.msk [vmem:[#allocation3] sm:$0xff] %vm465_vm4, %v1415_v25 }
 0x854   :  { %v1626_v7 = vpop.permute.xlu1 %1625 }
 0x855   :  { %1630 = vst.msk [vmem:[#allocation3 + $0x8] sm:$0xff] %vm588_vm5, %v1626_v7  ;;  %v1624_v48 = vpop.permute.xlu0 %1623 }
 0x856   :  { %1629 = vst.msk [vmem:[#allocation3] sm:$0xff] %vm588_vm5, %v1624_v48 }
 0x85c   :  { %v1632_v0 = vld [vmem:[#allocation3 + $0x8] sm:$0xff] }
 0x85d   :  { %v1631_v14 = vld [vmem:[#allocation3] sm:$0xff] }
 0x85e   :  { %v1633_v35 = vpack.c.bf16 %v1632_v0, %v1631_v14 }
 0x860   :  { %1936 = vmatmul.msk.bf16.vlgmr.msrb.gmra.mxu3 %vm84_vm0, %v1633_v35 }
 0x87b   :  { %v605_v34 = vpop.xlane.xlu2 %604 }
 0x87c   :  { %v616_v44 = vmul.f32 %v3142_v52, %v605_v34 }
 0x87e   :  { %v618_v28 = vsub.f32 %v601_v62, %v616_v44 }
 0x880   :  { %v608_v38 = vpop.xlane.xlu0 %607  ;;  %v620_v36 = vmul.f32 %v618_v28, %v618_v28 }
 0x881   :  { %v617_v39 = vmul.f32 %v3142_v52, %v608_v38 }
 0x882   :  { %v622_v1 = vsel %vm84_vm0, %v620_v36, 0.0 }
 0x883   :  { %v619_v4 = vsub.f32 %v602_v37, %v617_v39  ;;  %623 = vadd.xlane.f32.xlu1 %v622_v1 }
 0x885   :  { %v621_v46 = vmul.f32 %v619_v4, %v619_v4 }
 0x887   :  { %v625_v41 = vsel %vm84_vm0, %v621_v46, 0.0 }
 0x888   :  { %626 = vadd.xlane.f32.xlu2 %v625_v41 }
 0x8e3   :  { %v1666_v40 = vpop.f32.mrf.mxu3 }
 0x8e4   :  { %v1667_v19 = vadd.f32 %v2126_v20, %v1666_v40 }
 0x8eb   :  { %v1668_v43 = vpop.f32.mrf.mxu3 }
 0x8ec   :  { %v1669_v45 = vadd.f32 %v2126_v20, %v1668_v43 }
 0x8f6   :  { %v624_v49 = vpop.xlane.xlu1 %623 }
 0x8f7   :  { %v628_v47 = vmul.f32 %v624_v49, %v3142_v52 }
 0x8f9   :  { %v630_v54 = vadd.f32 1e-05, %v628_v47 }
 0x8fb   :  { %2201 = vrsqrt.f32 %v630_v54  ;;  %v627_v12 = vpop.xlane.xlu2 %626  ;;  %vm638_vm4 = vweird.f32 %v630_v54 }
 0x8fc   :  { %v629_v11 = vmul.f32 %v627_v12, %v3142_v52 }
 0x8fe   :  { %v631_v61 = vadd.f32 1e-05, %v629_v11  ;;  %v2129_v11 = vld [vmem:[%s3232_s16 + $0x2] ss:$0 sm:$0xff] }
 0x900   :  { %2203 = vrsqrt.f32 %v631_v61  ;;  %vm648_vm8 = vweird.f32 %v631_v61 }
 0x901   :  { %v2202_v59 = vpop.eup %2201 }
 0x902   :  { %v633_v6 = vmul.f32 %v2202_v59, %v630_v54  ;;  %vm639_vm3 = vweird.f32 %v2202_v59 }
 0x903   :  { %vm640_vm5 = vmor %vm638_vm4, %vm639_vm3 }
 0x904   :  { %v634_v27 = vmul.f32 %v2202_v59, %v633_v6 }
 0x906   :  { %v2204_v21 = vpop.eup %2203  ;;  %v635_v60 = vmul.f32 0.5, %v634_v27  ;;  %v2130_v27 = vld [vmem:[%s3232_s16 + $0x3] ss:$0 sm:$0xff] }
 0x907   :  { %v643_v10 = vmul.f32 %v2204_v21, %v631_v61  ;;  %vm649_vm12 = vweird.f32 %v2204_v21 }
 0x908   :  { %v636_v63 = vsub.f32 1.5, %v635_v60  ;;  %vm650_vm9 = vmor %vm648_vm8, %vm649_vm12 }
 0x909   :  { %v644_v17 = vmul.f32 %v2204_v21, %v643_v10 }
 0x90a   :  { %v637_v8 = vmul.f32 %v2202_v59, %v636_v63 }
 0x90b   :  { %v645_v53 = vmul.f32 0.5, %v644_v17 }
 0x90c   :  { %v641_v18 = vsel %vm640_vm5, %v2202_v59, %v637_v8  ;;  %v1976_v8 = vld [vmem:[%s3236_s14 + $0x18] sm:$0xff] }
 0x90d   :  { %v646_v22 = vsub.f32 1.5, %v645_v53  ;;  %v652_v15 = vmul.f32 %v641_v18, %v618_v28  ;;  %1808 = vmatpush.bf16.msrb.mxu1 %v1976_v8  ;;  %v1975_v53 = vld [vmem:[%s3236_s14 + $0x10] sm:$0xff]  ;;  %v1973_v18 = vld [vmem:[%s3236_s14] sm:$0xff] }
 0x90f   :  { %v647_v3 = vmul.f32 %v2204_v21, %v646_v22  ;;  %v655_v24 = vmul.f32 %v2127_v5, %v652_v15  ;;  %v2131_v22 = vld [vmem:[%s3233_s13] ss:$0 sm:$0xff] }
 0x911   :  { %v651_v58 = vsel %vm650_vm9, %v2204_v21, %v647_v3  ;;  %v658_v50 = vadd.f32 %v2128_v29, %v655_v24  ;;  %1809 = vmatpush.bf16.msrb.mxu1 %v1975_v53 }
 0x912   :  { %v653_v2 = vmul.f32 %v651_v58, %v619_v4 }
 0x913   :  { %v1671_v57 = vadd.f32 %v1667_v19, %v658_v50  ;;  %v2132_v50 = vld [vmem:[%s3235_s15] ss:$0 sm:$0xff] }
 0x914   :  { %v656_v62 = vmul.f32 %v2127_v5, %v653_v2  ;;  %v1974_v5 = vld [vmem:[%s3236_s14 + $0x8] sm:$0xff] }
 0x915   :  { %v1673_v56 = vsel %vm84_vm0, %v1671_v57, 0.0  ;;  %1810 = vmatpush.bf16.msrb.mxu1 %v1974_v5 }
 0x916   :  { %1674 = vadd.xlane.f32.xlu0 %v1673_v56  ;;  %v659_v26 = vadd.f32 %v2128_v29, %v656_v62 }
 0x918   :  { %v1672_v37 = vadd.f32 %v1669_v45, %v659_v26 }
 0x919   :  { %1811 = vmatpush.bf16.msrb.mxu1 %v1973_v18 }
 0x91a   :  { %v1676_v16 = vsel %vm84_vm0, %v1672_v37, 0.0 }
 0x91b   :  { %1677 = vadd.xlane.f32.xlu1 %v1676_v16 }
 0x989   :  { %v1675_v30 = vpop.xlane.xlu0 %1674 }
 0x98a   :  { %v1679_v32 = vmul.f32 %v1675_v30, %v3142_v52 }
 0x98c   :  { %v1681_v51 = vsub.f32 %v1671_v57, %v1679_v32 }
 0x98e   :  { %v1678_v55 = vpop.xlane.xlu1 %1677  ;;  %v1683_v25 = vmul.f32 %v1681_v51, %v1681_v51 }
 0x98f   :  { %v1680_v7 = vmul.f32 %v1678_v55, %v3142_v52 }
 0x990   :  { %v1685_v48 = vsel %vm84_vm0, %v1683_v25, 0.0 }
 0x991   :  { %v1682_v0 = vsub.f32 %v1672_v37, %v1680_v7  ;;  %1686 = vadd.xlane.f32.xlu2 %v1685_v48 }
 0x993   :  { %v1684_v14 = vmul.f32 %v1682_v0, %v1682_v0 }
 0x995   :  { %v1688_v35 = vsel %vm84_vm0, %v1684_v14, 0.0 }
 0x996   :  { %1689 = vadd.xlane.f32.xlu0 %v1688_v35 }
 0xa04   :  { %v1687_v9 = vpop.xlane.xlu2 %1686 }
 0xa05   :  { %v1691_v23 = vmul.f32 %v1687_v9, %v3142_v52 }
 0xa07   :  { %v1693_v13 = vadd.f32 1e-05, %v1691_v23 }
 0xa09   :  { %2205 = vrsqrt.f32 %v1693_v13  ;;  %v1690_v31 = vpop.xlane.xlu0 %1689  ;;  %vm1701_vm11 = vweird.f32 %v1693_v13 }
 0xa0a   :  { %v1692_v34 = vmul.f32 %v1690_v31, %v3142_v52 }
 0xa0c   :  { %v1694_v44 = vadd.f32 1e-05, %v1692_v34 }
 0xa0e   :  { %2207 = vrsqrt.f32 %v1694_v44  ;;  %vm1711_vm15 = vweird.f32 %v1694_v44 }
 0xa0f   :  { %v2206_v28 = vpop.eup %2205 }
 0xa10   :  { %v1696_v38 = vmul.f32 %v2206_v28, %v1693_v13  ;;  %vm1702_vm10 = vweird.f32 %v2206_v28 }
 0xa11   :  { %vm1703_vm13 = vmor %vm1701_vm11, %vm1702_vm10 }
 0xa12   :  { %v1697_v36 = vmul.f32 %v2206_v28, %v1696_v38 }
 0xa14   :  { %v2208_v39 = vpop.eup %2207  ;;  %v1698_v1 = vmul.f32 0.5, %v1697_v36 }
 0xa15   :  { %v1706_v4 = vmul.f32 %v2208_v39, %v1694_v44  ;;  %vm1712_vm14 = vweird.f32 %v2208_v39 }
 0xa16   :  { %v1699_v46 = vsub.f32 1.5, %v1698_v1  ;;  %vm1713_vm2 = vmor %vm1711_vm15, %vm1712_vm14 }
 0xa17   :  { %v1707_v41 = vmul.f32 %v2208_v39, %v1706_v4  ;;  %v2133_v4 = vld [vmem:[%s3232_s16 + $0x4] ss:$0 sm:$0xff] }
 0xa18   :  { %v1700_v49 = vmul.f32 %v2206_v28, %v1699_v46 }
 0xa19   :  { %v1708_v47 = vmul.f32 0.5, %v1707_v41 }
 0xa1a   :  { %v1704_v54 = vsel %vm1703_vm13, %v2206_v28, %v1700_v49 }
 0xa1b   :  { %v1709_v12 = vsub.f32 1.5, %v1708_v47  ;;  %v1715_v61 = vmul.f32 %v1704_v54, %v1681_v51 }
 0xa1d   :  { %v1710_v59 = vmul.f32 %v2208_v39, %v1709_v12  ;;  %v1718_v21 = vmul.f32 %v2129_v11, %v1715_v61 }
 0xa1f   :  { %v1714_v6 = vsel %vm1713_vm2, %v2208_v39, %v1710_v59  ;;  %v1721_v63 = vadd.f32 %v2130_v27, %v1718_v21 }
 0xa20   :  { %v1716_v60 = vmul.f32 %v1714_v6, %v1682_v0 }
 0xa22   :  { %v1719_v10 = vmul.f32 %v2129_v11, %v1716_v60 }
 0xa24   :  { %v1722_v40 = vadd.f32 %v2130_v27, %v1719_v10 }
 0xa26   :  { %v1723_v17 = vpack.c.bf16 %v1722_v40, %v1721_v63 }
 0xa28   :  { %1945 = vmatmul.msk.bf16.vlgmr.msra.gmra.mxu0 %vm84_vm0, %v1723_v17 }
 0xaa5   :  { %v1756_v20 = vpop.f32.mrf.mxu0 }
 0xaa6   :  { %v1757_v15 = vadd.f32 %v2131_v22, %v1756_v20 }
 0xaa8   :  { %v1761_v24 = vmax.f32 %v1757_v15, 0.0 }
 0xaad   :  { %v1758_v29 = vpop.f32.mrf.mxu0 }
 0xaae   :  { %v1759_v3 = vadd.f32 %v2131_v22, %v1758_v29 }
 0xab0   :  { %v1762_v19 = vmax.f32 %v1759_v3, 0.0 }
 0xab2   :  { %v1763_v58 = vpack.c.bf16 %v1762_v19, %v1761_v24 }
 0xab4   :  { %1962 = vmatmul.msk.bf16.vlgmr.msrb.gmra.mxu1 %vm1800_vm6, %v1763_v58 }
 0xb31   :  { %v1813_v2 = vpop.f32.mrf.mxu1 }
 0xb32   :  { %v1814_v43 = vadd.f32 %v2132_v50, %v1813_v2 }
 0xb34   :  { %v1818_v57 = vadd.f32 %v1814_v43, %v1721_v63 }
 0xb36   :  { %v1820_v62 = vsel %vm84_vm0, %v1818_v57, 0.0 }
 0xb37   :  { %1821 = vadd.xlane.f32.xlu1 %v1820_v62 }
 0xb39   :  { %v1815_v56 = vpop.f32.mrf.mxu1 }
 0xb3a   :  { %v1816_v45 = vadd.f32 %v2132_v50, %v1815_v56 }
 0xb3c   :  { %v1819_v26 = vadd.f32 %v1816_v45, %v1722_v40 }
 0xb3e   :  { %v1823_v37 = vsel %vm84_vm0, %v1819_v26, 0.0 }
 0xb3f   :  { %1824 = vadd.xlane.f32.xlu2 %v1823_v37 }
 0xbaa   :  { %v1822_v16 = vpop.xlane.xlu1 %1821 }
 0xbab   :  { %v1826_v30 = vmul.f32 %v1822_v16, %v3142_v52 }
 0xbad   :  { %v1828_v32 = vsub.f32 %v1818_v57, %v1826_v30 }
 0xbaf   :  { %v1830_v51 = vmul.f32 %v1828_v32, %v1828_v32 }
 0xbb1   :  { %v1832_v55 = vsel %vm84_vm0, %v1830_v51, 0.0 }
 0xbb2   :  { %v1825_v25 = vpop.xlane.xlu2 %1824  ;;  %1833 = vadd.xlane.f32.xlu0 %v1832_v55 }
 0xbb3   :  { %v1827_v7 = vmul.f32 %v1825_v25, %v3142_v52 }
 0xbb5   :  { %v1829_v48 = vsub.f32 %v1819_v26, %v1827_v7 }
 0xbb7   :  { %v1831_v0 = vmul.f32 %v1829_v48, %v1829_v48 }
 0xbb9   :  { %v1835_v14 = vsel %vm84_vm0, %v1831_v0, 0.0 }
 0xbba   :  { %1836 = vadd.xlane.f32.xlu1 %v1835_v14 }
 0xc25   :  { %v1834_v35 = vpop.xlane.xlu0 %1833 }
 0xc26   :  { %v1838_v42 = vmul.f32 %v1834_v35, %v3142_v52 }
 0xc28   :  { %v1840_v9 = vadd.f32 1e-05, %v1838_v42 }
 0xc2a   :  { %2209 = vrsqrt.f32 %v1840_v9  ;;  %vm1848_vm1 = vweird.f32 %v1840_v9 }
 0xc2d   :  { %v1837_v33 = vpop.xlane.xlu1 %1836 }
 0xc2e   :  { %v1839_v23 = vmul.f32 %v1837_v33, %v3142_v52  ;;  %v2134_v52 = vld [vmem:[%s3232_s16 + $0x5] ss:$0 sm:$0xff] }
 0xc30   :  { %v2210_v13 = vpop.eup %2209  ;;  %v1841_v31 = vadd.f32 1e-05, %v1839_v23 }
 0xc31   :  { %v1843_v34 = vmul.f32 %v2210_v13, %v1840_v9  ;;  %vm1849_vm7 = vweird.f32 %v2210_v13 }
 0xc32   :  { %2211 = vrsqrt.f32 %v1841_v31  ;;  %vm1850_vm3 = vmor %vm1848_vm1, %vm1849_vm7  ;;  %vm1858_vm5 = vweird.f32 %v1841_v31 }
 0xc33   :  { %v1844_v44 = vmul.f32 %v2210_v13, %v1843_v34 }
 0xc35   :  { %v1845_v28 = vmul.f32 0.5, %v1844_v44 }
 0xc37   :  { %v1846_v38 = vsub.f32 1.5, %v1845_v28 }
 0xc38   :  { %v2212_v36 = vpop.eup %2211 }
 0xc39   :  { %v1847_v39 = vmul.f32 %v2210_v13, %v1846_v38  ;;  %v1853_v1 = vmul.f32 %v2212_v36, %v1841_v31  ;;  %vm1859_vm4 = vweird.f32 %v2212_v36 }
 0xc3a   :  { %vm1860_vm12 = vmor %vm1858_vm5, %vm1859_vm4 }
 0xc3b   :  { %v1851_v46 = vsel %vm1850_vm3, %v2210_v13, %v1847_v39  ;;  %v1854_v41 = vmul.f32 %v2212_v36, %v1853_v1 }
 0xc3c   :  { %v1862_v49 = vmul.f32 %v1851_v46, %v1828_v32 }
 0xc3d   :  { %v1855_v47 = vmul.f32 0.5, %v1854_v41 }
 0xc3e   :  { %v1865_v54 = vmul.f32 %v2133_v4, %v1862_v49 }
 0xc3f   :  { %v1856_v12 = vsub.f32 1.5, %v1855_v47 }
 0xc40   :  { %v1868_v11 = vadd.f32 %v2134_v52, %v1865_v54 }
 0xc41   :  { %v1857_v61 = vmul.f32 %v2212_v36, %v1856_v12 }
 0xc42   :  { %1870 = vst.msk [vmem:[%s3237_s17] sm:$0xff] %vm84_vm0, %v1868_v11 }
 0xc43   :  { %v1861_v59 = vsel %vm1860_vm12, %v2212_v36, %v1857_v61 }
 0xc44   :  { %v1863_v6 = vmul.f32 %v1861_v59, %v1829_v48 }
 0xc46   :  { %v1866_v27 = vmul.f32 %v2133_v4, %v1863_v6 }
 0xc48   :  { %v1869_v21 = vadd.f32 %v2134_v52, %v1866_v27 }
 0xc4a   :  { %1871 = vst.msk [vmem:[%s3237_s17 + $0x8] sm:$0xff] %vm84_vm0, %v1869_v21 }

</bundles_post_ra>
